<compile_context>
chip_gen: v5e
topology: v5e:2x2
jax: 0.10.0
libtpu: 0.0.40
codegen_flags: <defaults>
</compile_context>

<pallas_src>
import math

import jax
import jax.numpy as jnp
from jax.experimental import pallas as pl
from jax.experimental.pallas import tpu as pltpu  # noqa: F401  (TPU backend assumed)

# ----- model configuration (small, synthetic) -----
HIDDEN = 32
NUM_HEADS = 4
HEAD_DIM = HIDDEN // NUM_HEADS
INTERMEDIATE = 64
NUM_LAYERS = 2
VOCAB = 100
VOCAB_PAD = 128          # lane-dense one-hot width (>= VOCAB)
MAX_POS = 16
NUM_LABELS = 3
LABELS_PAD = 128         # lane-dense classifier output width (>= NUM_LABELS)
LN_EPS_EMB = 1e-12       # Embeddings LayerNorm eps
LN_EPS_LAYER = 1e-5      # encoder-layer LayerNorm eps (nn.LayerNorm default)
NEG_INF = -1e30          # additive mask value for cross-sequence attention


def _layer_norm(x, g, b, eps):
    mu = jnp.mean(x, axis=-1, keepdims=True)
    var = jnp.mean((x - mu) ** 2, axis=-1, keepdims=True)
    return (x - mu) * jax.lax.rsqrt(var + eps) * g + b


# ---------------- fused forward kernel (whole batch, single invocation) ----------------
def fused_forward_kernel(
        ids_ref,                      # (B*S, 1) int32 token ids
        bias_ref,                     # (B*S, B*S) f32 block-diagonal additive attention mask
        tok_ref,                      # (VOCAB_PAD, H) token embedding table
        pos_ref,                      # (B*S, H) position embeddings, pre-tiled over batch
        eg_ref, eb_ref,               # embedding LayerNorm gamma/beta (1, H)
        ln1g_ref, ln1b_ref,           # (L, 1, H)
        wq_ref, bq_ref,               # (L, NH, H, HD), (L, NH, 1, HD) -- 1/sqrt(HD) folded in
        wk_ref, bk_ref,               # (L, NH, H, HD), (L, NH, 1, HD)
        wv_ref, bv_ref,               # (L, NH, H, HD), (L, NH, 1, HD)
        wo_ref, bo_ref,               # (L, NH, HD, H), (L, 1, H)
        ln2g_ref, ln2b_ref,           # (L, 1, H)
        w1_ref, b1_ref,               # (L, H, I), (L, 1, I)
        w2_ref, b2_ref,               # (L, I, H), (L, 1, H)
        clsw_ref, clsb_ref,           # (H, LABELS_PAD), (1, LABELS_PAD)
        o_ref):                       # (B, LABELS_PAD)
    BS = ids_ref.shape[0]
    B = o_ref.shape[0]
    S = BS // B

    # --- embeddings: one-hot token gather (MXU) + position embedding + LayerNorm ---
    ids = ids_ref[...]                                                 # (BS, 1)
    vocab_iota = jax.lax.broadcasted_iota(jnp.int32, (BS, VOCAB_PAD), 1)
    onehot = jnp.where(vocab_iota == ids, 1.0, 0.0)                    # (BS, VOCAB_PAD)
    x = jnp.dot(onehot, tok_ref[...], preferred_element_type=jnp.float32)
    x = x + pos_ref[...]
    x = _layer_norm(x, eg_ref[...], eb_ref[...], LN_EPS_EMB)           # (BS, H)

    bias = bias_ref[...]                                               # (BS, BS)

    for li in range(NUM_LAYERS):                                       # static unroll
        # --- multi-head self-attention (pre-LN); per-head weights are pre-split so there
        #     is no lane-slicing of activations and no lane-concatenation of head outputs ---
        h = _layer_norm(x, ln1g_ref[li], ln1b_ref[li], LN_EPS_LAYER)
        attn = bo_ref[li]                                              # (1, H) output bias
        for n in range(NUM_HEADS):                                     # static unroll
            qh = jnp.dot(h, wq_ref[li, n],
                         preferred_element_type=jnp.float32) + bq_ref[li, n]   # (BS, HD)
            kh = jnp.dot(h, wk_ref[li, n],
                         preferred_element_type=jnp.float32) + bk_ref[li, n]
            vh = jnp.dot(h, wv_ref[li, n],
                         preferred_element_type=jnp.float32) + bv_ref[li, n]
            # scores over all B*S rows; block-diagonal mask => per-sequence attention
            s = jax.lax.dot_general(qh, kh, (((1,), (1,)), ((), ())),
                                    preferred_element_type=jnp.float32) + bias  # (BS, BS)
            s = s - jnp.max(s, axis=-1, keepdims=True)
            e = jnp.exp(s)
            p = e * pl.reciprocal(jnp.sum(e, axis=-1, keepdims=True), approx=True)
            ctx = jnp.dot(p, vh, preferred_element_type=jnp.float32)   # (BS, HD)
            attn = attn + jnp.dot(ctx, wo_ref[li, n],
                                  preferred_element_type=jnp.float32)  # (BS, H)
        x = x + attn

        # --- feed-forward (pre-LN) ---
        h2 = _layer_norm(x, ln2g_ref[li], ln2b_ref[li], LN_EPS_LAYER)
        ff = jnp.dot(h2, w1_ref[li], preferred_element_type=jnp.float32) + b1_ref[li]
        # TODO(synk): nn.GELU() is exact-erf; tanh approximation used for safe EUP lowering.
        ff = jax.nn.gelu(ff, approximate=True)
        ff = jnp.dot(ff, w2_ref[li], preferred_element_type=jnp.float32) + b2_ref[li]
        x = x + ff

    # --- classifier on all rows (tiny), then pick each sequence's [CLS] row ---
    logits = jnp.dot(x, clsw_ref[...],
                     preferred_element_type=jnp.float32) + clsb_ref[...]   # (BS, LABELS_PAD)
    for b in range(B):                                                  # static unroll
        o_ref[pl.ds(b, 1), :] = logits[b * S:b * S + 1, :]


# ---------------- wrapper-side parameter plumbing (done once) ----------------
def _split_heads(w, b):
    """nn.Linear-style (H, H), (1, H) -> per-head (NH, H, HD), (NH, 1, HD)."""
    w_h = w.reshape(HIDDEN, NUM_HEADS, HEAD_DIM).transpose(1, 0, 2)
    b_h = b.reshape(1, NUM_HEADS, HEAD_DIM).transpose(1, 0, 2)
    return w_h, b_h


def pack_params(params, batch, seq_len):
    """One-time packing of the parameter dict into kernel-ready, layer-stacked arrays."""
    scale = 1.0 / math.sqrt(HEAD_DIM)
    seq_id = jnp.repeat(jnp.arange(batch, dtype=jnp.int32), seq_len)     # (B*S,)
    bias = jnp.where(seq_id[:, None] == seq_id[None, :], 0.0, NEG_INF).astype(jnp.float32)

    stacked = {k: [] for k in ('ln1g', 'ln1b', 'wq', 'bq', 'wk', 'bk', 'wv', 'bv',
                               'wo', 'bo', 'ln2g', 'ln2b', 'w1', 'b1', 'w2', 'b2')}
    for lp in params['layers']:
        wq, bq = _split_heads(lp['wq'] * scale, lp['bq'] * scale)  # fold 1/sqrt(HD) into Q
        wk, bk = _split_heads(lp['wk'], lp['bk'])
        wv, bv = _split_heads(lp['wv'], lp['bv'])
        vals = dict(ln1g=lp['ln1_g'], ln1b=lp['ln1_b'], wq=wq, bq=bq, wk=wk, bk=bk,
                    wv=wv, bv=bv, wo=lp['wo'].reshape(NUM_HEADS, HEAD_DIM, HIDDEN),
                    bo=lp['bo'], ln2g=lp['ln2_g'], ln2b=lp['ln2_b'],
                    w1=lp['w1'], b1=lp['b1'], w2=lp['w2'], b2=lp['b2'])
        for k, v in vals.items():
            stacked[k].append(v)
    stacked = {k: jnp.stack(v) for k, v in stacked.items()}

    return {
        'bias': bias,
        'tok': jnp.pad(params['tok_table'], ((0, VOCAB_PAD - VOCAB), (0, 0))),
        'pos': jnp.tile(params['pos_table'][:seq_len], (batch, 1)),
        'eg': params['emb_ln_g'], 'eb': params['emb_ln_b'],
        'clsw': jnp.pad(params['cls_w'], ((0, 0), (0, LABELS_PAD - NUM_LABELS))),
        'clsb': jnp.pad(params['cls_b'], ((0, 0), (0, LABELS_PAD - NUM_LABELS))),
        **stacked,
    }


@jax.jit
def sequence_classification(packed, input_ids):
    B, S = input_ids.shape
    ids = input_ids.astype(jnp.int32).reshape(B * S, 1)

    out = pl.pallas_call(
        fused_forward_kernel,
        out_shape=jax.ShapeDtypeStruct((B, LABELS_PAD), jnp.float32),
    )(ids, packed['bias'], packed['tok'], packed['pos'], packed['eg'], packed['eb'],
      packed['ln1g'], packed['ln1b'],
      packed['wq'], packed['bq'], packed['wk'], packed['bk'], packed['wv'], packed['bv'],
      packed['wo'], packed['bo'], packed['ln2g'], packed['ln2b'],
      packed['w1'], packed['b1'], packed['w2'], packed['b2'],
      packed['clsw'], packed['clsb'])

    # TODO(synk): nn.Dropout before the classifier is eval-mode identity (no RNG/training flag).
    return out[:, :NUM_LABELS]


# ---------------- parameter construction (deterministic, synthetic) ----------------
def init_params(key):
    def nrm(k, shape, scale=0.02):
        return (scale * jax.random.normal(k, shape)).astype(jnp.float32)

    keys = jax.random.split(key, 4 + NUM_LAYERS)
    params = {
        'tok_table': nrm(keys[0], (VOCAB, HIDDEN)),
        'pos_table': nrm(keys[1], (MAX_POS, HIDDEN)),
        'emb_ln_g': jnp.ones((1, HIDDEN), jnp.float32),
        'emb_ln_b': jnp.zeros((1, HIDDEN), jnp.float32),
        'cls_w': nrm(keys[2], (HIDDEN, NUM_LABELS)),
        'cls_b': jnp.zeros((1, NUM_LABELS), jnp.float32),
        'layers': [],
    }
    for li in range(NUM_LAYERS):
        lk = jax.random.split(keys[4 + li], 6)
        params['layers'].append({
            'ln1_g': jnp.ones((1, HIDDEN), jnp.float32),
            'ln1_b': jnp.zeros((1, HIDDEN), jnp.float32),
            'wq': nrm(lk[0], (HIDDEN, HIDDEN)), 'bq': jnp.zeros((1, HIDDEN), jnp.float32),
            'wk': nrm(lk[1], (HIDDEN, HIDDEN)), 'bk': jnp.zeros((1, HIDDEN), jnp.float32),
            'wv': nrm(lk[2], (HIDDEN, HIDDEN)), 'bv': jnp.zeros((1, HIDDEN), jnp.float32),
            'wo': nrm(lk[3], (HIDDEN, HIDDEN)), 'bo': jnp.zeros((1, HIDDEN), jnp.float32),
            'ln2_g': jnp.ones((1, HIDDEN), jnp.float32),
            'ln2_b': jnp.zeros((1, HIDDEN), jnp.float32),
            'w1': nrm(lk[4], (HIDDEN, INTERMEDIATE)),
            'b1': jnp.zeros((1, INTERMEDIATE), jnp.float32),
            'w2': nrm(lk[5], (INTERMEDIATE, HIDDEN)),
            'b2': jnp.zeros((1, HIDDEN), jnp.float32),
        })
    return params


if __name__ == "__main__":
    key = jax.random.PRNGKey(0)
    pkey, dkey = jax.random.split(key)
    params = init_params(pkey)

    B, S = 2, 8
    input_ids = jax.random.randint(dkey, (B, S), minval=0, maxval=VOCAB, dtype=jnp.int32)

    packed = pack_params(params, batch=B, seq_len=S)
    logits = sequence_classification(packed, input_ids)
    jax.block_until_ready(logits)
    assert logits.shape == (B, NUM_LABELS) and logits.dtype == jnp.float32
    print("KERNEL_OK")
</pallas_src>

<mosaic_0001>
module attributes {stable_mosaic.version = 11 : i64} {
  func.func @fused_forward_kernel(%arg0: memref<16x1xi32, #tpu.memory_space<vmem>>, %arg1: memref<16x16xf32, #tpu.memory_space<vmem>>, %arg2: memref<128x32xf32, #tpu.memory_space<vmem>>, %arg3: memref<16x32xf32, #tpu.memory_space<vmem>>, %arg4: memref<1x32xf32, #tpu.memory_space<vmem>>, %arg5: memref<1x32xf32, #tpu.memory_space<vmem>>, %arg6: memref<2x1x32xf32, #tpu.memory_space<vmem>>, %arg7: memref<2x1x32xf32, #tpu.memory_space<vmem>>, %arg8: memref<2x4x32x8xf32, #tpu.memory_space<vmem>>, %arg9: memref<2x4x1x8xf32, #tpu.memory_space<vmem>>, %arg10: memref<2x4x32x8xf32, #tpu.memory_space<vmem>>, %arg11: memref<2x4x1x8xf32, #tpu.memory_space<vmem>>, %arg12: memref<2x4x32x8xf32, #tpu.memory_space<vmem>>, %arg13: memref<2x4x1x8xf32, #tpu.memory_space<vmem>>, %arg14: memref<2x4x8x32xf32, #tpu.memory_space<vmem>>, %arg15: memref<2x1x32xf32, #tpu.memory_space<vmem>>, %arg16: memref<2x1x32xf32, #tpu.memory_space<vmem>>, %arg17: memref<2x1x32xf32, #tpu.memory_space<vmem>>, %arg18: memref<2x32x64xf32, #tpu.memory_space<vmem>>, %arg19: memref<2x1x64xf32, #tpu.memory_space<vmem>>, %arg20: memref<2x64x32xf32, #tpu.memory_space<vmem>>, %arg21: memref<2x1x32xf32, #tpu.memory_space<vmem>>, %arg22: memref<32x128xf32, #tpu.memory_space<vmem>>, %arg23: memref<1x128xf32, #tpu.memory_space<vmem>>, %arg24: memref<2x128xf32, #tpu.memory_space<vmem>>) attributes {dimension_semantics = [], scalar_prefetch = 0 : i64, scratch_operands = 0 : i64, tpu.core_type = #tpu.core_type<tc>} {
    %c0 = arith.constant 0 : index
    %c0_0 = arith.constant 0 : index
    %0 = vector.load %arg0[%c0, %c0_0] : memref<16x1xi32, #tpu.memory_space<vmem>>, vector<16x1xi32>
    %1 = tpu.iota {dimensions = array<i32: 1>} : vector<16x128xi32>
    %2 = vector.broadcast %0 : vector<16x1xi32> to vector<16x128xi32>
    %3 = arith.cmpi eq, %1, %2 : vector<16x128xi32>
    %cst = arith.constant 1.000000e+00 : f32
    %cst_1 = arith.constant 0.000000e+00 : f32
    %4 = vector.broadcast %cst : f32 to vector<16x128xf32>
    %5 = vector.broadcast %cst_1 : f32 to vector<16x128xf32>
    %6 = arith.select %3, %4, %5 : vector<16x128xi1>, vector<16x128xf32>
    %c0_2 = arith.constant 0 : index
    %c0_3 = arith.constant 0 : index
    %7 = vector.load %arg2[%c0_2, %c0_3] : memref<128x32xf32, #tpu.memory_space<vmem>>, vector<128x32xf32>
    %cst_4 = arith.constant dense<0.000000e+00> : vector<16x32xf32>
    %8 = tpu.matmul %6, %7, %cst_4 {dimension_numbers = #tpu.dot_dimension_numbers<[1], [0], [0], [1], [0, 0, 1, 1], [], []>} : vector<16x128xf32>, vector<128x32xf32>, vector<16x32xf32> -> vector<16x32xf32>
    %c0_5 = arith.constant 0 : index
    %c0_6 = arith.constant 0 : index
    %9 = vector.load %arg3[%c0_5, %c0_6] : memref<16x32xf32, #tpu.memory_space<vmem>>, vector<16x32xf32>
    %10 = arith.addf %8, %9 : vector<16x32xf32>
    %c0_7 = arith.constant 0 : index
    %c0_8 = arith.constant 0 : index
    %11 = vector.load %arg4[%c0_7, %c0_8] : memref<1x32xf32, #tpu.memory_space<vmem>>, vector<1x32xf32>
    %c0_9 = arith.constant 0 : index
    %c0_10 = arith.constant 0 : index
    %12 = vector.load %arg5[%c0_9, %c0_10] : memref<1x32xf32, #tpu.memory_space<vmem>>, vector<1x32xf32>
    %cst_11 = arith.constant dense<0.000000e+00> : vector<16xf32>
    %13 = vector.multi_reduction <add>, %10, %cst_11 [1] : vector<16x32xf32> to vector<16xf32>
    %14 = vector.shape_cast %13 : vector<16xf32> to vector<16x1xf32>
    %cst_12 = arith.constant 3.200000e+01 : f32
    %15 = vector.broadcast %cst_12 : f32 to vector<16x1xf32>
    %16 = arith.divf %14, %15 : vector<16x1xf32>
    %17 = vector.broadcast %16 : vector<16x1xf32> to vector<16x32xf32>
    %18 = arith.subf %10, %17 : vector<16x32xf32>
    %19 = arith.mulf %18, %18 : vector<16x32xf32>
    %cst_13 = arith.constant dense<0.000000e+00> : vector<16xf32>
    %20 = vector.multi_reduction <add>, %19, %cst_13 [1] : vector<16x32xf32> to vector<16xf32>
    %21 = vector.shape_cast %20 : vector<16xf32> to vector<16x1xf32>
    %cst_14 = arith.constant 3.200000e+01 : f32
    %22 = vector.broadcast %cst_14 : f32 to vector<16x1xf32>
    %23 = arith.divf %21, %22 : vector<16x1xf32>
    %24 = vector.broadcast %16 : vector<16x1xf32> to vector<16x32xf32>
    %25 = arith.subf %10, %24 : vector<16x32xf32>
    %cst_15 = arith.constant 9.99999996E-13 : f32
    %26 = vector.broadcast %cst_15 : f32 to vector<16x1xf32>
    %27 = arith.addf %23, %26 : vector<16x1xf32>
    %28 = math.rsqrt %27 : vector<16x1xf32>
    %29 = vector.broadcast %28 : vector<16x1xf32> to vector<16x32xf32>
    %30 = arith.mulf %25, %29 : vector<16x32xf32>
    %31 = vector.broadcast %11 : vector<1x32xf32> to vector<16x32xf32>
    %32 = arith.mulf %30, %31 : vector<16x32xf32>
    %33 = vector.broadcast %12 : vector<1x32xf32> to vector<16x32xf32>
    %34 = arith.addf %32, %33 : vector<16x32xf32>
    %c0_16 = arith.constant 0 : index
    %c0_17 = arith.constant 0 : index
    %35 = vector.load %arg1[%c0_16, %c0_17] : memref<16x16xf32, #tpu.memory_space<vmem>>, vector<16x16xf32>
    %c0_18 = arith.constant 0 : index
    %c0_19 = arith.constant 0 : index
    %c0_20 = arith.constant 0 : index
    %36 = vector.load %arg6[%c0_18, %c0_19, %c0_20] : memref<2x1x32xf32, #tpu.memory_space<vmem>>, vector<1x1x32xf32>
    %37 = vector.shape_cast %36 : vector<1x1x32xf32> to vector<1x32xf32>
    %c0_21 = arith.constant 0 : index
    %c0_22 = arith.constant 0 : index
    %c0_23 = arith.constant 0 : index
    %38 = vector.load %arg7[%c0_21, %c0_22, %c0_23] : memref<2x1x32xf32, #tpu.memory_space<vmem>>, vector<1x1x32xf32>
    %39 = vector.shape_cast %38 : vector<1x1x32xf32> to vector<1x32xf32>
    %cst_24 = arith.constant dense<0.000000e+00> : vector<16xf32>
    %40 = vector.multi_reduction <add>, %34, %cst_24 [1] : vector<16x32xf32> to vector<16xf32>
    %41 = vector.shape_cast %40 : vector<16xf32> to vector<16x1xf32>
    %cst_25 = arith.constant 3.200000e+01 : f32
    %42 = vector.broadcast %cst_25 : f32 to vector<16x1xf32>
    %43 = arith.divf %41, %42 : vector<16x1xf32>
    %44 = vector.broadcast %43 : vector<16x1xf32> to vector<16x32xf32>
    %45 = arith.subf %34, %44 : vector<16x32xf32>
    %46 = arith.mulf %45, %45 : vector<16x32xf32>
    %cst_26 = arith.constant dense<0.000000e+00> : vector<16xf32>
    %47 = vector.multi_reduction <add>, %46, %cst_26 [1] : vector<16x32xf32> to vector<16xf32>
    %48 = vector.shape_cast %47 : vector<16xf32> to vector<16x1xf32>
    %cst_27 = arith.constant 3.200000e+01 : f32
    %49 = vector.broadcast %cst_27 : f32 to vector<16x1xf32>
    %50 = arith.divf %48, %49 : vector<16x1xf32>
    %51 = vector.broadcast %43 : vector<16x1xf32> to vector<16x32xf32>
    %52 = arith.subf %34, %51 : vector<16x32xf32>
    %cst_28 = arith.constant 9.99999974E-6 : f32
    %53 = vector.broadcast %cst_28 : f32 to vector<16x1xf32>
    %54 = arith.addf %50, %53 : vector<16x1xf32>
    %55 = math.rsqrt %54 : vector<16x1xf32>
    %56 = vector.broadcast %55 : vector<16x1xf32> to vector<16x32xf32>
    %57 = arith.mulf %52, %56 : vector<16x32xf32>
    %58 = vector.broadcast %37 : vector<1x32xf32> to vector<16x32xf32>
    %59 = arith.mulf %57, %58 : vector<16x32xf32>
    %60 = vector.broadcast %39 : vector<1x32xf32> to vector<16x32xf32>
    %61 = arith.addf %59, %60 : vector<16x32xf32>
    %c0_29 = arith.constant 0 : index
    %c0_30 = arith.constant 0 : index
    %c0_31 = arith.constant 0 : index
    %62 = vector.load %arg15[%c0_29, %c0_30, %c0_31] : memref<2x1x32xf32, #tpu.memory_space<vmem>>, vector<1x1x32xf32>
    %63 = vector.shape_cast %62 : vector<1x1x32xf32> to vector<1x32xf32>
    %c0_32 = arith.constant 0 : index
    %c0_33 = arith.constant 0 : index
    %c0_34 = arith.constant 0 : index
    %c0_35 = arith.constant 0 : index
    %64 = vector.load %arg8[%c0_32, %c0_33, %c0_34, %c0_35] : memref<2x4x32x8xf32, #tpu.memory_space<vmem>>, vector<1x1x32x8xf32>
    %65 = vector.shape_cast %64 : vector<1x1x32x8xf32> to vector<32x8xf32>
    %cst_36 = arith.constant dense<0.000000e+00> : vector<16x8xf32>
    %66 = tpu.matmul %61, %65, %cst_36 {dimension_numbers = #tpu.dot_dimension_numbers<[1], [0], [0], [1], [0, 0, 1, 1], [], []>} : vector<16x32xf32>, vector<32x8xf32>, vector<16x8xf32> -> vector<16x8xf32>
    %c0_37 = arith.constant 0 : index
    %c0_38 = arith.constant 0 : index
    %c0_39 = arith.constant 0 : index
    %c0_40 = arith.constant 0 : index
    %67 = vector.load %arg9[%c0_37, %c0_38, %c0_39, %c0_40] : memref<2x4x1x8xf32, #tpu.memory_space<vmem>>, vector<1x1x1x8xf32>
    %68 = vector.shape_cast %67 : vector<1x1x1x8xf32> to vector<1x8xf32>
    %69 = vector.broadcast %68 : vector<1x8xf32> to vector<16x8xf32>
    %70 = arith.addf %66, %69 : vector<16x8xf32>
    %c0_41 = arith.constant 0 : index
    %c0_42 = arith.constant 0 : index
    %c0_43 = arith.constant 0 : index
    %c0_44 = arith.constant 0 : index
    %71 = vector.load %arg10[%c0_41, %c0_42, %c0_43, %c0_44] : memref<2x4x32x8xf32, #tpu.memory_space<vmem>>, vector<1x1x32x8xf32>
    %72 = vector.shape_cast %71 : vector<1x1x32x8xf32> to vector<32x8xf32>
    %cst_45 = arith.constant dense<0.000000e+00> : vector<16x8xf32>
    %73 = tpu.matmul %61, %72, %cst_45 {dimension_numbers = #tpu.dot_dimension_numbers<[1], [0], [0], [1], [0, 0, 1, 1], [], []>} : vector<16x32xf32>, vector<32x8xf32>, vector<16x8xf32> -> vector<16x8xf32>
    %c0_46 = arith.constant 0 : index
    %c0_47 = arith.constant 0 : index
    %c0_48 = arith.constant 0 : index
    %c0_49 = arith.constant 0 : index
    %74 = vector.load %arg11[%c0_46, %c0_47, %c0_48, %c0_49] : memref<2x4x1x8xf32, #tpu.memory_space<vmem>>, vector<1x1x1x8xf32>
    %75 = vector.shape_cast %74 : vector<1x1x1x8xf32> to vector<1x8xf32>
    %76 = vector.broadcast %75 : vector<1x8xf32> to vector<16x8xf32>
    %77 = arith.addf %73, %76 : vector<16x8xf32>
    %c0_50 = arith.constant 0 : index
    %c0_51 = arith.constant 0 : index
    %c0_52 = arith.constant 0 : index
    %c0_53 = arith.constant 0 : index
    %78 = vector.load %arg12[%c0_50, %c0_51, %c0_52, %c0_53] : memref<2x4x32x8xf32, #tpu.memory_space<vmem>>, vector<1x1x32x8xf32>
    %79 = vector.shape_cast %78 : vector<1x1x32x8xf32> to vector<32x8xf32>
    %cst_54 = arith.constant dense<0.000000e+00> : vector<16x8xf32>
    %80 = tpu.matmul %61, %79, %cst_54 {dimension_numbers = #tpu.dot_dimension_numbers<[1], [0], [0], [1], [0, 0, 1, 1], [], []>} : vector<16x32xf32>, vector<32x8xf32>, vector<16x8xf32> -> vector<16x8xf32>
    %c0_55 = arith.constant 0 : index
    %c0_56 = arith.constant 0 : index
    %c0_57 = arith.constant 0 : index
    %c0_58 = arith.constant 0 : index
    %81 = vector.load %arg13[%c0_55, %c0_56, %c0_57, %c0_58] : memref<2x4x1x8xf32, #tpu.memory_space<vmem>>, vector<1x1x1x8xf32>
    %82 = vector.shape_cast %81 : vector<1x1x1x8xf32> to vector<1x8xf32>
    %83 = vector.broadcast %82 : vector<1x8xf32> to vector<16x8xf32>
    %84 = arith.addf %80, %83 : vector<16x8xf32>
    %cst_59 = arith.constant dense<0.000000e+00> : vector<16x16xf32>
    %85 = tpu.matmul %70, %77, %cst_59 {dimension_numbers = #tpu.dot_dimension_numbers<[1], [1], [0], [0], [0, 0, 1, 0], [], []>} : vector<16x8xf32>, vector<16x8xf32>, vector<16x16xf32> -> vector<16x16xf32>
    %86 = arith.addf %85, %35 : vector<16x16xf32>
    %cst_60 = arith.constant dense<0xFF800000> : vector<16xf32>
    %87 = vector.multi_reduction <maximumf>, %86, %cst_60 [1] : vector<16x16xf32> to vector<16xf32>
    %88 = vector.shape_cast %87 : vector<16xf32> to vector<16x1xf32>
    %89 = vector.broadcast %88 : vector<16x1xf32> to vector<16x16xf32>
    %90 = arith.subf %86, %89 : vector<16x16xf32>
    %91 = math.exp %90 : vector<16x16xf32>
    %cst_61 = arith.constant dense<0.000000e+00> : vector<16xf32>
    %92 = vector.multi_reduction <add>, %91, %cst_61 [1] : vector<16x16xf32> to vector<16xf32>
    %93 = vector.shape_cast %92 : vector<16xf32> to vector<16x1xf32>
    %94 = tpu.reciprocal %93 {approx = true} : vector<16x1xf32> -> vector<16x1xf32>
    %95 = vector.broadcast %94 : vector<16x1xf32> to vector<16x16xf32>
    %96 = arith.mulf %91, %95 : vector<16x16xf32>
    %cst_62 = arith.constant dense<0.000000e+00> : vector<16x8xf32>
    %97 = tpu.matmul %96, %84, %cst_62 {dimension_numbers = #tpu.dot_dimension_numbers<[1], [0], [0], [1], [0, 0, 1, 1], [], []>} : vector<16x16xf32>, vector<16x8xf32>, vector<16x8xf32> -> vector<16x8xf32>
    %c0_63 = arith.constant 0 : index
    %c0_64 = arith.constant 0 : index
    %c0_65 = arith.constant 0 : index
    %c0_66 = arith.constant 0 : index
    %98 = vector.load %arg14[%c0_63, %c0_64, %c0_65, %c0_66] : memref<2x4x8x32xf32, #tpu.memory_space<vmem>>, vector<1x1x8x32xf32>
    %99 = vector.shape_cast %98 : vector<1x1x8x32xf32> to vector<8x32xf32>
    %cst_67 = arith.constant dense<0.000000e+00> : vector<16x32xf32>
    %100 = tpu.matmul %97, %99, %cst_67 {dimension_numbers = #tpu.dot_dimension_numbers<[1], [0], [0], [1], [0, 0, 1, 1], [], []>} : vector<16x8xf32>, vector<8x32xf32>, vector<16x32xf32> -> vector<16x32xf32>
    %101 = vector.broadcast %63 : vector<1x32xf32> to vector<16x32xf32>
    %102 = arith.addf %101, %100 : vector<16x32xf32>
    %c0_68 = arith.constant 0 : index
    %c1 = arith.constant 1 : index
    %c0_69 = arith.constant 0 : index
    %c0_70 = arith.constant 0 : index
    %103 = vector.load %arg8[%c0_68, %c1, %c0_69, %c0_70] : memref<2x4x32x8xf32, #tpu.memory_space<vmem>>, vector<1x1x32x8xf32>
    %104 = vector.shape_cast %103 : vector<1x1x32x8xf32> to vector<32x8xf32>
    %cst_71 = arith.constant dense<0.000000e+00> : vector<16x8xf32>
    %105 = tpu.matmul %61, %104, %cst_71 {dimension_numbers = #tpu.dot_dimension_numbers<[1], [0], [0], [1], [0, 0, 1, 1], [], []>} : vector<16x32xf32>, vector<32x8xf32>, vector<16x8xf32> -> vector<16x8xf32>
    %c0_72 = arith.constant 0 : index
    %c1_73 = arith.constant 1 : index
    %c0_74 = arith.constant 0 : index
    %c0_75 = arith.constant 0 : index
    %106 = vector.load %arg9[%c0_72, %c1_73, %c0_74, %c0_75] : memref<2x4x1x8xf32, #tpu.memory_space<vmem>>, vector<1x1x1x8xf32>
    %107 = vector.shape_cast %106 : vector<1x1x1x8xf32> to vector<1x8xf32>
    %108 = vector.broadcast %107 : vector<1x8xf32> to vector<16x8xf32>
    %109 = arith.addf %105, %108 : vector<16x8xf32>
    %c0_76 = arith.constant 0 : index
    %c1_77 = arith.constant 1 : index
    %c0_78 = arith.constant 0 : index
    %c0_79 = arith.constant 0 : index
    %110 = vector.load %arg10[%c0_76, %c1_77, %c0_78, %c0_79] : memref<2x4x32x8xf32, #tpu.memory_space<vmem>>, vector<1x1x32x8xf32>
    %111 = vector.shape_cast %110 : vector<1x1x32x8xf32> to vector<32x8xf32>
    %cst_80 = arith.constant dense<0.000000e+00> : vector<16x8xf32>
    %112 = tpu.matmul %61, %111, %cst_80 {dimension_numbers = #tpu.dot_dimension_numbers<[1], [0], [0], [1], [0, 0, 1, 1], [], []>} : vector<16x32xf32>, vector<32x8xf32>, vector<16x8xf32> -> vector<16x8xf32>
    %c0_81 = arith.constant 0 : index
    %c1_82 = arith.constant 1 : index
    %c0_83 = arith.constant 0 : index
    %c0_84 = arith.constant 0 : index
    %113 = vector.load %arg11[%c0_81, %c1_82, %c0_83, %c0_84] : memref<2x4x1x8xf32, #tpu.memory_space<vmem>>, vector<1x1x1x8xf32>
    %114 = vector.shape_cast %113 : vector<1x1x1x8xf32> to vector<1x8xf32>
    %115 = vector.broadcast %114 : vector<1x8xf32> to vector<16x8xf32>
    %116 = arith.addf %112, %115 : vector<16x8xf32>
    %c0_85 = arith.constant 0 : index
    %c1_86 = arith.constant 1 : index
    %c0_87 = arith.constant 0 : index
    %c0_88 = arith.constant 0 : index
    %117 = vector.load %arg12[%c0_85, %c1_86, %c0_87, %c0_88] : memref<2x4x32x8xf32, #tpu.memory_space<vmem>>, vector<1x1x32x8xf32>
    %118 = vector.shape_cast %117 : vector<1x1x32x8xf32> to vector<32x8xf32>
    %cst_89 = arith.constant dense<0.000000e+00> : vector<16x8xf32>
    %119 = tpu.matmul %61, %118, %cst_89 {dimension_numbers = #tpu.dot_dimension_numbers<[1], [0], [0], [1], [0, 0, 1, 1], [], []>} : vector<16x32xf32>, vector<32x8xf32>, vector<16x8xf32> -> vector<16x8xf32>
    %c0_90 = arith.constant 0 : index
    %c1_91 = arith.constant 1 : index
    %c0_92 = arith.constant 0 : index
    %c0_93 = arith.constant 0 : index
    %120 = vector.load %arg13[%c0_90, %c1_91, %c0_92, %c0_93] : memref<2x4x1x8xf32, #tpu.memory_space<vmem>>, vector<1x1x1x8xf32>
    %121 = vector.shape_cast %120 : vector<1x1x1x8xf32> to vector<1x8xf32>
    %122 = vector.broadcast %121 : vector<1x8xf32> to vector<16x8xf32>
    %123 = arith.addf %119, %122 : vector<16x8xf32>
    %cst_94 = arith.constant dense<0.000000e+00> : vector<16x16xf32>
    %124 = tpu.matmul %109, %116, %cst_94 {dimension_numbers = #tpu.dot_dimension_numbers<[1], [1], [0], [0], [0, 0, 1, 0], [], []>} : vector<16x8xf32>, vector<16x8xf32>, vector<16x16xf32> -> vector<16x16xf32>
    %125 = arith.addf %124, %35 : vector<16x16xf32>
    %cst_95 = arith.constant dense<0xFF800000> : vector<16xf32>
    %126 = vector.multi_reduction <maximumf>, %125, %cst_95 [1] : vector<16x16xf32> to vector<16xf32>
    %127 = vector.shape_cast %126 : vector<16xf32> to vector<16x1xf32>
    %128 = vector.broadcast %127 : vector<16x1xf32> to vector<16x16xf32>
    %129 = arith.subf %125, %128 : vector<16x16xf32>
    %130 = math.exp %129 : vector<16x16xf32>
    %cst_96 = arith.constant dense<0.000000e+00> : vector<16xf32>
    %131 = vector.multi_reduction <add>, %130, %cst_96 [1] : vector<16x16xf32> to vector<16xf32>
    %132 = vector.shape_cast %131 : vector<16xf32> to vector<16x1xf32>
    %133 = tpu.reciprocal %132 {approx = true} : vector<16x1xf32> -> vector<16x1xf32>
    %134 = vector.broadcast %133 : vector<16x1xf32> to vector<16x16xf32>
    %135 = arith.mulf %130, %134 : vector<16x16xf32>
    %cst_97 = arith.constant dense<0.000000e+00> : vector<16x8xf32>
    %136 = tpu.matmul %135, %123, %cst_97 {dimension_numbers = #tpu.dot_dimension_numbers<[1], [0], [0], [1], [0, 0, 1, 1], [], []>} : vector<16x16xf32>, vector<16x8xf32>, vector<16x8xf32> -> vector<16x8xf32>
    %c0_98 = arith.constant 0 : index
    %c1_99 = arith.constant 1 : index
    %c0_100 = arith.constant 0 : index
    %c0_101 = arith.constant 0 : index
    %137 = vector.load %arg14[%c0_98, %c1_99, %c0_100, %c0_101] : memref<2x4x8x32xf32, #tpu.memory_space<vmem>>, vector<1x1x8x32xf32>
    %138 = vector.shape_cast %137 : vector<1x1x8x32xf32> to vector<8x32xf32>
    %cst_102 = arith.constant dense<0.000000e+00> : vector<16x32xf32>
    %139 = tpu.matmul %136, %138, %cst_102 {dimension_numbers = #tpu.dot_dimension_numbers<[1], [0], [0], [1], [0, 0, 1, 1], [], []>} : vector<16x8xf32>, vector<8x32xf32>, vector<16x32xf32> -> vector<16x32xf32>
    %140 = arith.addf %102, %139 : vector<16x32xf32>
    %c0_103 = arith.constant 0 : index
    %c2 = arith.constant 2 : index
    %c0_104 = arith.constant 0 : index
    %c0_105 = arith.constant 0 : index
    %141 = vector.load %arg8[%c0_103, %c2, %c0_104, %c0_105] : memref<2x4x32x8xf32, #tpu.memory_space<vmem>>, vector<1x1x32x8xf32>
    %142 = vector.shape_cast %141 : vector<1x1x32x8xf32> to vector<32x8xf32>
    %cst_106 = arith.constant dense<0.000000e+00> : vector<16x8xf32>
    %143 = tpu.matmul %61, %142, %cst_106 {dimension_numbers = #tpu.dot_dimension_numbers<[1], [0], [0], [1], [0, 0, 1, 1], [], []>} : vector<16x32xf32>, vector<32x8xf32>, vector<16x8xf32> -> vector<16x8xf32>
    %c0_107 = arith.constant 0 : index
    %c2_108 = arith.constant 2 : index
    %c0_109 = arith.constant 0 : index
    %c0_110 = arith.constant 0 : index
    %144 = vector.load %arg9[%c0_107, %c2_108, %c0_109, %c0_110] : memref<2x4x1x8xf32, #tpu.memory_space<vmem>>, vector<1x1x1x8xf32>
    %145 = vector.shape_cast %144 : vector<1x1x1x8xf32> to vector<1x8xf32>
    %146 = vector.broadcast %145 : vector<1x8xf32> to vector<16x8xf32>
    %147 = arith.addf %143, %146 : vector<16x8xf32>
    %c0_111 = arith.constant 0 : index
    %c2_112 = arith.constant 2 : index
    %c0_113 = arith.constant 0 : index
    %c0_114 = arith.constant 0 : index
    %148 = vector.load %arg10[%c0_111, %c2_112, %c0_113, %c0_114] : memref<2x4x32x8xf32, #tpu.memory_space<vmem>>, vector<1x1x32x8xf32>
    %149 = vector.shape_cast %148 : vector<1x1x32x8xf32> to vector<32x8xf32>
    %cst_115 = arith.constant dense<0.000000e+00> : vector<16x8xf32>
    %150 = tpu.matmul %61, %149, %cst_115 {dimension_numbers = #tpu.dot_dimension_numbers<[1], [0], [0], [1], [0, 0, 1, 1], [], []>} : vector<16x32xf32>, vector<32x8xf32>, vector<16x8xf32> -> vector<16x8xf32>
    %c0_116 = arith.constant 0 : index
    %c2_117 = arith.constant 2 : index
    %c0_118 = arith.constant 0 : index
    %c0_119 = arith.constant 0 : index
    %151 = vector.load %arg11[%c0_116, %c2_117, %c0_118, %c0_119] : memref<2x4x1x8xf32, #tpu.memory_space<vmem>>, vector<1x1x1x8xf32>
    %152 = vector.shape_cast %151 : vector<1x1x1x8xf32> to vector<1x8xf32>
    %153 = vector.broadcast %152 : vector<1x8xf32> to vector<16x8xf32>
    %154 = arith.addf %150, %153 : vector<16x8xf32>
    %c0_120 = arith.constant 0 : index
    %c2_121 = arith.constant 2 : index
    %c0_122 = arith.constant 0 : index
    %c0_123 = arith.constant 0 : index
    %155 = vector.load %arg12[%c0_120, %c2_121, %c0_122, %c0_123] : memref<2x4x32x8xf32, #tpu.memory_space<vmem>>, vector<1x1x32x8xf32>
    %156 = vector.shape_cast %155 : vector<1x1x32x8xf32> to vector<32x8xf32>
    %cst_124 = arith.constant dense<0.000000e+00> : vector<16x8xf32>
    %157 = tpu.matmul %61, %156, %cst_124 {dimension_numbers = #tpu.dot_dimension_numbers<[1], [0], [0], [1], [0, 0, 1, 1], [], []>} : vector<16x32xf32>, vector<32x8xf32>, vector<16x8xf32> -> vector<16x8xf32>
    %c0_125 = arith.constant 0 : index
    %c2_126 = arith.constant 2 : index
    %c0_127 = arith.constant 0 : index
    %c0_128 = arith.constant 0 : index
    %158 = vector.load %arg13[%c0_125, %c2_126, %c0_127, %c0_128] : memref<2x4x1x8xf32, #tpu.memory_space<vmem>>, vector<1x1x1x8xf32>
    %159 = vector.shape_cast %158 : vector<1x1x1x8xf32> to vector<1x8xf32>
    %160 = vector.broadcast %159 : vector<1x8xf32> to vector<16x8xf32>
    %161 = arith.addf %157, %160 : vector<16x8xf32>
    %cst_129 = arith.constant dense<0.000000e+00> : vector<16x16xf32>
    %162 = tpu.matmul %147, %154, %cst_129 {dimension_numbers = #tpu.dot_dimension_numbers<[1], [1], [0], [0], [0, 0, 1, 0], [], []>} : vector<16x8xf32>, vector<16x8xf32>, vector<16x16xf32> -> vector<16x16xf32>
    %163 = arith.addf %162, %35 : vector<16x16xf32>
    %cst_130 = arith.constant dense<0xFF800000> : vector<16xf32>
    %164 = vector.multi_reduction <maximumf>, %163, %cst_130 [1] : vector<16x16xf32> to vector<16xf32>
    %165 = vector.shape_cast %164 : vector<16xf32> to vector<16x1xf32>
    %166 = vector.broadcast %165 : vector<16x1xf32> to vector<16x16xf32>
    %167 = arith.subf %163, %166 : vector<16x16xf32>
    %168 = math.exp %167 : vector<16x16xf32>
    %cst_131 = arith.constant dense<0.000000e+00> : vector<16xf32>
    %169 = vector.multi_reduction <add>, %168, %cst_131 [1] : vector<16x16xf32> to vector<16xf32>
    %170 = vector.shape_cast %169 : vector<16xf32> to vector<16x1xf32>
    %171 = tpu.reciprocal %170 {approx = true} : vector<16x1xf32> -> vector<16x1xf32>
    %172 = vector.broadcast %171 : vector<16x1xf32> to vector<16x16xf32>
    %173 = arith.mulf %168, %172 : vector<16x16xf32>
    %cst_132 = arith.constant dense<0.000000e+00> : vector<16x8xf32>
    %174 = tpu.matmul %173, %161, %cst_132 {dimension_numbers = #tpu.dot_dimension_numbers<[1], [0], [0], [1], [0, 0, 1, 1], [], []>} : vector<16x16xf32>, vector<16x8xf32>, vector<16x8xf32> -> vector<16x8xf32>
    %c0_133 = arith.constant 0 : index
    %c2_134 = arith.constant 2 : index
    %c0_135 = arith.constant 0 : index
    %c0_136 = arith.constant 0 : index
    %175 = vector.load %arg14[%c0_133, %c2_134, %c0_135, %c0_136] : memref<2x4x8x32xf32, #tpu.memory_space<vmem>>, vector<1x1x8x32xf32>
    %176 = vector.shape_cast %175 : vector<1x1x8x32xf32> to vector<8x32xf32>
    %cst_137 = arith.constant dense<0.000000e+00> : vector<16x32xf32>
    %177 = tpu.matmul %174, %176, %cst_137 {dimension_numbers = #tpu.dot_dimension_numbers<[1], [0], [0], [1], [0, 0, 1, 1], [], []>} : vector<16x8xf32>, vector<8x32xf32>, vector<16x32xf32> -> vector<16x32xf32>
    %178 = arith.addf %140, %177 : vector<16x32xf32>
    %c0_138 = arith.constant 0 : index
    %c3 = arith.constant 3 : index
    %c0_139 = arith.constant 0 : index
    %c0_140 = arith.constant 0 : index
    %179 = vector.load %arg8[%c0_138, %c3, %c0_139, %c0_140] : memref<2x4x32x8xf32, #tpu.memory_space<vmem>>, vector<1x1x32x8xf32>
    %180 = vector.shape_cast %179 : vector<1x1x32x8xf32> to vector<32x8xf32>
    %cst_141 = arith.constant dense<0.000000e+00> : vector<16x8xf32>
    %181 = tpu.matmul %61, %180, %cst_141 {dimension_numbers = #tpu.dot_dimension_numbers<[1], [0], [0], [1], [0, 0, 1, 1], [], []>} : vector<16x32xf32>, vector<32x8xf32>, vector<16x8xf32> -> vector<16x8xf32>
    %c0_142 = arith.constant 0 : index
    %c3_143 = arith.constant 3 : index
    %c0_144 = arith.constant 0 : index
    %c0_145 = arith.constant 0 : index
    %182 = vector.load %arg9[%c0_142, %c3_143, %c0_144, %c0_145] : memref<2x4x1x8xf32, #tpu.memory_space<vmem>>, vector<1x1x1x8xf32>
    %183 = vector.shape_cast %182 : vector<1x1x1x8xf32> to vector<1x8xf32>
    %184 = vector.broadcast %183 : vector<1x8xf32> to vector<16x8xf32>
    %185 = arith.addf %181, %184 : vector<16x8xf32>
    %c0_146 = arith.constant 0 : index
    %c3_147 = arith.constant 3 : index
    %c0_148 = arith.constant 0 : index
    %c0_149 = arith.constant 0 : index
    %186 = vector.load %arg10[%c0_146, %c3_147, %c0_148, %c0_149] : memref<2x4x32x8xf32, #tpu.memory_space<vmem>>, vector<1x1x32x8xf32>
    %187 = vector.shape_cast %186 : vector<1x1x32x8xf32> to vector<32x8xf32>
    %cst_150 = arith.constant dense<0.000000e+00> : vector<16x8xf32>
    %188 = tpu.matmul %61, %187, %cst_150 {dimension_numbers = #tpu.dot_dimension_numbers<[1], [0], [0], [1], [0, 0, 1, 1], [], []>} : vector<16x32xf32>, vector<32x8xf32>, vector<16x8xf32> -> vector<16x8xf32>
    %c0_151 = arith.constant 0 : index
    %c3_152 = arith.constant 3 : index
    %c0_153 = arith.constant 0 : index
    %c0_154 = arith.constant 0 : index
    %189 = vector.load %arg11[%c0_151, %c3_152, %c0_153, %c0_154] : memref<2x4x1x8xf32, #tpu.memory_space<vmem>>, vector<1x1x1x8xf32>
    %190 = vector.shape_cast %189 : vector<1x1x1x8xf32> to vector<1x8xf32>
    %191 = vector.broadcast %190 : vector<1x8xf32> to vector<16x8xf32>
    %192 = arith.addf %188, %191 : vector<16x8xf32>
    %c0_155 = arith.constant 0 : index
    %c3_156 = arith.constant 3 : index
    %c0_157 = arith.constant 0 : index
    %c0_158 = arith.constant 0 : index
    %193 = vector.load %arg12[%c0_155, %c3_156, %c0_157, %c0_158] : memref<2x4x32x8xf32, #tpu.memory_space<vmem>>, vector<1x1x32x8xf32>
    %194 = vector.shape_cast %193 : vector<1x1x32x8xf32> to vector<32x8xf32>
    %cst_159 = arith.constant dense<0.000000e+00> : vector<16x8xf32>
    %195 = tpu.matmul %61, %194, %cst_159 {dimension_numbers = #tpu.dot_dimension_numbers<[1], [0], [0], [1], [0, 0, 1, 1], [], []>} : vector<16x32xf32>, vector<32x8xf32>, vector<16x8xf32> -> vector<16x8xf32>
    %c0_160 = arith.constant 0 : index
    %c3_161 = arith.constant 3 : index
    %c0_162 = arith.constant 0 : index
    %c0_163 = arith.constant 0 : index
    %196 = vector.load %arg13[%c0_160, %c3_161, %c0_162, %c0_163] : memref<2x4x1x8xf32, #tpu.memory_space<vmem>>, vector<1x1x1x8xf32>
    %197 = vector.shape_cast %196 : vector<1x1x1x8xf32> to vector<1x8xf32>
    %198 = vector.broadcast %197 : vector<1x8xf32> to vector<16x8xf32>
    %199 = arith.addf %195, %198 : vector<16x8xf32>
    %cst_164 = arith.constant dense<0.000000e+00> : vector<16x16xf32>
    %200 = tpu.matmul %185, %192, %cst_164 {dimension_numbers = #tpu.dot_dimension_numbers<[1], [1], [0], [0], [0, 0, 1, 0], [], []>} : vector<16x8xf32>, vector<16x8xf32>, vector<16x16xf32> -> vector<16x16xf32>
    %201 = arith.addf %200, %35 : vector<16x16xf32>
    %cst_165 = arith.constant dense<0xFF800000> : vector<16xf32>
    %202 = vector.multi_reduction <maximumf>, %201, %cst_165 [1] : vector<16x16xf32> to vector<16xf32>
    %203 = vector.shape_cast %202 : vector<16xf32> to vector<16x1xf32>
    %204 = vector.broadcast %203 : vector<16x1xf32> to vector<16x16xf32>
    %205 = arith.subf %201, %204 : vector<16x16xf32>
    %206 = math.exp %205 : vector<16x16xf32>
    %cst_166 = arith.constant dense<0.000000e+00> : vector<16xf32>
    %207 = vector.multi_reduction <add>, %206, %cst_166 [1] : vector<16x16xf32> to vector<16xf32>
    %208 = vector.shape_cast %207 : vector<16xf32> to vector<16x1xf32>
    %209 = tpu.reciprocal %208 {approx = true} : vector<16x1xf32> -> vector<16x1xf32>
    %210 = vector.broadcast %209 : vector<16x1xf32> to vector<16x16xf32>
    %211 = arith.mulf %206, %210 : vector<16x16xf32>
    %cst_167 = arith.constant dense<0.000000e+00> : vector<16x8xf32>
    %212 = tpu.matmul %211, %199, %cst_167 {dimension_numbers = #tpu.dot_dimension_numbers<[1], [0], [0], [1], [0, 0, 1, 1], [], []>} : vector<16x16xf32>, vector<16x8xf32>, vector<16x8xf32> -> vector<16x8xf32>
    %c0_168 = arith.constant 0 : index
    %c3_169 = arith.constant 3 : index
    %c0_170 = arith.constant 0 : index
    %c0_171 = arith.constant 0 : index
    %213 = vector.load %arg14[%c0_168, %c3_169, %c0_170, %c0_171] : memref<2x4x8x32xf32, #tpu.memory_space<vmem>>, vector<1x1x8x32xf32>
    %214 = vector.shape_cast %213 : vector<1x1x8x32xf32> to vector<8x32xf32>
    %cst_172 = arith.constant dense<0.000000e+00> : vector<16x32xf32>
    %215 = tpu.matmul %212, %214, %cst_172 {dimension_numbers = #tpu.dot_dimension_numbers<[1], [0], [0], [1], [0, 0, 1, 1], [], []>} : vector<16x8xf32>, vector<8x32xf32>, vector<16x32xf32> -> vector<16x32xf32>
    %216 = arith.addf %178, %215 : vector<16x32xf32>
    %217 = arith.addf %34, %216 : vector<16x32xf32>
    %c0_173 = arith.constant 0 : index
    %c0_174 = arith.constant 0 : index
    %c0_175 = arith.constant 0 : index
    %218 = vector.load %arg16[%c0_173, %c0_174, %c0_175] : memref<2x1x32xf32, #tpu.memory_space<vmem>>, vector<1x1x32xf32>
    %219 = vector.shape_cast %218 : vector<1x1x32xf32> to vector<1x32xf32>
    %c0_176 = arith.constant 0 : index
    %c0_177 = arith.constant 0 : index
    %c0_178 = arith.constant 0 : index
    %220 = vector.load %arg17[%c0_176, %c0_177, %c0_178] : memref<2x1x32xf32, #tpu.memory_space<vmem>>, vector<1x1x32xf32>
    %221 = vector.shape_cast %220 : vector<1x1x32xf32> to vector<1x32xf32>
    %cst_179 = arith.constant dense<0.000000e+00> : vector<16xf32>
    %222 = vector.multi_reduction <add>, %217, %cst_179 [1] : vector<16x32xf32> to vector<16xf32>
    %223 = vector.shape_cast %222 : vector<16xf32> to vector<16x1xf32>
    %cst_180 = arith.constant 3.200000e+01 : f32
    %224 = vector.broadcast %cst_180 : f32 to vector<16x1xf32>
    %225 = arith.divf %223, %224 : vector<16x1xf32>
    %226 = vector.broadcast %225 : vector<16x1xf32> to vector<16x32xf32>
    %227 = arith.subf %217, %226 : vector<16x32xf32>
    %228 = arith.mulf %227, %227 : vector<16x32xf32>
    %cst_181 = arith.constant dense<0.000000e+00> : vector<16xf32>
    %229 = vector.multi_reduction <add>, %228, %cst_181 [1] : vector<16x32xf32> to vector<16xf32>
    %230 = vector.shape_cast %229 : vector<16xf32> to vector<16x1xf32>
    %cst_182 = arith.constant 3.200000e+01 : f32
    %231 = vector.broadcast %cst_182 : f32 to vector<16x1xf32>
    %232 = arith.divf %230, %231 : vector<16x1xf32>
    %233 = vector.broadcast %225 : vector<16x1xf32> to vector<16x32xf32>
    %234 = arith.subf %217, %233 : vector<16x32xf32>
    %cst_183 = arith.constant 9.99999974E-6 : f32
    %235 = vector.broadcast %cst_183 : f32 to vector<16x1xf32>
    %236 = arith.addf %232, %235 : vector<16x1xf32>
    %237 = math.rsqrt %236 : vector<16x1xf32>
    %238 = vector.broadcast %237 : vector<16x1xf32> to vector<16x32xf32>
    %239 = arith.mulf %234, %238 : vector<16x32xf32>
    %240 = vector.broadcast %219 : vector<1x32xf32> to vector<16x32xf32>
    %241 = arith.mulf %239, %240 : vector<16x32xf32>
    %242 = vector.broadcast %221 : vector<1x32xf32> to vector<16x32xf32>
    %243 = arith.addf %241, %242 : vector<16x32xf32>
    %c0_184 = arith.constant 0 : index
    %c0_185 = arith.constant 0 : index
    %c0_186 = arith.constant 0 : index
    %244 = vector.load %arg18[%c0_184, %c0_185, %c0_186] : memref<2x32x64xf32, #tpu.memory_space<vmem>>, vector<1x32x64xf32>
    %245 = vector.shape_cast %244 : vector<1x32x64xf32> to vector<32x64xf32>
    %cst_187 = arith.constant dense<0.000000e+00> : vector<16x64xf32>
    %246 = tpu.matmul %243, %245, %cst_187 {dimension_numbers = #tpu.dot_dimension_numbers<[1], [0], [0], [1], [0, 0, 1, 1], [], []>} : vector<16x32xf32>, vector<32x64xf32>, vector<16x64xf32> -> vector<16x64xf32>
    %c0_188 = arith.constant 0 : index
    %c0_189 = arith.constant 0 : index
    %c0_190 = arith.constant 0 : index
    %247 = vector.load %arg19[%c0_188, %c0_189, %c0_190] : memref<2x1x64xf32, #tpu.memory_space<vmem>>, vector<1x1x64xf32>
    %248 = vector.shape_cast %247 : vector<1x1x64xf32> to vector<1x64xf32>
    %249 = vector.broadcast %248 : vector<1x64xf32> to vector<16x64xf32>
    %250 = arith.addf %246, %249 : vector<16x64xf32>
    %251 = arith.mulf %250, %250 : vector<16x64xf32>
    %252 = arith.mulf %250, %251 : vector<16x64xf32>
    %cst_191 = arith.constant 4.471500e-02 : f32
    %253 = vector.broadcast %cst_191 : f32 to vector<16x64xf32>
    %254 = arith.mulf %253, %252 : vector<16x64xf32>
    %255 = arith.addf %250, %254 : vector<16x64xf32>
    %cst_192 = arith.constant 0.797884583 : f32
    %256 = vector.broadcast %cst_192 : f32 to vector<16x64xf32>
    %257 = arith.mulf %256, %255 : vector<16x64xf32>
    %258 = math.tanh %257 : vector<16x64xf32>
    %cst_193 = arith.constant 1.000000e+00 : f32
    %259 = vector.broadcast %cst_193 : f32 to vector<16x64xf32>
    %260 = arith.addf %259, %258 : vector<16x64xf32>
    %cst_194 = arith.constant 5.000000e-01 : f32
    %261 = vector.broadcast %cst_194 : f32 to vector<16x64xf32>
    %262 = arith.mulf %261, %260 : vector<16x64xf32>
    %263 = arith.mulf %250, %262 : vector<16x64xf32>
    %c0_195 = arith.constant 0 : index
    %c0_196 = arith.constant 0 : index
    %c0_197 = arith.constant 0 : index
    %264 = vector.load %arg20[%c0_195, %c0_196, %c0_197] : memref<2x64x32xf32, #tpu.memory_space<vmem>>, vector<1x64x32xf32>
    %265 = vector.shape_cast %264 : vector<1x64x32xf32> to vector<64x32xf32>
    %cst_198 = arith.constant dense<0.000000e+00> : vector<16x32xf32>
    %266 = tpu.matmul %263, %265, %cst_198 {dimension_numbers = #tpu.dot_dimension_numbers<[1], [0], [0], [1], [0, 0, 1, 1], [], []>} : vector<16x64xf32>, vector<64x32xf32>, vector<16x32xf32> -> vector<16x32xf32>
    %c0_199 = arith.constant 0 : index
    %c0_200 = arith.constant 0 : index
    %c0_201 = arith.constant 0 : index
    %267 = vector.load %arg21[%c0_199, %c0_200, %c0_201] : memref<2x1x32xf32, #tpu.memory_space<vmem>>, vector<1x1x32xf32>
    %268 = vector.shape_cast %267 : vector<1x1x32xf32> to vector<1x32xf32>
    %269 = vector.broadcast %268 : vector<1x32xf32> to vector<16x32xf32>
    %270 = arith.addf %266, %269 : vector<16x32xf32>
    %271 = arith.addf %217, %270 : vector<16x32xf32>
    %c1_202 = arith.constant 1 : index
    %c0_203 = arith.constant 0 : index
    %c0_204 = arith.constant 0 : index
    %272 = vector.load %arg6[%c1_202, %c0_203, %c0_204] : memref<2x1x32xf32, #tpu.memory_space<vmem>>, vector<1x1x32xf32>
    %273 = vector.shape_cast %272 : vector<1x1x32xf32> to vector<1x32xf32>
    %c1_205 = arith.constant 1 : index
    %c0_206 = arith.constant 0 : index
    %c0_207 = arith.constant 0 : index
    %274 = vector.load %arg7[%c1_205, %c0_206, %c0_207] : memref<2x1x32xf32, #tpu.memory_space<vmem>>, vector<1x1x32xf32>
    %275 = vector.shape_cast %274 : vector<1x1x32xf32> to vector<1x32xf32>
    %cst_208 = arith.constant dense<0.000000e+00> : vector<16xf32>
    %276 = vector.multi_reduction <add>, %271, %cst_208 [1] : vector<16x32xf32> to vector<16xf32>
    %277 = vector.shape_cast %276 : vector<16xf32> to vector<16x1xf32>
    %cst_209 = arith.constant 3.200000e+01 : f32
    %278 = vector.broadcast %cst_209 : f32 to vector<16x1xf32>
    %279 = arith.divf %277, %278 : vector<16x1xf32>
    %280 = vector.broadcast %279 : vector<16x1xf32> to vector<16x32xf32>
    %281 = arith.subf %271, %280 : vector<16x32xf32>
    %282 = arith.mulf %281, %281 : vector<16x32xf32>
    %cst_210 = arith.constant dense<0.000000e+00> : vector<16xf32>
    %283 = vector.multi_reduction <add>, %282, %cst_210 [1] : vector<16x32xf32> to vector<16xf32>
    %284 = vector.shape_cast %283 : vector<16xf32> to vector<16x1xf32>
    %cst_211 = arith.constant 3.200000e+01 : f32
    %285 = vector.broadcast %cst_211 : f32 to vector<16x1xf32>
    %286 = arith.divf %284, %285 : vector<16x1xf32>
    %287 = vector.broadcast %279 : vector<16x1xf32> to vector<16x32xf32>
    %288 = arith.subf %271, %287 : vector<16x32xf32>
    %cst_212 = arith.constant 9.99999974E-6 : f32
    %289 = vector.broadcast %cst_212 : f32 to vector<16x1xf32>
    %290 = arith.addf %286, %289 : vector<16x1xf32>
    %291 = math.rsqrt %290 : vector<16x1xf32>
    %292 = vector.broadcast %291 : vector<16x1xf32> to vector<16x32xf32>
    %293 = arith.mulf %288, %292 : vector<16x32xf32>
    %294 = vector.broadcast %273 : vector<1x32xf32> to vector<16x32xf32>
    %295 = arith.mulf %293, %294 : vector<16x32xf32>
    %296 = vector.broadcast %275 : vector<1x32xf32> to vector<16x32xf32>
    %297 = arith.addf %295, %296 : vector<16x32xf32>
    %c1_213 = arith.constant 1 : index
    %c0_214 = arith.constant 0 : index
    %c0_215 = arith.constant 0 : index
    %298 = vector.load %arg15[%c1_213, %c0_214, %c0_215] : memref<2x1x32xf32, #tpu.memory_space<vmem>>, vector<1x1x32xf32>
    %299 = vector.shape_cast %298 : vector<1x1x32xf32> to vector<1x32xf32>
    %c1_216 = arith.constant 1 : index
    %c0_217 = arith.constant 0 : index
    %c0_218 = arith.constant 0 : index
    %c0_219 = arith.constant 0 : index
    %300 = vector.load %arg8[%c1_216, %c0_217, %c0_218, %c0_219] : memref<2x4x32x8xf32, #tpu.memory_space<vmem>>, vector<1x1x32x8xf32>
    %301 = vector.shape_cast %300 : vector<1x1x32x8xf32> to vector<32x8xf32>
    %cst_220 = arith.constant dense<0.000000e+00> : vector<16x8xf32>
    %302 = tpu.matmul %297, %301, %cst_220 {dimension_numbers = #tpu.dot_dimension_numbers<[1], [0], [0], [1], [0, 0, 1, 1], [], []>} : vector<16x32xf32>, vector<32x8xf32>, vector<16x8xf32> -> vector<16x8xf32>
    %c1_221 = arith.constant 1 : index
    %c0_222 = arith.constant 0 : index
    %c0_223 = arith.constant 0 : index
    %c0_224 = arith.constant 0 : index
    %303 = vector.load %arg9[%c1_221, %c0_222, %c0_223, %c0_224] : memref<2x4x1x8xf32, #tpu.memory_space<vmem>>, vector<1x1x1x8xf32>
    %304 = vector.shape_cast %303 : vector<1x1x1x8xf32> to vector<1x8xf32>
    %305 = vector.broadcast %304 : vector<1x8xf32> to vector<16x8xf32>
    %306 = arith.addf %302, %305 : vector<16x8xf32>
    %c1_225 = arith.constant 1 : index
    %c0_226 = arith.constant 0 : index
    %c0_227 = arith.constant 0 : index
    %c0_228 = arith.constant 0 : index
    %307 = vector.load %arg10[%c1_225, %c0_226, %c0_227, %c0_228] : memref<2x4x32x8xf32, #tpu.memory_space<vmem>>, vector<1x1x32x8xf32>
    %308 = vector.shape_cast %307 : vector<1x1x32x8xf32> to vector<32x8xf32>
    %cst_229 = arith.constant dense<0.000000e+00> : vector<16x8xf32>
    %309 = tpu.matmul %297, %308, %cst_229 {dimension_numbers = #tpu.dot_dimension_numbers<[1], [0], [0], [1], [0, 0, 1, 1], [], []>} : vector<16x32xf32>, vector<32x8xf32>, vector<16x8xf32> -> vector<16x8xf32>
    %c1_230 = arith.constant 1 : index
    %c0_231 = arith.constant 0 : index
    %c0_232 = arith.constant 0 : index
    %c0_233 = arith.constant 0 : index
    %310 = vector.load %arg11[%c1_230, %c0_231, %c0_232, %c0_233] : memref<2x4x1x8xf32, #tpu.memory_space<vmem>>, vector<1x1x1x8xf32>
    %311 = vector.shape_cast %310 : vector<1x1x1x8xf32> to vector<1x8xf32>
    %312 = vector.broadcast %311 : vector<1x8xf32> to vector<16x8xf32>
    %313 = arith.addf %309, %312 : vector<16x8xf32>
    %c1_234 = arith.constant 1 : index
    %c0_235 = arith.constant 0 : index
    %c0_236 = arith.constant 0 : index
    %c0_237 = arith.constant 0 : index
    %314 = vector.load %arg12[%c1_234, %c0_235, %c0_236, %c0_237] : memref<2x4x32x8xf32, #tpu.memory_space<vmem>>, vector<1x1x32x8xf32>
    %315 = vector.shape_cast %314 : vector<1x1x32x8xf32> to vector<32x8xf32>
    %cst_238 = arith.constant dense<0.000000e+00> : vector<16x8xf32>
    %316 = tpu.matmul %297, %315, %cst_238 {dimension_numbers = #tpu.dot_dimension_numbers<[1], [0], [0], [1], [0, 0, 1, 1], [], []>} : vector<16x32xf32>, vector<32x8xf32>, vector<16x8xf32> -> vector<16x8xf32>
    %c1_239 = arith.constant 1 : index
    %c0_240 = arith.constant 0 : index
    %c0_241 = arith.constant 0 : index
    %c0_242 = arith.constant 0 : index
    %317 = vector.load %arg13[%c1_239, %c0_240, %c0_241, %c0_242] : memref<2x4x1x8xf32, #tpu.memory_space<vmem>>, vector<1x1x1x8xf32>
    %318 = vector.shape_cast %317 : vector<1x1x1x8xf32> to vector<1x8xf32>
    %319 = vector.broadcast %318 : vector<1x8xf32> to vector<16x8xf32>
    %320 = arith.addf %316, %319 : vector<16x8xf32>
    %cst_243 = arith.constant dense<0.000000e+00> : vector<16x16xf32>
    %321 = tpu.matmul %306, %313, %cst_243 {dimension_numbers = #tpu.dot_dimension_numbers<[1], [1], [0], [0], [0, 0, 1, 0], [], []>} : vector<16x8xf32>, vector<16x8xf32>, vector<16x16xf32> -> vector<16x16xf32>
    %322 = arith.addf %321, %35 : vector<16x16xf32>
    %cst_244 = arith.constant dense<0xFF800000> : vector<16xf32>
    %323 = vector.multi_reduction <maximumf>, %322, %cst_244 [1] : vector<16x16xf32> to vector<16xf32>
    %324 = vector.shape_cast %323 : vector<16xf32> to vector<16x1xf32>
    %325 = vector.broadcast %324 : vector<16x1xf32> to vector<16x16xf32>
    %326 = arith.subf %322, %325 : vector<16x16xf32>
    %327 = math.exp %326 : vector<16x16xf32>
    %cst_245 = arith.constant dense<0.000000e+00> : vector<16xf32>
    %328 = vector.multi_reduction <add>, %327, %cst_245 [1] : vector<16x16xf32> to vector<16xf32>
    %329 = vector.shape_cast %328 : vector<16xf32> to vector<16x1xf32>
    %330 = tpu.reciprocal %329 {approx = true} : vector<16x1xf32> -> vector<16x1xf32>
    %331 = vector.broadcast %330 : vector<16x1xf32> to vector<16x16xf32>
    %332 = arith.mulf %327, %331 : vector<16x16xf32>
    %cst_246 = arith.constant dense<0.000000e+00> : vector<16x8xf32>
    %333 = tpu.matmul %332, %320, %cst_246 {dimension_numbers = #tpu.dot_dimension_numbers<[1], [0], [0], [1], [0, 0, 1, 1], [], []>} : vector<16x16xf32>, vector<16x8xf32>, vector<16x8xf32> -> vector<16x8xf32>
    %c1_247 = arith.constant 1 : index
    %c0_248 = arith.constant 0 : index
    %c0_249 = arith.constant 0 : index
    %c0_250 = arith.constant 0 : index
    %334 = vector.load %arg14[%c1_247, %c0_248, %c0_249, %c0_250] : memref<2x4x8x32xf32, #tpu.memory_space<vmem>>, vector<1x1x8x32xf32>
    %335 = vector.shape_cast %334 : vector<1x1x8x32xf32> to vector<8x32xf32>
    %cst_251 = arith.constant dense<0.000000e+00> : vector<16x32xf32>
    %336 = tpu.matmul %333, %335, %cst_251 {dimension_numbers = #tpu.dot_dimension_numbers<[1], [0], [0], [1], [0, 0, 1, 1], [], []>} : vector<16x8xf32>, vector<8x32xf32>, vector<16x32xf32> -> vector<16x32xf32>
    %337 = vector.broadcast %299 : vector<1x32xf32> to vector<16x32xf32>
    %338 = arith.addf %337, %336 : vector<16x32xf32>
    %c1_252 = arith.constant 1 : index
    %c1_253 = arith.constant 1 : index
    %c0_254 = arith.constant 0 : index
    %c0_255 = arith.constant 0 : index
    %339 = vector.load %arg8[%c1_252, %c1_253, %c0_254, %c0_255] : memref<2x4x32x8xf32, #tpu.memory_space<vmem>>, vector<1x1x32x8xf32>
    %340 = vector.shape_cast %339 : vector<1x1x32x8xf32> to vector<32x8xf32>
    %cst_256 = arith.constant dense<0.000000e+00> : vector<16x8xf32>
    %341 = tpu.matmul %297, %340, %cst_256 {dimension_numbers = #tpu.dot_dimension_numbers<[1], [0], [0], [1], [0, 0, 1, 1], [], []>} : vector<16x32xf32>, vector<32x8xf32>, vector<16x8xf32> -> vector<16x8xf32>
    %c1_257 = arith.constant 1 : index
    %c1_258 = arith.constant 1 : index
    %c0_259 = arith.constant 0 : index
    %c0_260 = arith.constant 0 : index
    %342 = vector.load %arg9[%c1_257, %c1_258, %c0_259, %c0_260] : memref<2x4x1x8xf32, #tpu.memory_space<vmem>>, vector<1x1x1x8xf32>
    %343 = vector.shape_cast %342 : vector<1x1x1x8xf32> to vector<1x8xf32>
    %344 = vector.broadcast %343 : vector<1x8xf32> to vector<16x8xf32>
    %345 = arith.addf %341, %344 : vector<16x8xf32>
    %c1_261 = arith.constant 1 : index
    %c1_262 = arith.constant 1 : index
    %c0_263 = arith.constant 0 : index
    %c0_264 = arith.constant 0 : index
    %346 = vector.load %arg10[%c1_261, %c1_262, %c0_263, %c0_264] : memref<2x4x32x8xf32, #tpu.memory_space<vmem>>, vector<1x1x32x8xf32>
    %347 = vector.shape_cast %346 : vector<1x1x32x8xf32> to vector<32x8xf32>
    %cst_265 = arith.constant dense<0.000000e+00> : vector<16x8xf32>
    %348 = tpu.matmul %297, %347, %cst_265 {dimension_numbers = #tpu.dot_dimension_numbers<[1], [0], [0], [1], [0, 0, 1, 1], [], []>} : vector<16x32xf32>, vector<32x8xf32>, vector<16x8xf32> -> vector<16x8xf32>
    %c1_266 = arith.constant 1 : index
    %c1_267 = arith.constant 1 : index
    %c0_268 = arith.constant 0 : index
    %c0_269 = arith.constant 0 : index
    %349 = vector.load %arg11[%c1_266, %c1_267, %c0_268, %c0_269] : memref<2x4x1x8xf32, #tpu.memory_space<vmem>>, vector<1x1x1x8xf32>
    %350 = vector.shape_cast %349 : vector<1x1x1x8xf32> to vector<1x8xf32>
    %351 = vector.broadcast %350 : vector<1x8xf32> to vector<16x8xf32>
    %352 = arith.addf %348, %351 : vector<16x8xf32>
    %c1_270 = arith.constant 1 : index
    %c1_271 = arith.constant 1 : index
    %c0_272 = arith.constant 0 : index
    %c0_273 = arith.constant 0 : index
    %353 = vector.load %arg12[%c1_270, %c1_271, %c0_272, %c0_273] : memref<2x4x32x8xf32, #tpu.memory_space<vmem>>, vector<1x1x32x8xf32>
    %354 = vector.shape_cast %353 : vector<1x1x32x8xf32> to vector<32x8xf32>
    %cst_274 = arith.constant dense<0.000000e+00> : vector<16x8xf32>
    %355 = tpu.matmul %297, %354, %cst_274 {dimension_numbers = #tpu.dot_dimension_numbers<[1], [0], [0], [1], [0, 0, 1, 1], [], []>} : vector<16x32xf32>, vector<32x8xf32>, vector<16x8xf32> -> vector<16x8xf32>
    %c1_275 = arith.constant 1 : index
    %c1_276 = arith.constant 1 : index
    %c0_277 = arith.constant 0 : index
    %c0_278 = arith.constant 0 : index
    %356 = vector.load %arg13[%c1_275, %c1_276, %c0_277, %c0_278] : memref<2x4x1x8xf32, #tpu.memory_space<vmem>>, vector<1x1x1x8xf32>
    %357 = vector.shape_cast %356 : vector<1x1x1x8xf32> to vector<1x8xf32>
    %358 = vector.broadcast %357 : vector<1x8xf32> to vector<16x8xf32>
    %359 = arith.addf %355, %358 : vector<16x8xf32>
    %cst_279 = arith.constant dense<0.000000e+00> : vector<16x16xf32>
    %360 = tpu.matmul %345, %352, %cst_279 {dimension_numbers = #tpu.dot_dimension_numbers<[1], [1], [0], [0], [0, 0, 1, 0], [], []>} : vector<16x8xf32>, vector<16x8xf32>, vector<16x16xf32> -> vector<16x16xf32>
    %361 = arith.addf %360, %35 : vector<16x16xf32>
    %cst_280 = arith.constant dense<0xFF800000> : vector<16xf32>
    %362 = vector.multi_reduction <maximumf>, %361, %cst_280 [1] : vector<16x16xf32> to vector<16xf32>
    %363 = vector.shape_cast %362 : vector<16xf32> to vector<16x1xf32>
    %364 = vector.broadcast %363 : vector<16x1xf32> to vector<16x16xf32>
    %365 = arith.subf %361, %364 : vector<16x16xf32>
    %366 = math.exp %365 : vector<16x16xf32>
    %cst_281 = arith.constant dense<0.000000e+00> : vector<16xf32>
    %367 = vector.multi_reduction <add>, %366, %cst_281 [1] : vector<16x16xf32> to vector<16xf32>
    %368 = vector.shape_cast %367 : vector<16xf32> to vector<16x1xf32>
    %369 = tpu.reciprocal %368 {approx = true} : vector<16x1xf32> -> vector<16x1xf32>
    %370 = vector.broadcast %369 : vector<16x1xf32> to vector<16x16xf32>
    %371 = arith.mulf %366, %370 : vector<16x16xf32>
    %cst_282 = arith.constant dense<0.000000e+00> : vector<16x8xf32>
    %372 = tpu.matmul %371, %359, %cst_282 {dimension_numbers = #tpu.dot_dimension_numbers<[1], [0], [0], [1], [0, 0, 1, 1], [], []>} : vector<16x16xf32>, vector<16x8xf32>, vector<16x8xf32> -> vector<16x8xf32>
    %c1_283 = arith.constant 1 : index
    %c1_284 = arith.constant 1 : index
    %c0_285 = arith.constant 0 : index
    %c0_286 = arith.constant 0 : index
    %373 = vector.load %arg14[%c1_283, %c1_284, %c0_285, %c0_286] : memref<2x4x8x32xf32, #tpu.memory_space<vmem>>, vector<1x1x8x32xf32>
    %374 = vector.shape_cast %373 : vector<1x1x8x32xf32> to vector<8x32xf32>
    %cst_287 = arith.constant dense<0.000000e+00> : vector<16x32xf32>
    %375 = tpu.matmul %372, %374, %cst_287 {dimension_numbers = #tpu.dot_dimension_numbers<[1], [0], [0], [1], [0, 0, 1, 1], [], []>} : vector<16x8xf32>, vector<8x32xf32>, vector<16x32xf32> -> vector<16x32xf32>
    %376 = arith.addf %338, %375 : vector<16x32xf32>
    %c1_288 = arith.constant 1 : index
    %c2_289 = arith.constant 2 : index
    %c0_290 = arith.constant 0 : index
    %c0_291 = arith.constant 0 : index
    %377 = vector.load %arg8[%c1_288, %c2_289, %c0_290, %c0_291] : memref<2x4x32x8xf32, #tpu.memory_space<vmem>>, vector<1x1x32x8xf32>
    %378 = vector.shape_cast %377 : vector<1x1x32x8xf32> to vector<32x8xf32>
    %cst_292 = arith.constant dense<0.000000e+00> : vector<16x8xf32>
    %379 = tpu.matmul %297, %378, %cst_292 {dimension_numbers = #tpu.dot_dimension_numbers<[1], [0], [0], [1], [0, 0, 1, 1], [], []>} : vector<16x32xf32>, vector<32x8xf32>, vector<16x8xf32> -> vector<16x8xf32>
    %c1_293 = arith.constant 1 : index
    %c2_294 = arith.constant 2 : index
    %c0_295 = arith.constant 0 : index
    %c0_296 = arith.constant 0 : index
    %380 = vector.load %arg9[%c1_293, %c2_294, %c0_295, %c0_296] : memref<2x4x1x8xf32, #tpu.memory_space<vmem>>, vector<1x1x1x8xf32>
    %381 = vector.shape_cast %380 : vector<1x1x1x8xf32> to vector<1x8xf32>
    %382 = vector.broadcast %381 : vector<1x8xf32> to vector<16x8xf32>
    %383 = arith.addf %379, %382 : vector<16x8xf32>
    %c1_297 = arith.constant 1 : index
    %c2_298 = arith.constant 2 : index
    %c0_299 = arith.constant 0 : index
    %c0_300 = arith.constant 0 : index
    %384 = vector.load %arg10[%c1_297, %c2_298, %c0_299, %c0_300] : memref<2x4x32x8xf32, #tpu.memory_space<vmem>>, vector<1x1x32x8xf32>
    %385 = vector.shape_cast %384 : vector<1x1x32x8xf32> to vector<32x8xf32>
    %cst_301 = arith.constant dense<0.000000e+00> : vector<16x8xf32>
    %386 = tpu.matmul %297, %385, %cst_301 {dimension_numbers = #tpu.dot_dimension_numbers<[1], [0], [0], [1], [0, 0, 1, 1], [], []>} : vector<16x32xf32>, vector<32x8xf32>, vector<16x8xf32> -> vector<16x8xf32>
    %c1_302 = arith.constant 1 : index
    %c2_303 = arith.constant 2 : index
    %c0_304 = arith.constant 0 : index
    %c0_305 = arith.constant 0 : index
    %387 = vector.load %arg11[%c1_302, %c2_303, %c0_304, %c0_305] : memref<2x4x1x8xf32, #tpu.memory_space<vmem>>, vector<1x1x1x8xf32>
    %388 = vector.shape_cast %387 : vector<1x1x1x8xf32> to vector<1x8xf32>
    %389 = vector.broadcast %388 : vector<1x8xf32> to vector<16x8xf32>
    %390 = arith.addf %386, %389 : vector<16x8xf32>
    %c1_306 = arith.constant 1 : index
    %c2_307 = arith.constant 2 : index
    %c0_308 = arith.constant 0 : index
    %c0_309 = arith.constant 0 : index
    %391 = vector.load %arg12[%c1_306, %c2_307, %c0_308, %c0_309] : memref<2x4x32x8xf32, #tpu.memory_space<vmem>>, vector<1x1x32x8xf32>
    %392 = vector.shape_cast %391 : vector<1x1x32x8xf32> to vector<32x8xf32>
    %cst_310 = arith.constant dense<0.000000e+00> : vector<16x8xf32>
    %393 = tpu.matmul %297, %392, %cst_310 {dimension_numbers = #tpu.dot_dimension_numbers<[1], [0], [0], [1], [0, 0, 1, 1], [], []>} : vector<16x32xf32>, vector<32x8xf32>, vector<16x8xf32> -> vector<16x8xf32>
    %c1_311 = arith.constant 1 : index
    %c2_312 = arith.constant 2 : index
    %c0_313 = arith.constant 0 : index
    %c0_314 = arith.constant 0 : index
    %394 = vector.load %arg13[%c1_311, %c2_312, %c0_313, %c0_314] : memref<2x4x1x8xf32, #tpu.memory_space<vmem>>, vector<1x1x1x8xf32>
    %395 = vector.shape_cast %394 : vector<1x1x1x8xf32> to vector<1x8xf32>
    %396 = vector.broadcast %395 : vector<1x8xf32> to vector<16x8xf32>
    %397 = arith.addf %393, %396 : vector<16x8xf32>
    %cst_315 = arith.constant dense<0.000000e+00> : vector<16x16xf32>
    %398 = tpu.matmul %383, %390, %cst_315 {dimension_numbers = #tpu.dot_dimension_numbers<[1], [1], [0], [0], [0, 0, 1, 0], [], []>} : vector<16x8xf32>, vector<16x8xf32>, vector<16x16xf32> -> vector<16x16xf32>
    %399 = arith.addf %398, %35 : vector<16x16xf32>
    %cst_316 = arith.constant dense<0xFF800000> : vector<16xf32>
    %400 = vector.multi_reduction <maximumf>, %399, %cst_316 [1] : vector<16x16xf32> to vector<16xf32>
    %401 = vector.shape_cast %400 : vector<16xf32> to vector<16x1xf32>
    %402 = vector.broadcast %401 : vector<16x1xf32> to vector<16x16xf32>
    %403 = arith.subf %399, %402 : vector<16x16xf32>
    %404 = math.exp %403 : vector<16x16xf32>
    %cst_317 = arith.constant dense<0.000000e+00> : vector<16xf32>
    %405 = vector.multi_reduction <add>, %404, %cst_317 [1] : vector<16x16xf32> to vector<16xf32>
    %406 = vector.shape_cast %405 : vector<16xf32> to vector<16x1xf32>
    %407 = tpu.reciprocal %406 {approx = true} : vector<16x1xf32> -> vector<16x1xf32>
    %408 = vector.broadcast %407 : vector<16x1xf32> to vector<16x16xf32>
    %409 = arith.mulf %404, %408 : vector<16x16xf32>
    %cst_318 = arith.constant dense<0.000000e+00> : vector<16x8xf32>
    %410 = tpu.matmul %409, %397, %cst_318 {dimension_numbers = #tpu.dot_dimension_numbers<[1], [0], [0], [1], [0, 0, 1, 1], [], []>} : vector<16x16xf32>, vector<16x8xf32>, vector<16x8xf32> -> vector<16x8xf32>
    %c1_319 = arith.constant 1 : index
    %c2_320 = arith.constant 2 : index
    %c0_321 = arith.constant 0 : index
    %c0_322 = arith.constant 0 : index
    %411 = vector.load %arg14[%c1_319, %c2_320, %c0_321, %c0_322] : memref<2x4x8x32xf32, #tpu.memory_space<vmem>>, vector<1x1x8x32xf32>
    %412 = vector.shape_cast %411 : vector<1x1x8x32xf32> to vector<8x32xf32>
    %cst_323 = arith.constant dense<0.000000e+00> : vector<16x32xf32>
    %413 = tpu.matmul %410, %412, %cst_323 {dimension_numbers = #tpu.dot_dimension_numbers<[1], [0], [0], [1], [0, 0, 1, 1], [], []>} : vector<16x8xf32>, vector<8x32xf32>, vector<16x32xf32> -> vector<16x32xf32>
    %414 = arith.addf %376, %413 : vector<16x32xf32>
    %c1_324 = arith.constant 1 : index
    %c3_325 = arith.constant 3 : index
    %c0_326 = arith.constant 0 : index
    %c0_327 = arith.constant 0 : index
    %415 = vector.load %arg8[%c1_324, %c3_325, %c0_326, %c0_327] : memref<2x4x32x8xf32, #tpu.memory_space<vmem>>, vector<1x1x32x8xf32>
    %416 = vector.shape_cast %415 : vector<1x1x32x8xf32> to vector<32x8xf32>
    %cst_328 = arith.constant dense<0.000000e+00> : vector<16x8xf32>
    %417 = tpu.matmul %297, %416, %cst_328 {dimension_numbers = #tpu.dot_dimension_numbers<[1], [0], [0], [1], [0, 0, 1, 1], [], []>} : vector<16x32xf32>, vector<32x8xf32>, vector<16x8xf32> -> vector<16x8xf32>
    %c1_329 = arith.constant 1 : index
    %c3_330 = arith.constant 3 : index
    %c0_331 = arith.constant 0 : index
    %c0_332 = arith.constant 0 : index
    %418 = vector.load %arg9[%c1_329, %c3_330, %c0_331, %c0_332] : memref<2x4x1x8xf32, #tpu.memory_space<vmem>>, vector<1x1x1x8xf32>
    %419 = vector.shape_cast %418 : vector<1x1x1x8xf32> to vector<1x8xf32>
    %420 = vector.broadcast %419 : vector<1x8xf32> to vector<16x8xf32>
    %421 = arith.addf %417, %420 : vector<16x8xf32>
    %c1_333 = arith.constant 1 : index
    %c3_334 = arith.constant 3 : index
    %c0_335 = arith.constant 0 : index
    %c0_336 = arith.constant 0 : index
    %422 = vector.load %arg10[%c1_333, %c3_334, %c0_335, %c0_336] : memref<2x4x32x8xf32, #tpu.memory_space<vmem>>, vector<1x1x32x8xf32>
    %423 = vector.shape_cast %422 : vector<1x1x32x8xf32> to vector<32x8xf32>
    %cst_337 = arith.constant dense<0.000000e+00> : vector<16x8xf32>
    %424 = tpu.matmul %297, %423, %cst_337 {dimension_numbers = #tpu.dot_dimension_numbers<[1], [0], [0], [1], [0, 0, 1, 1], [], []>} : vector<16x32xf32>, vector<32x8xf32>, vector<16x8xf32> -> vector<16x8xf32>
    %c1_338 = arith.constant 1 : index
    %c3_339 = arith.constant 3 : index
    %c0_340 = arith.constant 0 : index
    %c0_341 = arith.constant 0 : index
    %425 = vector.load %arg11[%c1_338, %c3_339, %c0_340, %c0_341] : memref<2x4x1x8xf32, #tpu.memory_space<vmem>>, vector<1x1x1x8xf32>
    %426 = vector.shape_cast %425 : vector<1x1x1x8xf32> to vector<1x8xf32>
    %427 = vector.broadcast %426 : vector<1x8xf32> to vector<16x8xf32>
    %428 = arith.addf %424, %427 : vector<16x8xf32>
    %c1_342 = arith.constant 1 : index
    %c3_343 = arith.constant 3 : index
    %c0_344 = arith.constant 0 : index
    %c0_345 = arith.constant 0 : index
    %429 = vector.load %arg12[%c1_342, %c3_343, %c0_344, %c0_345] : memref<2x4x32x8xf32, #tpu.memory_space<vmem>>, vector<1x1x32x8xf32>
    %430 = vector.shape_cast %429 : vector<1x1x32x8xf32> to vector<32x8xf32>
    %cst_346 = arith.constant dense<0.000000e+00> : vector<16x8xf32>
    %431 = tpu.matmul %297, %430, %cst_346 {dimension_numbers = #tpu.dot_dimension_numbers<[1], [0], [0], [1], [0, 0, 1, 1], [], []>} : vector<16x32xf32>, vector<32x8xf32>, vector<16x8xf32> -> vector<16x8xf32>
    %c1_347 = arith.constant 1 : index
    %c3_348 = arith.constant 3 : index
    %c0_349 = arith.constant 0 : index
    %c0_350 = arith.constant 0 : index
    %432 = vector.load %arg13[%c1_347, %c3_348, %c0_349, %c0_350] : memref<2x4x1x8xf32, #tpu.memory_space<vmem>>, vector<1x1x1x8xf32>
    %433 = vector.shape_cast %432 : vector<1x1x1x8xf32> to vector<1x8xf32>
    %434 = vector.broadcast %433 : vector<1x8xf32> to vector<16x8xf32>
    %435 = arith.addf %431, %434 : vector<16x8xf32>
    %cst_351 = arith.constant dense<0.000000e+00> : vector<16x16xf32>
    %436 = tpu.matmul %421, %428, %cst_351 {dimension_numbers = #tpu.dot_dimension_numbers<[1], [1], [0], [0], [0, 0, 1, 0], [], []>} : vector<16x8xf32>, vector<16x8xf32>, vector<16x16xf32> -> vector<16x16xf32>
    %437 = arith.addf %436, %35 : vector<16x16xf32>
    %cst_352 = arith.constant dense<0xFF800000> : vector<16xf32>
    %438 = vector.multi_reduction <maximumf>, %437, %cst_352 [1] : vector<16x16xf32> to vector<16xf32>
    %439 = vector.shape_cast %438 : vector<16xf32> to vector<16x1xf32>
    %440 = vector.broadcast %439 : vector<16x1xf32> to vector<16x16xf32>
    %441 = arith.subf %437, %440 : vector<16x16xf32>
    %442 = math.exp %441 : vector<16x16xf32>
    %cst_353 = arith.constant dense<0.000000e+00> : vector<16xf32>
    %443 = vector.multi_reduction <add>, %442, %cst_353 [1] : vector<16x16xf32> to vector<16xf32>
    %444 = vector.shape_cast %443 : vector<16xf32> to vector<16x1xf32>
    %445 = tpu.reciprocal %444 {approx = true} : vector<16x1xf32> -> vector<16x1xf32>
    %446 = vector.broadcast %445 : vector<16x1xf32> to vector<16x16xf32>
    %447 = arith.mulf %442, %446 : vector<16x16xf32>
    %cst_354 = arith.constant dense<0.000000e+00> : vector<16x8xf32>
    %448 = tpu.matmul %447, %435, %cst_354 {dimension_numbers = #tpu.dot_dimension_numbers<[1], [0], [0], [1], [0, 0, 1, 1], [], []>} : vector<16x16xf32>, vector<16x8xf32>, vector<16x8xf32> -> vector<16x8xf32>
    %c1_355 = arith.constant 1 : index
    %c3_356 = arith.constant 3 : index
    %c0_357 = arith.constant 0 : index
    %c0_358 = arith.constant 0 : index
    %449 = vector.load %arg14[%c1_355, %c3_356, %c0_357, %c0_358] : memref<2x4x8x32xf32, #tpu.memory_space<vmem>>, vector<1x1x8x32xf32>
    %450 = vector.shape_cast %449 : vector<1x1x8x32xf32> to vector<8x32xf32>
    %cst_359 = arith.constant dense<0.000000e+00> : vector<16x32xf32>
    %451 = tpu.matmul %448, %450, %cst_359 {dimension_numbers = #tpu.dot_dimension_numbers<[1], [0], [0], [1], [0, 0, 1, 1], [], []>} : vector<16x8xf32>, vector<8x32xf32>, vector<16x32xf32> -> vector<16x32xf32>
    %452 = arith.addf %414, %451 : vector<16x32xf32>
    %453 = arith.addf %271, %452 : vector<16x32xf32>
    %c1_360 = arith.constant 1 : index
    %c0_361 = arith.constant 0 : index
    %c0_362 = arith.constant 0 : index
    %454 = vector.load %arg16[%c1_360, %c0_361, %c0_362] : memref<2x1x32xf32, #tpu.memory_space<vmem>>, vector<1x1x32xf32>
    %455 = vector.shape_cast %454 : vector<1x1x32xf32> to vector<1x32xf32>
    %c1_363 = arith.constant 1 : index
    %c0_364 = arith.constant 0 : index
    %c0_365 = arith.constant 0 : index
    %456 = vector.load %arg17[%c1_363, %c0_364, %c0_365] : memref<2x1x32xf32, #tpu.memory_space<vmem>>, vector<1x1x32xf32>
    %457 = vector.shape_cast %456 : vector<1x1x32xf32> to vector<1x32xf32>
    %cst_366 = arith.constant dense<0.000000e+00> : vector<16xf32>
    %458 = vector.multi_reduction <add>, %453, %cst_366 [1] : vector<16x32xf32> to vector<16xf32>
    %459 = vector.shape_cast %458 : vector<16xf32> to vector<16x1xf32>
    %cst_367 = arith.constant 3.200000e+01 : f32
    %460 = vector.broadcast %cst_367 : f32 to vector<16x1xf32>
    %461 = arith.divf %459, %460 : vector<16x1xf32>
    %462 = vector.broadcast %461 : vector<16x1xf32> to vector<16x32xf32>
    %463 = arith.subf %453, %462 : vector<16x32xf32>
    %464 = arith.mulf %463, %463 : vector<16x32xf32>
    %cst_368 = arith.constant dense<0.000000e+00> : vector<16xf32>
    %465 = vector.multi_reduction <add>, %464, %cst_368 [1] : vector<16x32xf32> to vector<16xf32>
    %466 = vector.shape_cast %465 : vector<16xf32> to vector<16x1xf32>
    %cst_369 = arith.constant 3.200000e+01 : f32
    %467 = vector.broadcast %cst_369 : f32 to vector<16x1xf32>
    %468 = arith.divf %466, %467 : vector<16x1xf32>
    %469 = vector.broadcast %461 : vector<16x1xf32> to vector<16x32xf32>
    %470 = arith.subf %453, %469 : vector<16x32xf32>
    %cst_370 = arith.constant 9.99999974E-6 : f32
    %471 = vector.broadcast %cst_370 : f32 to vector<16x1xf32>
    %472 = arith.addf %468, %471 : vector<16x1xf32>
    %473 = math.rsqrt %472 : vector<16x1xf32>
    %474 = vector.broadcast %473 : vector<16x1xf32> to vector<16x32xf32>
    %475 = arith.mulf %470, %474 : vector<16x32xf32>
    %476 = vector.broadcast %455 : vector<1x32xf32> to vector<16x32xf32>
    %477 = arith.mulf %475, %476 : vector<16x32xf32>
    %478 = vector.broadcast %457 : vector<1x32xf32> to vector<16x32xf32>
    %479 = arith.addf %477, %478 : vector<16x32xf32>
    %c1_371 = arith.constant 1 : index
    %c0_372 = arith.constant 0 : index
    %c0_373 = arith.constant 0 : index
    %480 = vector.load %arg18[%c1_371, %c0_372, %c0_373] : memref<2x32x64xf32, #tpu.memory_space<vmem>>, vector<1x32x64xf32>
    %481 = vector.shape_cast %480 : vector<1x32x64xf32> to vector<32x64xf32>
    %cst_374 = arith.constant dense<0.000000e+00> : vector<16x64xf32>
    %482 = tpu.matmul %479, %481, %cst_374 {dimension_numbers = #tpu.dot_dimension_numbers<[1], [0], [0], [1], [0, 0, 1, 1], [], []>} : vector<16x32xf32>, vector<32x64xf32>, vector<16x64xf32> -> vector<16x64xf32>
    %c1_375 = arith.constant 1 : index
    %c0_376 = arith.constant 0 : index
    %c0_377 = arith.constant 0 : index
    %483 = vector.load %arg19[%c1_375, %c0_376, %c0_377] : memref<2x1x64xf32, #tpu.memory_space<vmem>>, vector<1x1x64xf32>
    %484 = vector.shape_cast %483 : vector<1x1x64xf32> to vector<1x64xf32>
    %485 = vector.broadcast %484 : vector<1x64xf32> to vector<16x64xf32>
    %486 = arith.addf %482, %485 : vector<16x64xf32>
    %487 = arith.mulf %486, %486 : vector<16x64xf32>
    %488 = arith.mulf %486, %487 : vector<16x64xf32>
    %cst_378 = arith.constant 4.471500e-02 : f32
    %489 = vector.broadcast %cst_378 : f32 to vector<16x64xf32>
    %490 = arith.mulf %489, %488 : vector<16x64xf32>
    %491 = arith.addf %486, %490 : vector<16x64xf32>
    %cst_379 = arith.constant 0.797884583 : f32
    %492 = vector.broadcast %cst_379 : f32 to vector<16x64xf32>
    %493 = arith.mulf %492, %491 : vector<16x64xf32>
    %494 = math.tanh %493 : vector<16x64xf32>
    %cst_380 = arith.constant 1.000000e+00 : f32
    %495 = vector.broadcast %cst_380 : f32 to vector<16x64xf32>
    %496 = arith.addf %495, %494 : vector<16x64xf32>
    %cst_381 = arith.constant 5.000000e-01 : f32
    %497 = vector.broadcast %cst_381 : f32 to vector<16x64xf32>
    %498 = arith.mulf %497, %496 : vector<16x64xf32>
    %499 = arith.mulf %486, %498 : vector<16x64xf32>
    %c1_382 = arith.constant 1 : index
    %c0_383 = arith.constant 0 : index
    %c0_384 = arith.constant 0 : index
    %500 = vector.load %arg20[%c1_382, %c0_383, %c0_384] : memref<2x64x32xf32, #tpu.memory_space<vmem>>, vector<1x64x32xf32>
    %501 = vector.shape_cast %500 : vector<1x64x32xf32> to vector<64x32xf32>
    %cst_385 = arith.constant dense<0.000000e+00> : vector<16x32xf32>
    %502 = tpu.matmul %499, %501, %cst_385 {dimension_numbers = #tpu.dot_dimension_numbers<[1], [0], [0], [1], [0, 0, 1, 1], [], []>} : vector<16x64xf32>, vector<64x32xf32>, vector<16x32xf32> -> vector<16x32xf32>
    %c1_386 = arith.constant 1 : index
    %c0_387 = arith.constant 0 : index
    %c0_388 = arith.constant 0 : index
    %503 = vector.load %arg21[%c1_386, %c0_387, %c0_388] : memref<2x1x32xf32, #tpu.memory_space<vmem>>, vector<1x1x32xf32>
    %504 = vector.shape_cast %503 : vector<1x1x32xf32> to vector<1x32xf32>
    %505 = vector.broadcast %504 : vector<1x32xf32> to vector<16x32xf32>
    %506 = arith.addf %502, %505 : vector<16x32xf32>
    %507 = arith.addf %453, %506 : vector<16x32xf32>
    %c0_389 = arith.constant 0 : index
    %c0_390 = arith.constant 0 : index
    %508 = vector.load %arg22[%c0_389, %c0_390] : memref<32x128xf32, #tpu.memory_space<vmem>>, vector<32x128xf32>
    %cst_391 = arith.constant dense<0.000000e+00> : vector<16x128xf32>
    %509 = tpu.matmul %507, %508, %cst_391 {dimension_numbers = #tpu.dot_dimension_numbers<[1], [0], [0], [1], [0, 0, 1, 1], [], []>} : vector<16x32xf32>, vector<32x128xf32>, vector<16x128xf32> -> vector<16x128xf32>
    %c0_392 = arith.constant 0 : index
    %c0_393 = arith.constant 0 : index
    %510 = vector.load %arg23[%c0_392, %c0_393] : memref<1x128xf32, #tpu.memory_space<vmem>>, vector<1x128xf32>
    %511 = vector.broadcast %510 : vector<1x128xf32> to vector<16x128xf32>
    %512 = arith.addf %509, %511 : vector<16x128xf32>
    %513 = vector.extract_strided_slice %512 {offsets = [0, 0], sizes = [1, 128], strides = [1, 1]} : vector<16x128xf32> to vector<1x128xf32>
    %c0_394 = arith.constant 0 : index
    %c0_395 = arith.constant 0 : index
    %514 = vector.load %arg24[%c0_394, %c0_395] : memref<2x128xf32, #tpu.memory_space<vmem>>, vector<1x128xf32>
    tpu.vector_store %arg24[%c0_394, %c0_395], %513 {strides = array<i32>} : memref<2x128xf32, #tpu.memory_space<vmem>>, vector<1x128xf32>,
    %515 = vector.extract_strided_slice %512 {offsets = [8, 0], sizes = [1, 128], strides = [1, 1]} : vector<16x128xf32> to vector<1x128xf32>
    %c1_396 = arith.constant 1 : index
    %c0_397 = arith.constant 0 : index
    %516 = vector.load %arg24[%c1_396, %c0_397] : memref<2x128xf32, #tpu.memory_space<vmem>>, vector<1x128xf32>
    tpu.vector_store %arg24[%c1_396, %c0_397], %515 {strides = array<i32>} : memref<2x128xf32, #tpu.memory_space<vmem>>, vector<1x128xf32>,
    return
  }
}

</mosaic_0001>

<bundles_post_ra>
// kernel: sequence_classification.1
= control target key start
LH: loop header
LB: loop body
LE: loop exit
PB: predicated region body
PF: predicated region fallthrough
CT: control target
= control target key end

     0   :  { %s3948_s0 = inlined_call_operand.vmem [shape: s32[16,1], index: 0, kind: input, shape index: {}]   ;;  %s3949_s1 = inlined_call_operand.vmem [shape: f32[16,16], index: 1, kind: input, shape index: {}]   ;;  %s3950_s2 = inlined_call_operand.vmem [shape: f32[128,32], index: 2, kind: input, shape index: {}]   ;;  %s3951_s3 = inlined_call_operand.vmem [shape: f32[16,32], index: 3, kind: input, shape index: {}]   ;;  %s3952_s4 = inlined_call_operand.vmem [shape: f32[1,32], index: 4, kind: input, shape index: {}]   ;;  %s3953_s5 = inlined_call_operand.vmem [shape: f32[1,32], index: 5, kind: input, shape index: {}]   ;;  %s3954_s6 = inlined_call_operand.vmem [shape: f32[2,1,32], index: 6, kind: input, shape index: {}]   ;;  %s3955_s7 = inlined_call_operand.vmem [shape: f32[2,1,32], index: 7, kind: input, shape index: {}]   ;;  %s3956_s8 = inlined_call_operand.vmem [shape: f32[2,4,32,8], index: 8, kind: input, shape index: {}]   ;;  %s3957_s9 = inlined_call_operand.vmem [shape: f32[2,4,1,8], index: 9, kind: input, shape index: {}]   ;;  %s3958_s10 = inlined_call_operand.vmem [shape: f32[2,4,32,8], index: 10, kind: input, shape index: {}]   ;;  %s3959_s11 = inlined_call_operand.vmem [shape: f32[2,4,1,8], index: 11, kind: input, shape index: {}]   ;;  %s3960_s12 = inlined_call_operand.vmem [shape: f32[2,4,32,8], index: 12, kind: input, shape index: {}]   ;;  %s3961_s13 = inlined_call_operand.vmem [shape: f32[2,4,1,8], index: 13, kind: input, shape index: {}]   ;;  %s3962_s14 = inlined_call_operand.vmem [shape: f32[2,4,8,32], index: 14, kind: input, shape index: {}]   ;;  %s3963_s15 = inlined_call_operand.vmem [shape: f32[2,1,32], index: 15, kind: input, shape index: {}]   ;;  %s3964_s16 = inlined_call_operand.vmem [shape: f32[2,1,32], index: 16, kind: input, shape index: {}]   ;;  %s3965_s17 = inlined_call_operand.vmem [shape: f32[2,1,32], index: 17, kind: input, shape index: {}]   ;;  %s3966_s18 = inlined_call_operand.vmem [shape: f32[2,32,64], index: 18, kind: input, shape index: {}]   ;;  %s3967_s19 = inlined_call_operand.vmem [shape: f32[2,1,64], index: 19, kind: input, shape index: {}]   ;;  %s3968_s20 = inlined_call_operand.vmem [shape: f32[2,64,32], index: 20, kind: input, shape index: {}]   ;;  %s3969_s21 = inlined_call_operand.vmem [shape: f32[2,1,32], index: 21, kind: input, shape index: {}]   ;;  %s3970_s22 = inlined_call_operand.vmem [shape: f32[32,128], index: 22, kind: input, shape index: {}]   ;;  %s3971_s23 = inlined_call_operand.vmem [shape: f32[1,128], index: 23, kind: input, shape index: {}]   ;;  %s3972_s24 = inlined_call_operand.hbm [shape: f32[2,128], index: 24, kind: output, shape index: {}]  }
   0x1   :  { %3981 = sst [smem:[#allocation5_spill]] %s3948_s0 }
   0x2   :  { %3982 = sst [smem:[#allocation6_spill]] %s3949_s1 }
   0x3   :  { %3983 = sst [smem:[#allocation7_spill]] %s3950_s2 }
   0x4   :  { %3984 = sst [smem:[#allocation8_spill]] %s3951_s3 }
   0x5   :  { %3985 = sst [smem:[#allocation9_spill]] %s3952_s4 }
   0x6   :  { %3986 = sst [smem:[#allocation10_spill]] %s3953_s5 }
   0x7   :  { %3987 = sst [smem:[#allocation11_spill]] %s3954_s6 }
   0x8   :  { %3988 = sst [smem:[#allocation12_spill]] %s3955_s7 }
   0x9   :  { %3989 = sst [smem:[#allocation13_spill]] %s3956_s8 }
   0xa   :  { %3990 = sst [smem:[#allocation14_spill]] %s3967_s19 }
   0xb   :  { %s3991_s27 = sld [smem:[#allocation5_spill]]  ;;  %v2870_v2 = vmov 0  }
   0xc   :  { %s3992_s19 = sld [smem:[#allocation7_spill]]  ;;  %2706 = vset.pattern.permute.xlu0 %v2870_v2 }
  0x11   :  { %v78_v0 = vld [vmem:[%s3991_s27] sm:$0xff]  ;;  %v79_v6 = vld [vmem:[%s3991_s27 + $0x8] sm:$0xff] }
  0x12   :  { %v107_v1 = vld [vmem:[%s3992_s19 + $0x78] sm:$0xff]  ;;  %v106_v3 = vld [vmem:[%s3992_s19 + $0x70] sm:$0xff]  ;;  %83 = vperm.xlu0 %2706, %v78_v0   ;;  %v105_v4 = vld [vmem:[%s3992_s19 + $0x68] sm:$0xff] }
  0x13   :  { %110 = vmatpush.msra.mxu0 %v107_v1  ;;  %v104_v5 = vld [vmem:[%s3992_s19 + $0x60] sm:$0xff]  ;;  %v103_v7 = vld [vmem:[%s3992_s19 + $0x58] sm:$0xff]  ;;  %v102_v8 = vld [vmem:[%s3992_s19 + $0x50] sm:$0xff] }
  0x14   :  { %v101_v9 = vld [vmem:[%s3992_s19 + $0x48] sm:$0xff]  ;;  %v100_v10 = vld [vmem:[%s3992_s19 + $0x40] sm:$0xff]  ;;  %v99_v11 = vld [vmem:[%s3992_s19 + $0x38] sm:$0xff] }
  0x15   :  { %111 = vmatpush.msra.mxu0 %v106_v3  ;;  %v98_v12 = vld [vmem:[%s3992_s19 + $0x30] sm:$0xff]  ;;  %v97_v13 = vld [vmem:[%s3992_s19 + $0x28] sm:$0xff] }
  0x17   :  { %112 = vmatpush.msra.mxu0 %v105_v4 }
  0x19   :  { %113 = vmatpush.msra.mxu0 %v104_v5 }
  0x1a   :  { %86 = vperm.xlu0 %2706, %v79_v6  }
  0x1b   :  { %114 = vmatpush.msra.mxu0 %v103_v7 }
  0x1d   :  { %115 = vmatpush.msra.mxu0 %v102_v8 }
  0x1f   :  { %116 = vmatpush.msra.mxu0 %v101_v9 }
  0x21   :  { %117 = vmatpush.msra.mxu0 %v100_v10 }
  0x23   :  { %118 = vmatpush.msra.mxu0 %v99_v11 }
  0x25   :  { %119 = vmatpush.msra.mxu0 %v98_v12 }
  0x26   :  { %29 = vsyncpa [#allocation3], 0  ;;  %v96_v14 = vld [vmem:[%s3992_s19 + $0x20] sm:$0xff]  ;;  %v95_v15 = vld [vmem:[%s3992_s19 + $0x18] sm:$0xff]  ;;  %v80_v19 = vlaneseq  ;;  %v2871_v22 = vmov 1.0   ;;  %s3993_s30 = sld [smem:[#allocation8_spill]] }
  0x27   :  { %120 = vmatpush.msra.mxu0 %v97_v13  ;;  %v94_v16 = vld [vmem:[%s3992_s19 + $0x10] sm:$0xff]  ;;  %v93_v17 = vld [vmem:[%s3992_s19 + $0x8] sm:$0xff]  ;;  %v92_v18 = vld [vmem:[%s3992_s19] sm:$0xff]  ;;  %vm135_vm2 = vcmask 261120   ;;  %v2872_v32 = vmov 32.0   ;;  %s3994_s4 = sld [smem:[#allocation9_spill]] }
  0x28   :  { %v81_v20 = vand.u32 127, %v80_v19  ;;  %2748 = vrcp.f32 %v2872_v32  ;;  %s3995_s26 = sld [smem:[#allocation10_spill]]  ;;  %v294_v32 = vld [vmem:[%s3958_s10 + $0x8] sm:$0xff] }
  0x29   :  { %121 = vmatpush.msra.mxu0 %v96_v14  ;;  %s3996_s2 = sld [smem:[#allocation13_spill]] }
  0x2a   :  { %s3999_s27 = sld [smem:[#allocation6_spill]] }
  0x2b   :  { %122 = vmatpush.msra.mxu0 %v95_v15  ;;  %s4000_s3 = sld [smem:[#allocation14_spill]] }
  0x2c   :  { %v108_v24 = vld [vmem:[%s3993_s30] sm:$0xff]  ;;  %v109_v28 = vld [vmem:[%s3993_s30 + $0x8] sm:$0xff]  ;;  %s2438_s30 = sshll.u32 %s3972_s24, 4  ;;  %s2439_s30 = int_to_ptr.hbm [resolvable:$true] %s2438_s30 }
  0x2d   :  { %123 = vmatpush.msra.mxu0 %v94_v16  ;;  %v2707_v63 = vld [vmem:[%s3994_s4] ss:$0 sm:$0xff]  ;;  %s3997_s4 = sld [smem:[#allocation11_spill]] }
  0x2e   :  { %v2749_v33 = vpop.eup %2748  ;;  %v2708_v3 = vld [vmem:[%s3995_s26] ss:$0 sm:$0xff]  ;;  %s3998_s26 = sld [smem:[#allocation12_spill]] }
  0x2f   :  { %124 = vmatpush.msra.mxu0 %v93_v17  ;;  %v143_v34 = vmul.f32 32.0, %v2749_v33  ;;  %vm147_vm3 = vweird.f32 %v2749_v33 }
  0x31   :  { %125 = vmatpush.msra.mxu0 %v92_v18  ;;  %v144_v35 = vsub.f32 1.0, %v143_v34  ;;  %v256_v34 = vld [vmem:[%s3996_s2] sm:$0xff] }
  0x33   :  { %v145_v36 = vmul.f32 %v2749_v33, %v144_v35  ;;  %v293_v35 = vld [vmem:[%s3958_s10] sm:$0xff] }
  0x35   :  { %v146_v37 = vadd.f32 %v2749_v33, %v145_v36  ;;  %v324_v36 = vld [vmem:[%s3960_s12] sm:$0xff] }
  0x37   :  { %v3061_v38 = vsel %vm147_vm3, %v2749_v33, %v146_v37  ;;  %v325_v33 = vld [vmem:[%s3960_s12 + $0x8] sm:$0xff] }
  0x84   :  { %v84_v21 = vpop.permute.xlu0 %83 }
  0x85   :  { %vm88_vm0 = vcmp.eq.s32.totalorder %v81_v20, %v84_v21 }
  0x86   :  { %2447 = vmatmul.msk.f32.vlgmr.msra.gmra.mxu0 %vm88_vm0, %v2871_v22  ;;  %vm355_vm0 = vcmask 64512  }
  0x8c   :  { %v87_v23 = vpop.permute.xlu0 %86 }
  0x8d   :  { %vm89_vm1 = vcmp.eq.s32.totalorder %v81_v20, %v87_v23 }
  0x8e   :  { %2448 = vmatmul.msk.f32.gmra.mxu0 %vm89_vm1, %v2871_v22  ;;  %vm391_vm1 = vcmask 130048  }
 0x103   :  { %v127_v25 = vpop.f32.mrf.mxu0 }
 0x104   :  { %v128_v26 = vadd.f32 %v127_v25, %v108_v24  ;;  %v259_v25 = vld [vmem:[%s3996_s2 + $0x18] sm:$0xff] }
 0x105   :  { %282 = vmatpush.msra.mxu1 %v259_v25 }
 0x106   :  { %v136_v27 = vsel %vm135_vm2, %v128_v26, 0.0 }
 0x107   :  { %137 = vadd.xlane.f32.xlu1 %v136_v27  ;;  %v327_v27 = vld [vmem:[%s3960_s12 + $0x18] sm:$0xff] }
 0x108   :  { %344 = vmatpush.msra.mxu3 %v327_v27  ;;  %v3193_v27 = vld [vmem:[%s3999_s27 + $0x8] sm:$0xff] }
 0x10b   :  { %v130_v29 = vpop.f32.mrf.mxu0 }
 0x10c   :  { %v131_v30 = vadd.f32 %v130_v29, %v109_v28  ;;  %v258_v28 = vld [vmem:[%s3996_s2 + $0x10] sm:$0xff] }
 0x10d   :  { %v295_v29 = vld [vmem:[%s3958_s10 + $0x10] sm:$0xff]  ;;  %283 = vmatpush.msra.mxu1 %v258_v28 }
 0x10e   :  { %v139_v31 = vsel %vm135_vm2, %v131_v30, 0.0 }
 0x10f   :  { %140 = vadd.xlane.f32.xlu1 %v139_v31  ;;  %v257_v31 = vld [vmem:[%s3996_s2 + $0x8] sm:$0xff] }
 0x110   :  { %284 = vmatpush.msra.mxu1 %v257_v31 }
 0x112   :  { %285 = vmatpush.msra.mxu1 %v256_v34 }
 0x17a   :  { %v138_v39 = vpop.xlane.xlu1 %137 }
 0x17b   :  { %v149_v40 = vmul.f32 %v3061_v38, %v138_v39 }
 0x17d   :  { %v151_v41 = vsub.f32 %v128_v26, %v149_v40  ;;  %v296_v26 = vld [vmem:[%s3958_s10 + $0x18] sm:$0xff] }
 0x17e   :  { %313 = vmatpush.msra.mxu2 %v296_v26 }
 0x17f   :  { %v153_v42 = vmul.f32 %v151_v41, %v151_v41 }
 0x180   :  { %314 = vmatpush.msra.mxu2 %v295_v29 }
 0x181   :  { %v155_v43 = vsel %vm135_vm2, %v153_v42, 0.0 }
 0x182   :  { %156 = vadd.xlane.f32.xlu2 %v155_v43  ;;  %v141_v44 = vpop.xlane.xlu1 %140  ;;  %315 = vmatpush.msra.mxu2 %v294_v32 }
 0x183   :  { %v150_v45 = vmul.f32 %v3061_v38, %v141_v44 }
 0x184   :  { %316 = vmatpush.msra.mxu2 %v293_v35 }
 0x185   :  { %v152_v46 = vsub.f32 %v131_v30, %v150_v45  ;;  %v326_v30 = vld [vmem:[%s3960_s12 + $0x10] sm:$0xff] }
 0x186   :  { %345 = vmatpush.msra.mxu3 %v326_v30 }
 0x187   :  { %v154_v47 = vmul.f32 %v152_v46, %v152_v46 }
 0x188   :  { %346 = vmatpush.msra.mxu3 %v325_v33 }
 0x189   :  { %v158_v48 = vsel %vm135_vm2, %v154_v47, 0.0 }
 0x18a   :  { %159 = vadd.xlane.f32.xlu2 %v158_v48  ;;  %347 = vmatpush.msra.mxu3 %v324_v36 }
 0x1f5   :  { %v157_v49 = vpop.xlane.xlu2 %156 }
 0x1f6   :  { %v161_v50 = vmul.f32 %v157_v49, %v3061_v38 }
 0x1f8   :  { %v163_v51 = vadd.f32 1e-12, %v161_v50 }
 0x1fa   :  { %2750 = vrsqrt.f32 %v163_v51  ;;  %vm171_vm5 = vweird.f32 %v163_v51 }
 0x1fd   :  { %v160_v52 = vpop.xlane.xlu2 %159 }
 0x1fe   :  { %v162_v53 = vmul.f32 %v160_v52, %v3061_v38  ;;  %v2709_v52 = vld [vmem:[%s3997_s4] ss:$0 sm:$0xff] }
 0x200   :  { %v2751_v54 = vpop.eup %2750  ;;  %v164_v55 = vadd.f32 1e-12, %v162_v53 }
 0x201   :  { %v166_v56 = vmul.f32 %v2751_v54, %v163_v51  ;;  %vm172_vm4 = vweird.f32 %v2751_v54 }
 0x202   :  { %2752 = vrsqrt.f32 %v164_v55  ;;  %vm173_vm6 = vmor %vm171_vm5, %vm172_vm4  ;;  %vm181_vm8 = vweird.f32 %v164_v55 }
 0x203   :  { %v167_v57 = vmul.f32 %v2751_v54, %v166_v56 }
 0x205   :  { %v168_v58 = vmul.f32 0.5, %v167_v57 }
 0x207   :  { %v169_v59 = vsub.f32 1.5, %v168_v58 }
 0x208   :  { %v2753_v60 = vpop.eup %2752 }
 0x209   :  { %v170_v61 = vmul.f32 %v2751_v54, %v169_v59  ;;  %v176_v62 = vmul.f32 %v2753_v60, %v164_v55  ;;  %vm182_vm7 = vweird.f32 %v2753_v60  ;;  %v2710_v55 = vld [vmem:[%s3998_s26] ss:$0 sm:$0xff] }
 0x20a   :  { %vm183_vm9 = vmor %vm181_vm8, %vm182_vm7 }
 0x20b   :  { %v174_v0 = vsel %vm173_vm6, %v2751_v54, %v170_v61  ;;  %v177_v1 = vmul.f32 %v2753_v60, %v176_v62 }
 0x20c   :  { %v185_v2 = vmul.f32 %v174_v0, %v151_v41 }
 0x20d   :  { %v178_v4 = vmul.f32 0.5, %v177_v1 }
 0x20e   :  { %v190_v5 = vmul.f32 %v2707_v63, %v185_v2 }
 0x20f   :  { %v179_v6 = vsub.f32 1.5, %v178_v4  ;;  %v2712_v4 = vld [vmem:[%s3959_s11] ss:$0 sm:$0xff] }
 0x210   :  { %v3075_v7 = vadd.f32 %v2708_v3, %v190_v5 }
 0x211   :  { %v180_v8 = vmul.f32 %v2753_v60, %v179_v6  ;;  %v2713_v6 = vld [vmem:[%s3961_s13] ss:$0 sm:$0xff] }
 0x212   :  { %v201_v9 = vsel %vm135_vm2, %v3075_v7, 0.0 }
 0x213   :  { %v184_v10 = vsel %vm183_vm9, %v2753_v60, %v180_v8  ;;  %202 = vadd.xlane.f32.xlu0 %v201_v9  ;;  %vm1257_vm9 = vcmask 523264  }
 0x214   :  { %v186_v11 = vmul.f32 %v184_v10, %v152_v46 }
 0x216   :  { %v191_v12 = vmul.f32 %v2707_v63, %v186_v11 }
 0x218   :  { %v3079_v13 = vadd.f32 %v2708_v3, %v191_v12  ;;  %v2711_v12 = vld [vmem:[%s3957_s9] ss:$0 sm:$0xff] }
 0x21a   :  { %v204_v14 = vsel %vm135_vm2, %v3079_v13, 0.0 }
 0x21b   :  { %205 = vadd.xlane.f32.xlu1 %v204_v14 }
 0x286   :  { %v203_v15 = vpop.xlane.xlu0 %202 }
 0x287   :  { %v207_v16 = vmul.f32 %v203_v15, %v3061_v38 }
 0x289   :  { %v209_v17 = vsub.f32 %v3075_v7, %v207_v16  ;;  %v2466_v16 = vld [vmem:[%s3996_s2 + $0x38] sm:$0xff] }
 0x28b   :  { %v211_v18 = vmul.f32 %v209_v17, %v209_v17 }
 0x28d   :  { %v213_v19 = vsel %vm135_vm2, %v211_v18, 0.0  ;;  %v2465_v18 = vld [vmem:[%s3996_s2 + $0x30] sm:$0xff] }
 0x28e   :  { %v206_v20 = vpop.xlane.xlu1 %205  ;;  %214 = vadd.xlane.f32.xlu2 %v213_v19  ;;  %v2464_v19 = vld [vmem:[%s3996_s2 + $0x28] sm:$0xff] }
 0x28f   :  { %v208_v21 = vmul.f32 %v206_v20, %v3061_v38  ;;  %v2463_v20 = vld [vmem:[%s3996_s2 + $0x20] sm:$0xff] }
 0x291   :  { %v3088_v22 = vsub.f32 %v3079_v13, %v208_v21 }
 0x293   :  { %v212_v23 = vmul.f32 %v3088_v22, %v3088_v22 }
 0x295   :  { %v216_v24 = vsel %vm135_vm2, %v212_v23, 0.0  ;;  %v3186_v23 = vld [vmem:[%s3999_s27] sm:$0xff] }
 0x296   :  { %217 = vadd.xlane.f32.xlu1 %v216_v24 }
 0x301   :  { %v215_v37 = vpop.xlane.xlu2 %214 }
 0x302   :  { %v219_v39 = vmul.f32 %v215_v37, %v3061_v38 }
 0x304   :  { %v221_v40 = vadd.f32 1e-05, %v219_v39 }
 0x306   :  { %2754 = vrsqrt.f32 %v221_v40  ;;  %vm229_vm11 = vweird.f32 %v221_v40 }
 0x309   :  { %v218_v41 = vpop.xlane.xlu1 %217 }
 0x30a   :  { %v220_v42 = vmul.f32 %v218_v41, %v3061_v38 }
 0x30c   :  { %v2755_v43 = vpop.eup %2754  ;;  %v222_v44 = vadd.f32 1e-05, %v220_v42  ;;  %v2473_v42 = vld [vmem:[%s3958_s10 + $0x38] sm:$0xff] }
 0x30d   :  { %v224_v45 = vmul.f32 %v2755_v43, %v221_v40  ;;  %vm230_vm10 = vweird.f32 %v2755_v43 }
 0x30e   :  { %2756 = vrsqrt.f32 %v222_v44  ;;  %vm231_vm12 = vmor %vm229_vm11, %vm230_vm10  ;;  %vm239_vm14 = vweird.f32 %v222_v44 }
 0x30f   :  { %v225_v46 = vmul.f32 %v2755_v43, %v224_v45  ;;  %v2470_v45 = vld [vmem:[%s3958_s10 + $0x20] sm:$0xff] }
 0x311   :  { %v226_v47 = vmul.f32 0.5, %v225_v46 }
 0x313   :  { %v227_v48 = vsub.f32 1.5, %v226_v47 }
 0x314   :  { %v2757_v49 = vpop.eup %2756 }
 0x315   :  { %v228_v50 = vmul.f32 %v2755_v43, %v227_v48  ;;  %v234_v51 = vmul.f32 %v2757_v49, %v222_v44  ;;  %vm240_vm13 = vweird.f32 %v2757_v49  ;;  %v2471_v44 = vld [vmem:[%s3958_s10 + $0x28] sm:$0xff] }
 0x316   :  { %vm241_vm15 = vmor %vm239_vm14, %vm240_vm13 }
 0x317   :  { %v232_v53 = vsel %vm231_vm12, %v2755_v43, %v228_v50  ;;  %v235_v54 = vmul.f32 %v2757_v49, %v234_v51  ;;  %v2472_v43 = vld [vmem:[%s3958_s10 + $0x30] sm:$0xff] }
 0x318   :  { %v243_v56 = vmul.f32 %v232_v53, %v209_v17  ;;  %v2480_v53 = vld [vmem:[%s3960_s12 + $0x38] sm:$0xff] }
 0x319   :  { %v236_v57 = vmul.f32 0.5, %v235_v54  ;;  %v2479_v54 = vld [vmem:[%s3960_s12 + $0x30] sm:$0xff] }
 0x31a   :  { %v248_v58 = vmul.f32 %v2709_v52, %v243_v56  ;;  %v2477_v56 = vld [vmem:[%s3960_s12 + $0x20] sm:$0xff] }
 0x31b   :  { %v237_v59 = vsub.f32 1.5, %v236_v57  ;;  %v2496_v57 = vld [vmem:[%s3996_s2 + $0x58] sm:$0xff] }
 0x31c   :  { %v3137_v60 = vadd.f32 %v2710_v55, %v248_v58 }
 0x31d   :  { %v238_v61 = vmul.f32 %v2757_v49, %v237_v59  ;;  %v2495_v59 = vld [vmem:[%s3996_s2 + $0x50] sm:$0xff] }
 0x31e   :  { %2449 = vmatmul.msk.f32.vlgmr.msra.gmra.mxu1 %vm135_vm2, %v3137_v60  ;;  %2451 = vmatmul.msk.f32.vlgmr.msra.gmra.mxu2 %vm135_vm2, %v3137_v60 }
 0x31f   :  { %v242_v62 = vsel %vm241_vm15, %v2757_v49, %v238_v61  ;;  %2453 = vmatmul.msk.f32.vlgmr.msra.gmra.mxu3 %vm135_vm2, %v3137_v60  ;;  %v2494_v61 = vld [vmem:[%s3996_s2 + $0x48] sm:$0xff] }
 0x320   :  { %v244_v63 = vmul.f32 %v242_v62, %v3088_v22  ;;  %v2493_v62 = vld [vmem:[%s3996_s2 + $0x40] sm:$0xff] }
 0x322   :  { %v249_v0 = vmul.f32 %v2709_v52, %v244_v63  ;;  %v443_v52 = vld [vmem:[%s3962_s14] sm:$0xff] }
 0x323   :  { %465 = vmatpush.msrb.mxu3 %v443_v52  ;;  %v2507_v52 = vld [vmem:[%s3960_s12 + $0x40] sm:$0xff] }
 0x324   :  { %v3146_v1 = vadd.f32 %v2710_v55, %v249_v0  ;;  %v2478_v55 = vld [vmem:[%s3960_s12 + $0x28] sm:$0xff] }
 0x325   :  { %566 = vmatpush.msra.mxu3 %v2480_v53 }
 0x326   :  { %2450 = vmatmul.msk.f32.gmra.mxu1 %vm135_vm2, %v3146_v1  ;;  %2452 = vmatmul.msk.f32.gmra.mxu2 %vm135_vm2, %v3146_v1 }
 0x327   :  { %2454 = vmatmul.msk.f32.gmra.mxu3 %vm135_vm2, %v3146_v1 }
 0x328   :  { %567 = vmatpush.msra.mxu3 %v2479_v54 }
 0x32a   :  { %568 = vmatpush.msra.mxu3 %v2478_v55 }
 0x32c   :  { %569 = vmatpush.msra.mxu3 %v2477_v56 }
 0x39b   :  { %v287_v11 = vpop.f32.mrf.mxu1 }
 0x39c   :  { %v288_v17 = vadd.f32 %v2711_v12, %v287_v11  ;;  %v2502_v11 = vld [vmem:[%s3958_s10 + $0x50] sm:$0xff] }
 0x3a1   :  { %v318_v2 = vpop.f32.mrf.mxu2 }
 0x3a2   :  { %v349_v3 = vpop.f32.mrf.mxu3  ;;  %v319_v15 = vadd.f32 %v2712_v4, %v318_v2  ;;  %v2715_v2 = vld [vmem:[%s3959_s11 + $0x1] ss:$0 sm:$0xff] }
 0x3a3   :  { %v350_v14 = vadd.f32 %v2713_v6, %v349_v3  ;;  %v290_v21 = vpop.f32.mrf.mxu1 }
 0x3a4   :  { %v291_v22 = vadd.f32 %v2711_v12, %v290_v21  ;;  %v2501_v12 = vld [vmem:[%s3958_s10 + $0x48] sm:$0xff]  ;;  %v2717_v21 = vld [vmem:[%s3961_s13 + $0x1] ss:$0 sm:$0xff] }
 0x3a9   :  { %v321_v5 = vpop.f32.mrf.mxu2 }
 0x3aa   :  { %v322_v8 = vadd.f32 %v2712_v4, %v321_v5  ;;  %v352_v9 = vpop.f32.mrf.mxu3 }
 0x3ab   :  { %v353_v10 = vadd.f32 %v2713_v6, %v352_v9  ;;  %v2714_v6 = vld [vmem:[%s3957_s9 + $0x1] ss:$0 sm:$0xff]  ;;  %v2503_v9 = vld [vmem:[%s3958_s10 + $0x58] sm:$0xff] }
 0x3ac   :  { %2455 = vmatpush.xpose.msk.msrb.mxu1 %vm355_vm0, %v322_v8 }
 0x3ad   :  { %434 = vmatpush.msrb.mxu2 %v353_v10 }
 0x3af   :  { %435 = vmatpush.msrb.mxu2 %v350_v14  ;;  %v2500_v14 = vld [vmem:[%s3958_s10 + $0x40] sm:$0xff] }
 0x3b0   :  { %2456 = vmatpush.xpose.msk.msrb.mxu1 %vm355_vm0, %v319_v15 }
 0x3b1   :  { %533 = vmatpush.msra.mxu2 %v2473_v42 }
 0x3b3   :  { %2457 = vmatmul.msk.f32.vlgmr.msrb.gmra.mxu1 %vm355_vm0, %v288_v17  ;;  %534 = vmatpush.msra.mxu2 %v2472_v43 }
 0x3b4   :  { %500 = vmatpush.msra.mxu1 %v2466_v16 }
 0x3b5   :  { %535 = vmatpush.msra.mxu2 %v2471_v44 }
 0x3b6   :  { %501 = vmatpush.msra.mxu1 %v2465_v18 }
 0x3b7   :  { %536 = vmatpush.msra.mxu2 %v2470_v45 }
 0x3b8   :  { %502 = vmatpush.msra.mxu1 %v2464_v19 }
 0x3ba   :  { %503 = vmatpush.msra.mxu1 %v2463_v20  ;;  %v2490_v20 = vld [vmem:[%s3962_s14 + $0x8] sm:$0xff] }
 0x3bb   :  { %2458 = vmatmul.msk.f32.gmra.mxu1 %vm355_vm0, %v291_v22 }
 0x3c3   :  { %2468 = vmatmul.msk.f32.vlgmr.msra.gmra.mxu1 %vm135_vm2, %v3137_v60 }
 0x3cb   :  { %2469 = vmatmul.msk.f32.gmra.mxu1 %vm135_vm2, %v3146_v1 }
 0x430   :  { %v385_v24 = vpop.f32.mrf.mxu1 }
 0x431   :  { %v386_v25 = vadd.f32 %v385_v24, %v3186_v23 }
 0x433   :  { %v392_v26 = vsel %vm391_vm1, %v386_v25, -inf }
 0x434   :  { %393 = vmax.xlane.f32.xlu2 %v392_v26 }
 0x438   :  { %v388_v28 = vpop.f32.mrf.mxu1 }
 0x439   :  { %v389_v29 = vadd.f32 %v388_v28, %v3193_v27 }
 0x43b   :  { %v395_v30 = vsel %vm391_vm1, %v389_v29, -inf }
 0x43c   :  { %396 = vmax.xlane.f32.xlu1 %v395_v30 }
 0x440   :  { %v505_v5 = vpop.f32.mrf.mxu1 }
 0x441   :  { %v506_v10 = vadd.f32 %v2714_v6, %v505_v5  ;;  %v2530_v5 = vld [vmem:[%s3958_s10 + $0x60] sm:$0xff] }
 0x448   :  { %v508_v15 = vpop.f32.mrf.mxu1 }
 0x449   :  { %v509_v16 = vadd.f32 %v2714_v6, %v508_v15  ;;  %v2720_v15 = vld [vmem:[%s3961_s13 + $0x2] ss:$0 sm:$0xff] }
 0x4a7   :  { %v394_v31 = vpop.xlane.xlu2 %393 }
 0x4a8   :  { %v398_v32 = vsub.f32 %v386_v25, %v394_v31 }
 0x4aa   :  { %v400_v33 = vmul.f32 1.442695, %v398_v32 }
 0x4ac   :  { %2758 = vpow2.f32 %v400_v33 }
 0x4af   :  { %v397_v34 = vpop.xlane.xlu1 %396 }
 0x4b0   :  { %v399_v35 = vsub.f32 %v389_v29, %v397_v34  ;;  %v2719_v34 = vld [vmem:[%s3959_s11 + $0x2] ss:$0 sm:$0xff] }
 0x4b2   :  { %v2759_v36 = vpop.eup %2758  ;;  %v402_v37 = vmul.f32 1.442695, %v399_v35 }
 0x4b3   :  { %v404_v39 = vsel %vm391_vm1, %v2759_v36, 0.0 }
 0x4b4   :  { %2760 = vpow2.f32 %v402_v37  ;;  %405 = vadd.xlane.f32.xlu2 %v404_v39 }
 0x4ba   :  { %v2761_v40 = vpop.eup %2760 }
 0x4bb   :  { %v407_v41 = vsel %vm391_vm1, %v2761_v40, 0.0 }
 0x4bc   :  { %408 = vadd.xlane.f32.xlu1 %v407_v41 }
 0x527   :  { %v406_v46 = vpop.xlane.xlu2 %405 }
 0x528   :  { %2762 = vrcp.f32 %v406_v46 }
 0x52e   :  { %v2763_v47 = vpop.eup %2762 }
 0x52f   :  { %v409_v48 = vpop.xlane.xlu1 %408  ;;  %v412_v49 = vmul.f32 %v2763_v47, %v2759_v36 }
 0x530   :  { %2764 = vrcp.f32 %v409_v48 }
 0x531   :  { %2459 = vmatmul.msk.f32.vlgmr.msrb.gmra.mxu2 %vm391_vm1, %v412_v49  ;;  %v2510_v49 = vld [vmem:[%s3960_s12 + $0x58] sm:$0xff] }
 0x532   :  { %686 = vmatpush.msrb.mxu2 %v2490_v20 }
 0x536   :  { %v2765_v50 = vpop.eup %2764 }
 0x537   :  { %v413_v51 = vmul.f32 %v2765_v50, %v2761_v40  ;;  %v2509_v50 = vld [vmem:[%s3960_s12 + $0x50] sm:$0xff] }
 0x539   :  { %2460 = vmatmul.msk.f32.gmra.mxu2 %vm391_vm1, %v413_v51  ;;  %v2508_v51 = vld [vmem:[%s3960_s12 + $0x48] sm:$0xff] }
 0x541   :  { %2475 = vmatmul.msk.f32.vlgmr.msra.gmra.mxu2 %vm135_vm2, %v3137_v60 }
 0x549   :  { %2476 = vmatmul.msk.f32.gmra.mxu2 %vm135_vm2, %v3146_v1 }
 0x5b4   :  { %v437_v58 = vpop.f32.mrf.mxu2 }
 0x5b5   :  { %2461 = vmatmul.msk.f32.vlgmr.msrb.gmra.mxu3 %vm355_vm0, %v437_v58  ;;  %v2525_v58 = vld [vmem:[%s3996_s2 + $0x70] sm:$0xff] }
 0x5b6   :  { %718 = vmatpush.msrb.mxu3 %v2496_v57  ;;  %v2526_v57 = vld [vmem:[%s3996_s2 + $0x78] sm:$0xff] }
 0x5b8   :  { %719 = vmatpush.msrb.mxu3 %v2495_v59  ;;  %v2524_v59 = vld [vmem:[%s3996_s2 + $0x68] sm:$0xff] }
 0x5ba   :  { %720 = vmatpush.msrb.mxu3 %v2494_v61  ;;  %v2523_v61 = vld [vmem:[%s3996_s2 + $0x60] sm:$0xff] }
 0x5bc   :  { %v440_v63 = vpop.f32.mrf.mxu2  ;;  %721 = vmatpush.msrb.mxu3 %v2493_v62 }
 0x5bd   :  { %2462 = vmatmul.msk.f32.gmra.mxu3 %vm355_vm0, %v440_v63 }
 0x5c4   :  { %v538_v0 = vpop.f32.mrf.mxu2 }
 0x5c5   :  { %2482 = vmatmul.msk.f32.vlgmr.msra.gmra.mxu3 %vm135_vm2, %v3137_v60  ;;  %v539_v8 = vadd.f32 %v2715_v2, %v538_v0  ;;  %v2533_v0 = vld [vmem:[%s3958_s10 + $0x78] sm:$0xff] }
 0x5cc   :  { %v541_v3 = vpop.f32.mrf.mxu2 }
 0x5cd   :  { %v542_v4 = vadd.f32 %v2715_v2, %v541_v3  ;;  %2483 = vmatmul.msk.f32.gmra.mxu3 %vm135_vm2, %v3146_v1  ;;  %v2532_v3 = vld [vmem:[%s3958_s10 + $0x70] sm:$0xff] }
 0x5cf   :  { %2484 = vmatpush.xpose.msk.msrb.mxu0 %vm355_vm0, %v542_v4  ;;  %v2531_v4 = vld [vmem:[%s3958_s10 + $0x68] sm:$0xff] }
 0x5d3   :  { %2485 = vmatpush.xpose.msk.msrb.mxu0 %vm355_vm0, %v539_v8 }
 0x5d5   :  { %2498 = vmatmul.msk.f32.vlgmr.msrb.gmra.mxu3 %vm135_vm2, %v3137_v60 }
 0x5d6   :  { %2486 = vmatmul.msk.f32.vlgmr.msrb.gmra.mxu0 %vm355_vm0, %v506_v10 }
 0x5d7   :  { %751 = vmatpush.msra.mxu0 %v2503_v9  ;;  %v2718_v9 = vld [vmem:[%s3957_s9 + $0x2] ss:$0 sm:$0xff] }
 0x5d9   :  { %752 = vmatpush.msra.mxu0 %v2502_v11 }
 0x5db   :  { %753 = vmatpush.msra.mxu0 %v2501_v12 }
 0x5dd   :  { %754 = vmatpush.msra.mxu0 %v2500_v14  ;;  %2499 = vmatmul.msk.f32.gmra.mxu3 %vm135_vm2, %v3146_v1 }
 0x5de   :  { %2487 = vmatmul.msk.f32.gmra.mxu0 %vm355_vm0, %v509_v16 }
 0x5e6   :  { %2505 = vmatmul.msk.f32.vlgmr.msra.gmra.mxu0 %vm135_vm2, %v3137_v60 }
 0x5ee   :  { %2506 = vmatmul.msk.f32.gmra.mxu0 %vm135_vm2, %v3146_v1 }
 0x638   :  { %v3280_v17 = vpop.f32.mrf.mxu3 }
 0x640   :  { %v3282_v18 = vpop.f32.mrf.mxu3 }
 0x648   :  { %v571_v19 = vpop.f32.mrf.mxu3 }
 0x649   :  { %v572_v25 = vadd.f32 %v2717_v21, %v571_v19 }
 0x650   :  { %v574_v22 = vpop.f32.mrf.mxu3 }
 0x651   :  { %v575_v24 = vadd.f32 %v2717_v21, %v574_v22 }
 0x653   :  { %v606_v26 = vpop.f32.mrf.mxu0  ;;  %654 = vmatpush.msrb.mxu1 %v575_v24  ;;  %v2520_v24 = vld [vmem:[%s3962_s14 + $0x10] sm:$0xff] }
 0x654   :  { %v607_v28 = vadd.f32 %v606_v26, %v3186_v23  ;;  %904 = vmatpush.msrb.mxu0 %v2520_v24 }
 0x655   :  { %655 = vmatpush.msrb.mxu1 %v572_v25 }
 0x656   :  { %v612_v29 = vsel %vm391_vm1, %v607_v28, -inf }
 0x657   :  { %613 = vmax.xlane.f32.xlu2 %v612_v29  ;;  %784 = vmatpush.msra.mxu1 %v2510_v49  ;;  %v2539_v49 = vld [vmem:[%s3960_s12 + $0x70] sm:$0xff] }
 0x658   :  { %v723_v8 = vpop.f32.mrf.mxu3 }
 0x659   :  { %785 = vmatpush.msra.mxu1 %v2509_v50  ;;  %v724_v10 = vadd.f32 %v2718_v9, %v723_v8  ;;  %v2538_v50 = vld [vmem:[%s3960_s12 + $0x68] sm:$0xff] }
 0x65b   :  { %v609_v30 = vpop.f32.mrf.mxu0  ;;  %786 = vmatpush.msra.mxu1 %v2508_v51  ;;  %v2537_v51 = vld [vmem:[%s3960_s12 + $0x60] sm:$0xff] }
 0x65c   :  { %v610_v31 = vadd.f32 %v609_v30, %v3193_v27 }
 0x65d   :  { %787 = vmatpush.msra.mxu1 %v2507_v52 }
 0x65e   :  { %v615_v32 = vsel %vm391_vm1, %v610_v31, -inf }
 0x65f   :  { %616 = vmax.xlane.f32.xlu1 %v615_v32 }
 0x660   :  { %v726_v12 = vpop.f32.mrf.mxu3 }
 0x661   :  { %v727_v14 = vadd.f32 %v2718_v9, %v726_v12 }
 0x663   :  { %v756_v33 = vpop.f32.mrf.mxu0 }
 0x664   :  { %v757_v37 = vadd.f32 %v2719_v34, %v756_v33  ;;  %v2722_v33 = vld [vmem:[%s3959_s11 + $0x3] ss:$0 sm:$0xff] }
 0x66b   :  { %v759_v35 = vpop.f32.mrf.mxu0 }
 0x66c   :  { %v760_v36 = vadd.f32 %v2719_v34, %v759_v35 }
 0x66e   :  { %2514 = vmatpush.xpose.msk.msra.mxu2 %vm355_vm0, %v760_v36 }
 0x672   :  { %2515 = vmatpush.xpose.msk.msra.mxu2 %vm355_vm0, %v757_v37 }
 0x6ca   :  { %v614_v39 = vpop.xlane.xlu2 %613 }
 0x6cb   :  { %v618_v40 = vsub.f32 %v607_v28, %v614_v39 }
 0x6cd   :  { %v620_v41 = vmul.f32 1.442695, %v618_v40 }
 0x6cf   :  { %2766 = vpow2.f32 %v620_v41 }
 0x6d2   :  { %v617_v42 = vpop.xlane.xlu1 %616 }
 0x6d3   :  { %v619_v43 = vsub.f32 %v610_v31, %v617_v42 }
 0x6d5   :  { %v2767_v44 = vpop.eup %2766  ;;  %v622_v45 = vmul.f32 1.442695, %v619_v43 }
 0x6d6   :  { %v624_v46 = vsel %vm391_vm1, %v2767_v44, 0.0 }
 0x6d7   :  { %2768 = vpow2.f32 %v622_v45  ;;  %625 = vadd.xlane.f32.xlu2 %v624_v46 }
 0x6dd   :  { %v2769_v47 = vpop.eup %2768 }
 0x6de   :  { %v627_v48 = vsel %vm391_vm1, %v2769_v47, 0.0 }
 0x6df   :  { %628 = vadd.xlane.f32.xlu1 %v627_v48  ;;  %v2540_v48 = vld [vmem:[%s3960_s12 + $0x78] sm:$0xff] }
 0x74a   :  { %v626_v53 = vpop.xlane.xlu2 %625 }
 0x74b   :  { %2770 = vrcp.f32 %v626_v53 }
 0x751   :  { %v2771_v54 = vpop.eup %2770 }
 0x752   :  { %v632_v55 = vmul.f32 %v2771_v54, %v2767_v44  ;;  %v629_v56 = vpop.xlane.xlu1 %628 }
 0x753   :  { %2772 = vrcp.f32 %v629_v56 }
 0x754   :  { %2488 = vmatmul.msk.f32.vlgmr.msrb.gmra.mxu1 %vm391_vm1, %v632_v55 }
 0x755   :  { %936 = vmatpush.msrb.mxu1 %v2526_v57 }
 0x757   :  { %937 = vmatpush.msrb.mxu1 %v2525_v58 }
 0x759   :  { %v2773_v62 = vpop.eup %2772  ;;  %938 = vmatpush.msrb.mxu1 %v2524_v59 }
 0x75a   :  { %v633_v63 = vmul.f32 %v2773_v62, %v2769_v47  ;;  %v2721_v62 = vld [vmem:[%s3957_s9 + $0x3] ss:$0 sm:$0xff] }
 0x75b   :  { %939 = vmatpush.msrb.mxu1 %v2523_v61 }
 0x75c   :  { %2489 = vmatmul.msk.f32.gmra.mxu1 %vm391_vm1, %v633_v63 }
 0x764   :  { %2512 = vmatmul.msk.f32.vlgmr.msra.gmra.mxu1 %vm135_vm2, %v3137_v60 }
 0x76c   :  { %2513 = vmatmul.msk.f32.gmra.mxu1 %vm135_vm2, %v3146_v1 }
 0x774   :  { %2528 = vmatmul.msk.f32.vlgmr.msrb.gmra.mxu1 %vm135_vm2, %v3137_v60 }
 0x77c   :  { %2529 = vmatmul.msk.f32.gmra.mxu1 %vm135_vm2, %v3146_v1 }
 0x7d1   :  { %v657_v2 = vpop.f32.mrf.mxu1 }
 0x7d2   :  { %2491 = vmatmul.msk.f32.vlgmr.msrb.gmra.mxu2 %vm355_vm0, %v657_v2 }
 0x7d3   :  { %969 = vmatpush.msrb.mxu2 %v2533_v0 }
 0x7d5   :  { %970 = vmatpush.msrb.mxu2 %v2532_v3 }
 0x7d7   :  { %971 = vmatpush.msrb.mxu2 %v2531_v4 }
 0x7d9   :  { %v660_v6 = vpop.f32.mrf.mxu1  ;;  %972 = vmatpush.msrb.mxu2 %v2530_v5 }
 0x7da   :  { %2492 = vmatmul.msk.f32.gmra.mxu2 %vm355_vm0, %v660_v6  ;;  %v2716_v6 = vld [vmem:[%s3963_s15] ss:$0 sm:$0xff] }
 0x7db   :  { %v476_v8 = vadd.f32 %v2716_v6, %v3280_v17  ;;  %v477_v12 = vadd.f32 %v2716_v6, %v3282_v18 }
 0x7e1   :  { %v789_v11 = vpop.f32.mrf.mxu1 }
 0x7e2   :  { %2516 = vmatmul.msk.f32.vlgmr.msra.gmra.mxu2 %vm355_vm0, %v724_v10  ;;  %v790_v20 = vadd.f32 %v2720_v15, %v789_v11 }
 0x7e9   :  { %v792_v16 = vpop.f32.mrf.mxu1 }
 0x7ea   :  { %v793_v19 = vadd.f32 %v2720_v15, %v792_v16  ;;  %2517 = vmatmul.msk.f32.gmra.mxu2 %vm355_vm0, %v727_v14 }
 0x7ec   :  { %872 = vmatpush.msra.mxu3 %v793_v19 }
 0x7ee   :  { %873 = vmatpush.msra.mxu3 %v790_v20 }
 0x7f0   :  { %1002 = vmatpush.msrb.mxu3 %v2540_v48 }
 0x7f1   :  { %v941_v61 = vpop.f32.mrf.mxu1 }
 0x7f2   :  { %2535 = vmatmul.msk.f32.vlgmr.msrb.gmra.mxu2 %vm135_vm2, %v3137_v60  ;;  %1003 = vmatpush.msrb.mxu3 %v2539_v49  ;;  %v942_v63 = vadd.f32 %v2721_v62, %v941_v61  ;;  %v1192_v61 = vld [vmem:[%s3966_s18 + $0x10] sm:$0xff] }
 0x7f4   :  { %1004 = vmatpush.msrb.mxu3 %v2538_v50 }
 0x7f6   :  { %1005 = vmatpush.msrb.mxu3 %v2537_v51 }
 0x7f9   :  { %v944_v2 = vpop.f32.mrf.mxu1 }
 0x7fa   :  { %2536 = vmatmul.msk.f32.gmra.mxu2 %vm135_vm2, %v3146_v1 }
 0x855   :  { %v3361_v21 = vpop.f32.mrf.mxu2 }
 0x856   :  { %v694_v9 = vadd.f32 %v3361_v21, %v476_v8 }
 0x85d   :  { %v3363_v22 = vpop.f32.mrf.mxu2 }
 0x85e   :  { %v695_v14 = vadd.f32 %v3363_v22, %v477_v12 }
 0x865   :  { %v824_v25 = vpop.f32.mrf.mxu2 }
 0x866   :  { %v825_v26 = vadd.f32 %v824_v25, %v3186_v23 }
 0x868   :  { %v830_v28 = vsel %vm391_vm1, %v825_v26, -inf }
 0x869   :  { %831 = vmax.xlane.f32.xlu2 %v830_v28 }
 0x86d   :  { %v827_v29 = vpop.f32.mrf.mxu2 }
 0x86e   :  { %v828_v30 = vadd.f32 %v827_v29, %v3193_v27 }
 0x870   :  { %v833_v31 = vsel %vm391_vm1, %v828_v30, -inf }
 0x871   :  { %834 = vmax.xlane.f32.xlu0 %v833_v31 }
 0x875   :  { %v974_v32 = vpop.f32.mrf.mxu2 }
 0x876   :  { %v975_v36 = vadd.f32 %v2722_v33, %v974_v32 }
 0x87d   :  { %v977_v34 = vpop.f32.mrf.mxu2 }
 0x87e   :  { %v978_v35 = vadd.f32 %v2722_v33, %v977_v34 }
 0x880   :  { %2544 = vmatpush.xpose.msk.msra.mxu0 %vm355_vm0, %v978_v35 }
 0x884   :  { %2545 = vmatpush.xpose.msk.msra.mxu0 %vm355_vm0, %v975_v36 }
 0x8dc   :  { %v832_v37 = vpop.xlane.xlu2 %831 }
 0x8dd   :  { %v836_v39 = vsub.f32 %v825_v26, %v832_v37 }
 0x8df   :  { %v838_v40 = vmul.f32 1.442695, %v836_v39 }
 0x8e1   :  { %2774 = vpow2.f32 %v838_v40 }
 0x8e4   :  { %v835_v41 = vpop.xlane.xlu0 %834 }
 0x8e5   :  { %v837_v42 = vsub.f32 %v828_v30, %v835_v41 }
 0x8e7   :  { %v2775_v43 = vpop.eup %2774  ;;  %v840_v44 = vmul.f32 1.442695, %v837_v42 }
 0x8e8   :  { %v842_v45 = vsel %vm391_vm1, %v2775_v43, 0.0 }
 0x8e9   :  { %2776 = vpow2.f32 %v840_v44  ;;  %843 = vadd.xlane.f32.xlu1 %v842_v45 }
 0x8ef   :  { %v2777_v46 = vpop.eup %2776 }
 0x8f0   :  { %v845_v47 = vsel %vm391_vm1, %v2777_v46, 0.0 }
 0x8f1   :  { %846 = vadd.xlane.f32.xlu2 %v845_v47 }
 0x95c   :  { %v844_v52 = vpop.xlane.xlu1 %843 }
 0x95d   :  { %2778 = vrcp.f32 %v844_v52 }
 0x963   :  { %v2779_v53 = vpop.eup %2778 }
 0x964   :  { %v850_v54 = vmul.f32 %v2779_v53, %v2775_v43  ;;  %v847_v55 = vpop.xlane.xlu2 %846 }
 0x965   :  { %2780 = vrcp.f32 %v847_v55 }
 0x966   :  { %2518 = vmatmul.msk.f32.vlgmr.msra.gmra.mxu3 %vm391_vm1, %v850_v54 }
 0x96b   :  { %v2781_v56 = vpop.eup %2780 }
 0x96c   :  { %v851_v57 = vmul.f32 %v2781_v56, %v2777_v46 }
 0x96e   :  { %2519 = vmatmul.msk.f32.gmra.mxu3 %vm391_vm1, %v851_v57 }
 0x976   :  { %2542 = vmatmul.msk.f32.vlgmr.msrb.gmra.mxu3 %vm135_vm2, %v3137_v60  ;;  %v945_v60 = vadd.f32 %v2721_v62, %v944_v2  ;;  %v1191_v62 = vld [vmem:[%s3966_s18 + $0x8] sm:$0xff] }
 0x97e   :  { %2543 = vmatmul.msk.f32.gmra.mxu3 %vm135_vm2, %v3146_v1  ;;  %v2723_v1 = vld [vmem:[%s3961_s13 + $0x3] ss:$0 sm:$0xff] }
 0x9e9   :  { %v875_v58 = vpop.f32.mrf.mxu3 }
 0x9ea   :  { %2521 = vmatmul.msk.f32.vlgmr.msrb.gmra.mxu0 %vm355_vm0, %v875_v58 }
 0x9f1   :  { %v878_v59 = vpop.f32.mrf.mxu3 }
 0x9f2   :  { %2522 = vmatmul.msk.f32.gmra.mxu0 %vm355_vm0, %v878_v59  ;;  %v1193_v59 = vld [vmem:[%s3966_s18 + $0x18] sm:$0xff] }
 0x9f3   :  { %1216 = vmatpush.msra.mxu3 %v1193_v59 }
 0x9f5   :  { %1217 = vmatpush.msra.mxu3 %v1192_v61 }
 0x9f7   :  { %1218 = vmatpush.msra.mxu3 %v1191_v62  ;;  %v2727_v62 = vld [vmem:[%s3969_s21] ss:$0 sm:$0xff] }
 0x9f9   :  { %v1007_v0 = vpop.f32.mrf.mxu3 }
 0x9fa   :  { %2546 = vmatmul.msk.f32.vlgmr.msra.gmra.mxu0 %vm355_vm0, %v942_v63  ;;  %v1008_v5 = vadd.f32 %v2723_v1, %v1007_v0  ;;  %v1190_v63 = vld [vmem:[%s3966_s18] sm:$0xff] }
 0x9fb   :  { %1219 = vmatpush.msra.mxu3 %v1190_v63 }
 0xa01   :  { %v1010_v3 = vpop.f32.mrf.mxu3 }
 0xa02   :  { %v1011_v4 = vadd.f32 %v2723_v1, %v1010_v3  ;;  %2547 = vmatmul.msk.f32.gmra.mxu0 %vm355_vm0, %v945_v60 }
 0xa04   :  { %1090 = vmatpush.msra.mxu1 %v1011_v4 }
 0xa06   :  { %1091 = vmatpush.msra.mxu1 %v1008_v5 }
 0xa67   :  { %v906_v10 = vpop.f32.mrf.mxu0 }
 0xa68   :  { %v912_v11 = vadd.f32 %v906_v10, %v694_v9 }
 0xa6f   :  { %v909_v15 = vpop.f32.mrf.mxu0 }
 0xa70   :  { %v913_v16 = vadd.f32 %v909_v15, %v695_v14  ;;  %v2724_v15 = vld [vmem:[%s3964_s16] ss:$0 sm:$0xff] }
 0xa77   :  { %v1042_v19 = vpop.f32.mrf.mxu0 }
 0xa78   :  { %v1043_v20 = vadd.f32 %v1042_v19, %v3186_v23 }
 0xa7a   :  { %v1048_v24 = vsel %vm391_vm1, %v1043_v20, -inf }
 0xa7b   :  { %1049 = vmax.xlane.f32.xlu0 %v1048_v24  ;;  %v2725_v24 = vld [vmem:[%s3965_s17] ss:$0 sm:$0xff] }
 0xa7f   :  { %v1045_v25 = vpop.f32.mrf.mxu0 }
 0xa80   :  { %v1046_v26 = vadd.f32 %v1045_v25, %v3193_v27  ;;  %v2550_v27 = vld [vmem:[%s3962_s14 + $0x18] sm:$0xff] }
 0xa81   :  { %1122 = vmatpush.msra.mxu2 %v2550_v27  ;;  %v1248_v27 = vld [vmem:[%s3968_s20 + $0x18] sm:$0xff] }
 0xa82   :  { %v1051_v17 = vsel %vm391_vm1, %v1046_v26, -inf }
 0xa83   :  { %1052 = vmax.xlane.f32.xlu1 %v1051_v17 }
 0xaee   :  { %v1050_v21 = vpop.xlane.xlu0 %1049 }
 0xaef   :  { %v1054_v28 = vsub.f32 %v1043_v20, %v1050_v21 }
 0xaf1   :  { %v1056_v29 = vmul.f32 1.442695, %v1054_v28 }
 0xaf3   :  { %2782 = vpow2.f32 %v1056_v29 }
 0xaf6   :  { %v1053_v18 = vpop.xlane.xlu1 %1052 }
 0xaf7   :  { %v1055_v22 = vsub.f32 %v1046_v26, %v1053_v18 }
 0xaf9   :  { %v2783_v30 = vpop.eup %2782  ;;  %v1058_v31 = vmul.f32 1.442695, %v1055_v22 }
 0xafa   :  { %v1060_v32 = vsel %vm391_vm1, %v2783_v30, 0.0 }
 0xafb   :  { %2784 = vpow2.f32 %v1058_v31  ;;  %1061 = vadd.xlane.f32.xlu2 %v1060_v32  ;;  %v1252_v31 = vld [vmem:[%s3968_s20 + $0x38] sm:$0xff]  ;;  %v1251_v32 = vld [vmem:[%s3968_s20 + $0x30] sm:$0xff] }
 0xafc   :  { %1272 = vmatpush.msrb.mxu0 %v1252_v31 }
 0xafe   :  { %1273 = vmatpush.msrb.mxu0 %v1251_v32 }
 0xb01   :  { %v2785_v23 = vpop.eup %2784 }
 0xb02   :  { %v1063_v33 = vsel %vm391_vm1, %v2785_v23, 0.0 }
 0xb03   :  { %1064 = vadd.xlane.f32.xlu0 %v1063_v33  ;;  %v1249_v33 = vld [vmem:[%s3968_s20 + $0x20] sm:$0xff] }
 0xb6e   :  { %v1062_v34 = vpop.xlane.xlu2 %1061 }
 0xb6f   :  { %2786 = vrcp.f32 %v1062_v34  ;;  %v1247_v34 = vld [vmem:[%s3968_s20 + $0x10] sm:$0xff] }
 0xb75   :  { %v2787_v35 = vpop.eup %2786 }
 0xb76   :  { %v1068_v36 = vmul.f32 %v2787_v35, %v2783_v30  ;;  %v1065_v37 = vpop.xlane.xlu0 %1064  ;;  %v1246_v35 = vld [vmem:[%s3968_s20 + $0x8] sm:$0xff] }
 0xb77   :  { %2788 = vrcp.f32 %v1065_v37  ;;  %v2726_v37 = vld [vmem:[%s4000_s3] ss:$0 sm:$0xff] }
 0xb78   :  { %2548 = vmatmul.msk.f32.vlgmr.msra.gmra.mxu1 %vm391_vm1, %v1068_v36  ;;  %v1245_v36 = vld [vmem:[%s3968_s20] sm:$0xff] }
 0xb7d   :  { %v2789_v39 = vpop.eup %2788 }
 0xb7e   :  { %v1069_v40 = vmul.f32 %v2789_v39, %v2785_v23  ;;  %v1250_v23 = vld [vmem:[%s3968_s20 + $0x28] sm:$0xff] }
 0xb7f   :  { %1274 = vmatpush.msrb.mxu0 %v1250_v23  ;;  %v2593_v23 = vld [vmem:[%s3996_s2 + $0xb8] sm:$0xff] }
 0xb80   :  { %2549 = vmatmul.msk.f32.gmra.mxu1 %vm391_vm1, %v1069_v40 }
 0xb81   :  { %1275 = vmatpush.msrb.mxu0 %v1249_v33  ;;  %v2592_v33 = vld [vmem:[%s3996_s2 + $0xb0] sm:$0xff] }
 0xb83   :  { %1276 = vmatpush.msrb.mxu0 %v1248_v27 }
 0xb85   :  { %1277 = vmatpush.msrb.mxu0 %v1247_v34  ;;  %v2591_v34 = vld [vmem:[%s3996_s2 + $0xa8] sm:$0xff] }
 0xb87   :  { %1278 = vmatpush.msrb.mxu0 %v1246_v35 }
 0xb89   :  { %1279 = vmatpush.msrb.mxu0 %v1245_v36  ;;  %v2590_v36 = vld [vmem:[%s3996_s2 + $0xa0] sm:$0xff] }
 0xbf5   :  { %v1093_v41 = vpop.f32.mrf.mxu1 }
 0xbf6   :  { %2551 = vmatmul.msk.f32.vlgmr.msra.gmra.mxu2 %vm355_vm0, %v1093_v41 }
 0xbfd   :  { %v1096_v42 = vpop.f32.mrf.mxu1 }
 0xbfe   :  { %2552 = vmatmul.msk.f32.gmra.mxu2 %vm355_vm0, %v1096_v42 }
 0xc79   :  { %v1124_v43 = vpop.f32.mrf.mxu2 }
 0xc7a   :  { %v1130_v44 = vadd.f32 %v1124_v43, %v912_v11 }
 0xc7c   :  { %v3428_v45 = vadd.f32 %v1130_v44, %v3075_v7 }
 0xc7e   :  { %v1136_v46 = vsel %vm135_vm2, %v3428_v45, 0.0 }
 0xc7f   :  { %1137 = vadd.xlane.f32.xlu1 %v1136_v46 }
 0xc81   :  { %v1127_v47 = vpop.f32.mrf.mxu2 }
 0xc82   :  { %v1131_v48 = vadd.f32 %v1127_v47, %v913_v16 }
 0xc84   :  { %v3433_v49 = vadd.f32 %v1131_v48, %v3079_v13 }
 0xc86   :  { %v1139_v50 = vsel %vm135_vm2, %v3433_v49, 0.0 }
 0xc87   :  { %1140 = vadd.xlane.f32.xlu2 %v1139_v50 }
 0xcf2   :  { %v1138_v51 = vpop.xlane.xlu1 %1137 }
 0xcf3   :  { %v1142_v52 = vmul.f32 %v1138_v51, %v3061_v38 }
 0xcf5   :  { %v1144_v53 = vsub.f32 %v3428_v45, %v1142_v52 }
 0xcf7   :  { %v1146_v7 = vmul.f32 %v1144_v53, %v1144_v53 }
 0xcf9   :  { %v1148_v54 = vsel %vm135_vm2, %v1146_v7, 0.0 }
 0xcfa   :  { %1149 = vadd.xlane.f32.xlu0 %v1148_v54  ;;  %v1141_v55 = vpop.xlane.xlu2 %1140 }
 0xcfb   :  { %v1143_v56 = vmul.f32 %v1141_v55, %v3061_v38 }
 0xcfd   :  { %v1145_v57 = vsub.f32 %v3433_v49, %v1143_v56 }
 0xcff   :  { %v1147_v13 = vmul.f32 %v1145_v57, %v1145_v57 }
 0xd01   :  { %v1151_v58 = vsel %vm135_vm2, %v1147_v13, 0.0 }
 0xd02   :  { %1152 = vadd.xlane.f32.xlu1 %v1151_v58 }
 0xd6d   :  { %v1150_v0 = vpop.xlane.xlu0 %1149 }
 0xd6e   :  { %v1154_v2 = vmul.f32 %v1150_v0, %v3061_v38 }
 0xd70   :  { %v1156_v60 = vadd.f32 1e-05, %v1154_v2 }
 0xd72   :  { %2790 = vrsqrt.f32 %v1156_v60  ;;  %vm1164_vm4 = vweird.f32 %v1156_v60 }
 0xd75   :  { %v1153_v1 = vpop.xlane.xlu1 %1152 }
 0xd76   :  { %v1155_v3 = vmul.f32 %v1153_v1, %v3061_v38 }
 0xd78   :  { %v2791_v4 = vpop.eup %2790  ;;  %v1157_v5 = vadd.f32 1e-05, %v1155_v3 }
 0xd79   :  { %v1159_v6 = vmul.f32 %v2791_v4, %v1156_v60  ;;  %vm1165_vm3 = vweird.f32 %v2791_v4 }
 0xd7a   :  { %2792 = vrsqrt.f32 %v1157_v5  ;;  %vm1166_vm5 = vmor %vm1164_vm4, %vm1165_vm3  ;;  %vm1174_vm7 = vweird.f32 %v1157_v5 }
 0xd7b   :  { %v1160_v8 = vmul.f32 %v2791_v4, %v1159_v6 }
 0xd7d   :  { %v1161_v9 = vmul.f32 0.5, %v1160_v8 }
 0xd7f   :  { %v1162_v10 = vsub.f32 1.5, %v1161_v9 }
 0xd80   :  { %v2793_v11 = vpop.eup %2792 }
 0xd81   :  { %v1163_v12 = vmul.f32 %v2791_v4, %v1162_v10  ;;  %v1169_v14 = vmul.f32 %v2793_v11, %v1157_v5  ;;  %vm1175_vm6 = vweird.f32 %v2793_v11 }
 0xd82   :  { %vm1176_vm8 = vmor %vm1174_vm7, %vm1175_vm6 }
 0xd83   :  { %v1167_v16 = vsel %vm1166_vm5, %v2791_v4, %v1163_v12  ;;  %v1170_v19 = vmul.f32 %v2793_v11, %v1169_v14 }
 0xd84   :  { %v1178_v20 = vmul.f32 %v1167_v16, %v1144_v53  ;;  %v2563_v16 = vld [vmem:[%s3996_s2 + $0x98] sm:$0xff] }
 0xd85   :  { %v1171_v25 = vmul.f32 0.5, %v1170_v19  ;;  %v2570_v19 = vld [vmem:[%s3958_s10 + $0x98] sm:$0xff]  ;;  %1377 = vmatpush.msrb.mxu1 %v2563_v16 }
 0xd86   :  { %v1183_v26 = vmul.f32 %v2724_v15, %v1178_v20  ;;  %v2577_v20 = vld [vmem:[%s3960_s12 + $0x98] sm:$0xff]  ;;  %1410 = vmatpush.msrb.mxu2 %v2570_v19 }
 0xd87   :  { %v1172_v17 = vsub.f32 1.5, %v1171_v25  ;;  %1443 = vmatpush.msrb.mxu3 %v2577_v20  ;;  %v2569_v25 = vld [vmem:[%s3958_s10 + $0x90] sm:$0xff]  ;;  %v2587_v20 = vld [vmem:[%s3962_s14 + $0x20] sm:$0xff] }
 0xd88   :  { %v1188_v21 = vadd.f32 %v2725_v24, %v1183_v26  ;;  %v2576_v26 = vld [vmem:[%s3960_s12 + $0x90] sm:$0xff]  ;;  %1411 = vmatpush.msrb.mxu2 %v2569_v25  ;;  %v3634_v25 = vld [vmem:[%s3999_s27] sm:$0xff] }
 0xd89   :  { %v1173_v28 = vmul.f32 %v2793_v11, %v1172_v17  ;;  %1444 = vmatpush.msrb.mxu3 %v2576_v26  ;;  %v2561_v17 = vld [vmem:[%s3996_s2 + $0x88] sm:$0xff] }
 0xd8a   :  { %2553 = vmatmul.msk.f32.vlgmr.msra.gmra.mxu3 %vm135_vm2, %v1188_v21  ;;  %v2568_v21 = vld [vmem:[%s3958_s10 + $0x88] sm:$0xff] }
 0xd8b   :  { %v1177_v29 = vsel %vm1176_vm8, %v2793_v11, %v1173_v28  ;;  %v2575_v28 = vld [vmem:[%s3960_s12 + $0x88] sm:$0xff]  ;;  %1412 = vmatpush.msrb.mxu2 %v2568_v21 }
 0xd8c   :  { %v1179_v18 = vmul.f32 %v1177_v29, %v1145_v57  ;;  %1445 = vmatpush.msrb.mxu3 %v2575_v28  ;;  %v2560_v29 = vld [vmem:[%s3996_s2 + $0x80] sm:$0xff]  ;;  %v3641_v28 = vld [vmem:[%s3999_s27 + $0x8] sm:$0xff] }
 0xd8e   :  { %v1184_v22 = vmul.f32 %v2724_v15, %v1179_v18  ;;  %v2567_v18 = vld [vmem:[%s3958_s10 + $0x80] sm:$0xff] }
 0xd8f   :  { %1413 = vmatpush.msrb.mxu2 %v2567_v18 }
 0xd90   :  { %v1189_v30 = vadd.f32 %v2725_v24, %v1184_v22  ;;  %v2562_v24 = vld [vmem:[%s3996_s2 + $0x90] sm:$0xff]  ;;  %v2574_v22 = vld [vmem:[%s3960_s12 + $0x80] sm:$0xff] }
 0xd91   :  { %1378 = vmatpush.msrb.mxu1 %v2562_v24  ;;  %1446 = vmatpush.msrb.mxu3 %v2574_v22 }
 0xd92   :  { %2554 = vmatmul.msk.f32.gmra.mxu3 %vm135_vm2, %v1189_v30  ;;  %1563 = vmatpush.msra.mxu2 %v2587_v20 }
 0xd93   :  { %1379 = vmatpush.msrb.mxu1 %v2561_v17  ;;  %1598 = vmatpush.msra.mxu3 %v2593_v23 }
 0xd95   :  { %1380 = vmatpush.msrb.mxu1 %v2560_v29  ;;  %1599 = vmatpush.msra.mxu3 %v2592_v33 }
 0xd97   :  { %1600 = vmatpush.msra.mxu3 %v2591_v34 }
 0xd99   :  { %1601 = vmatpush.msra.mxu3 %v2590_v36 }
 0xe0d   :  { %v1221_v39 = vpop.f32.mrf.mxu3 }
 0xe0e   :  { %v1222_v40 = vadd.f32 %v2726_v37, %v1221_v39 }
 0xe10   :  { %v1227_v41 = vmul.f32 %v1222_v40, %v1222_v40 }
 0xe12   :  { %v1229_v42 = vmul.f32 %v1227_v41, %v1222_v40 }
 0xe14   :  { %v1231_v43 = vmul.f32 0.044715, %v1229_v42 }
 0xe15   :  { %v1224_v44 = vpop.f32.mrf.mxu3 }
 0xe16   :  { %v1233_v46 = vadd.f32 %v1231_v43, %v1222_v40  ;;  %v1225_v47 = vadd.f32 %v2726_v37, %v1224_v44 }
 0xe18   :  { %v1235_v48 = vmul.f32 0.7978846, %v1233_v46  ;;  %v1228_v50 = vmul.f32 %v1225_v47, %v1225_v47 }
 0xe1a   :  { %2794 = vtanh.f32 %v1235_v48  ;;  %v1230_v51 = vmul.f32 %v1228_v50, %v1225_v47  ;;  %v2728_v48 = vld [vmem:[%s3997_s4 + $0x1] ss:$0 sm:$0xff] }
 0xe1c   :  { %v1232_v52 = vmul.f32 0.044715, %v1230_v51 }
 0xe1e   :  { %v1234_v53 = vadd.f32 %v1232_v52, %v1225_v47  ;;  %v2729_v52 = vld [vmem:[%s3998_s26 + $0x1] ss:$0 sm:$0xff] }
 0xe20   :  { %v2795_v7 = vpop.eup %2794  ;;  %v1236_v54 = vmul.f32 0.7978846, %v1234_v53 }
 0xe21   :  { %v1239_v55 = vadd.f32 1.0, %v2795_v7 }
 0xe22   :  { %2796 = vtanh.f32 %v1236_v54 }
 0xe23   :  { %v1241_v56 = vmul.f32 0.5, %v1239_v55 }
 0xe25   :  { %v1243_v57 = vmul.f32 %v1241_v56, %v1222_v40 }
 0xe27   :  { %2555 = vmatmul.msk.f32.vlgmr.msrb.gmra.mxu0 %vm1257_vm9, %v1243_v57 }
 0xe28   :  { %v2797_v13 = vpop.eup %2796 }
 0xe29   :  { %v1240_v58 = vadd.f32 1.0, %v2797_v13 }
 0xe2b   :  { %v1242_v59 = vmul.f32 0.5, %v1240_v58 }
 0xe2d   :  { %v1244_v61 = vmul.f32 %v1242_v59, %v1225_v47 }
 0xe2f   :  { %2556 = vmatmul.msk.f32.gmra.mxu0 %vm1257_vm9, %v1244_v61 }
 0xea4   :  { %v1281_v63 = vpop.f32.mrf.mxu0 }
 0xea5   :  { %v1282_v0 = vadd.f32 %v2727_v62, %v1281_v63 }
 0xea7   :  { %v3498_v2 = vadd.f32 %v1282_v0, %v3428_v45  ;;  %v2731_v0 = vld [vmem:[%s3959_s11 + $0x4] ss:$0 sm:$0xff] }
 0xea9   :  { %v1293_v60 = vsel %vm135_vm2, %v3498_v2, 0.0 }
 0xeaa   :  { %1294 = vadd.xlane.f32.xlu2 %v1293_v60  ;;  %v2732_v60 = vld [vmem:[%s3961_s13 + $0x4] ss:$0 sm:$0xff] }
 0xeac   :  { %v1284_v1 = vpop.f32.mrf.mxu0 }
 0xead   :  { %v1285_v3 = vadd.f32 %v2727_v62, %v1284_v1 }
 0xeaf   :  { %v3503_v4 = vadd.f32 %v1285_v3, %v3433_v49 }
 0xeb1   :  { %v1296_v5 = vsel %vm135_vm2, %v3503_v4, 0.0 }
 0xeb2   :  { %1297 = vadd.xlane.f32.xlu0 %v1296_v5 }
 0xf1d   :  { %v1295_v6 = vpop.xlane.xlu2 %1294 }
 0xf1e   :  { %v1299_v8 = vmul.f32 %v1295_v6, %v3061_v38 }
 0xf20   :  { %v3509_v9 = vsub.f32 %v3498_v2, %v1299_v8 }
 0xf22   :  { %v1303_v45 = vmul.f32 %v3509_v9, %v3509_v9 }
 0xf24   :  { %v1305_v10 = vsel %vm135_vm2, %v1303_v45, 0.0 }
 0xf25   :  { %v1298_v11 = vpop.xlane.xlu0 %1297  ;;  %1306 = vadd.xlane.f32.xlu1 %v1305_v10 }
 0xf26   :  { %v1300_v49 = vmul.f32 %v1298_v11, %v3061_v38  ;;  %v2600_v11 = vld [vmem:[%s3958_s10 + $0xb8] sm:$0xff] }
 0xf28   :  { %v3516_v12 = vsub.f32 %v3503_v4, %v1300_v49 }
 0xf2a   :  { %v1304_v14 = vmul.f32 %v3516_v12, %v3516_v12 }
 0xf2c   :  { %v1308_v15 = vsel %vm135_vm2, %v1304_v14, 0.0  ;;  %v2598_v14 = vld [vmem:[%s3958_s10 + $0xa8] sm:$0xff] }
 0xf2d   :  { %1309 = vadd.xlane.f32.xlu2 %v1308_v15  ;;  %v2597_v15 = vld [vmem:[%s3958_s10 + $0xa0] sm:$0xff] }
 0xf98   :  { %v1307_v30 = vpop.xlane.xlu1 %1306 }
 0xf99   :  { %v1311_v31 = vmul.f32 %v1307_v30, %v3061_v38  ;;  %v2734_v30 = vld [vmem:[%s3959_s11 + $0x5] ss:$0 sm:$0xff] }
 0xf9b   :  { %v1313_v32 = vadd.f32 1e-05, %v1311_v31 }
 0xf9d   :  { %2798 = vrsqrt.f32 %v1313_v32  ;;  %vm1321_vm11 = vweird.f32 %v1313_v32 }
 0xfa0   :  { %v1310_v27 = vpop.xlane.xlu2 %1309 }
 0xfa1   :  { %v1312_v35 = vmul.f32 %v1310_v27, %v3061_v38 }
 0xfa3   :  { %v2799_v37 = vpop.eup %2798  ;;  %v1314_v39 = vadd.f32 1e-05, %v1312_v35 }
 0xfa4   :  { %v1316_v40 = vmul.f32 %v2799_v37, %v1313_v32  ;;  %vm1322_vm10 = vweird.f32 %v2799_v37 }
 0xfa5   :  { %2800 = vrsqrt.f32 %v1314_v39  ;;  %vm1323_vm12 = vmor %vm1321_vm11, %vm1322_vm10  ;;  %vm1331_vm14 = vweird.f32 %v1314_v39 }
 0xfa6   :  { %v1317_v41 = vmul.f32 %v2799_v37, %v1316_v40 }
 0xfa8   :  { %v1318_v42 = vmul.f32 0.5, %v1317_v41 }
 0xfaa   :  { %v1319_v43 = vsub.f32 1.5, %v1318_v42 }
 0xfab   :  { %v2801_v44 = vpop.eup %2800 }
 0xfac   :  { %v1320_v46 = vmul.f32 %v2799_v37, %v1319_v43  ;;  %v1326_v47 = vmul.f32 %v2801_v44, %v1314_v39  ;;  %vm1332_vm13 = vweird.f32 %v2801_v44  ;;  %v2607_v43 = vld [vmem:[%s3960_s12 + $0xb8] sm:$0xff] }
 0xfad   :  { %vm1333_vm15 = vmor %vm1331_vm14, %vm1332_vm13 }
 0xfae   :  { %v1324_v50 = vsel %vm1323_vm12, %v2799_v37, %v1320_v46  ;;  %v1327_v51 = vmul.f32 %v2801_v44, %v1326_v47  ;;  %v2605_v46 = vld [vmem:[%s3960_s12 + $0xa8] sm:$0xff]  ;;  %v2604_v47 = vld [vmem:[%s3960_s12 + $0xa0] sm:$0xff] }
 0xfaf   :  { %v1335_v53 = vmul.f32 %v1324_v50, %v3509_v9  ;;  %v2730_v9 = vld [vmem:[%s3957_s9 + $0x4] ss:$0 sm:$0xff] }
 0xfb0   :  { %v1328_v7 = vmul.f32 0.5, %v1327_v51 }
 0xfb1   :  { %v1340_v54 = vmul.f32 %v2728_v48, %v1335_v53  ;;  %v2623_v53 = vld [vmem:[%s3996_s2 + $0xd8] sm:$0xff] }
 0xfb2   :  { %v1329_v55 = vsub.f32 1.5, %v1328_v7  ;;  %v2622_v7 = vld [vmem:[%s3996_s2 + $0xd0] sm:$0xff] }
 0xfb3   :  { %v3578_v56 = vadd.f32 %v2729_v52, %v1340_v54  ;;  %v2621_v54 = vld [vmem:[%s3996_s2 + $0xc8] sm:$0xff] }
 0xfb4   :  { %v1330_v57 = vmul.f32 %v2801_v44, %v1329_v55  ;;  %v2620_v55 = vld [vmem:[%s3996_s2 + $0xc0] sm:$0xff] }
 0xfb5   :  { %2565 = vmatmul.msk.f32.vlgmr.msrb.gmra.mxu1 %vm135_vm2, %v3578_v56  ;;  %2572 = vmatmul.msk.f32.vlgmr.msrb.gmra.mxu2 %vm135_vm2, %v3578_v56 }
 0xfb6   :  { %v1334_v13 = vsel %vm1333_vm15, %v2801_v44, %v1330_v57  ;;  %2579 = vmatmul.msk.f32.vlgmr.msrb.gmra.mxu3 %vm135_vm2, %v3578_v56  ;;  %v2606_v44 = vld [vmem:[%s3960_s12 + $0xb0] sm:$0xff] }
 0xfb7   :  { %v1336_v58 = vmul.f32 %v1334_v13, %v3516_v12  ;;  %v2599_v12 = vld [vmem:[%s3958_s10 + $0xb0] sm:$0xff] }
 0xfb9   :  { %v1341_v59 = vmul.f32 %v2728_v48, %v1336_v58  ;;  %v2630_v58 = vld [vmem:[%s3958_s10 + $0xd8] sm:$0xff] }
 0xfbb   :  { %v3587_v61 = vadd.f32 %v2729_v52, %v1341_v59 }
 0xfbd   :  { %2566 = vmatmul.msk.f32.gmra.mxu1 %vm135_vm2, %v3587_v61  ;;  %2573 = vmatmul.msk.f32.gmra.mxu2 %vm135_vm2, %v3587_v61 }
 0xfbe   :  { %2580 = vmatmul.msk.f32.gmra.mxu3 %vm135_vm2, %v3587_v61 }
 0xfc6   :  { %2595 = vmatmul.msk.f32.vlgmr.msra.gmra.mxu3 %vm135_vm2, %v3578_v56 }
 0xfce   :  { %2596 = vmatmul.msk.f32.gmra.mxu3 %vm135_vm2, %v3587_v61 }
0x1032   :  { %v1382_v8 = vpop.f32.mrf.mxu1 }
0x1033   :  { %v1383_v49 = vadd.f32 %v2730_v9, %v1382_v8 }
0x1038   :  { %v1415_v62 = vpop.f32.mrf.mxu2 }
0x1039   :  { %v1448_v63 = vpop.f32.mrf.mxu3  ;;  %v1416_v10 = vadd.f32 %v2731_v0, %v1415_v62  ;;  %v2629_v62 = vld [vmem:[%s3958_s10 + $0xd0] sm:$0xff] }
0x103a   :  { %v1449_v45 = vadd.f32 %v2732_v60, %v1448_v63  ;;  %v1385_v16 = vpop.f32.mrf.mxu1  ;;  %v2628_v63 = vld [vmem:[%s3958_s10 + $0xc8] sm:$0xff] }
0x103b   :  { %v1386_v19 = vadd.f32 %v2730_v9, %v1385_v16 }
0x1040   :  { %v1418_v1 = vpop.f32.mrf.mxu2 }
0x1041   :  { %v1419_v3 = vadd.f32 %v2731_v0, %v1418_v1  ;;  %v1451_v5 = vpop.f32.mrf.mxu3  ;;  %v2627_v0 = vld [vmem:[%s3958_s10 + $0xc0] sm:$0xff] }
0x1042   :  { %v1452_v6 = vadd.f32 %v2732_v60, %v1451_v5 }
0x1043   :  { %2581 = vmatpush.xpose.msk.msra.mxu0 %vm355_vm0, %v1419_v3  ;;  %v2733_v3 = vld [vmem:[%s3957_s9 + $0x5] ss:$0 sm:$0xff] }
0x1044   :  { %1531 = vmatpush.msra.mxu1 %v1452_v6 }
0x1046   :  { %1532 = vmatpush.msra.mxu1 %v1449_v45  ;;  %v2735_v45 = vld [vmem:[%s3961_s13 + $0x5] ss:$0 sm:$0xff] }
0x1047   :  { %2582 = vmatpush.xpose.msk.msra.mxu0 %vm355_vm0, %v1416_v10 }
0x1048   :  { %1664 = vmatpush.msrb.mxu1 %v2607_v43  ;;  %v2634_v43 = vld [vmem:[%s3960_s12 + $0xc0] sm:$0xff] }
0x1049   :  { %v1603_v1 = vpop.f32.mrf.mxu3 }
0x104a   :  { %2583 = vmatmul.msk.f32.vlgmr.msra.gmra.mxu0 %vm355_vm0, %v1383_v49  ;;  %1665 = vmatpush.msrb.mxu1 %v2606_v44  ;;  %v1604_v5 = vadd.f32 %v2733_v3, %v1603_v1 }
0x104b   :  { %1631 = vmatpush.msrb.mxu0 %v2600_v11 }
0x104c   :  { %1666 = vmatpush.msrb.mxu1 %v2605_v46 }
0x104d   :  { %1632 = vmatpush.msrb.mxu0 %v2599_v12 }
0x104e   :  { %1667 = vmatpush.msrb.mxu1 %v2604_v47 }
0x104f   :  { %1633 = vmatpush.msrb.mxu0 %v2598_v14 }
0x1051   :  { %1634 = vmatpush.msrb.mxu0 %v2597_v15  ;;  %v1606_v8 = vpop.f32.mrf.mxu3  ;;  %v2617_v15 = vld [vmem:[%s3962_s14 + $0x28] sm:$0xff] }
0x1052   :  { %2584 = vmatmul.msk.f32.gmra.mxu0 %vm355_vm0, %v1386_v19  ;;  %v1607_v9 = vadd.f32 %v2733_v3, %v1606_v8 }
0x1053   :  { %1784 = vmatpush.msra.mxu0 %v2617_v15 }
0x105a   :  { %2602 = vmatmul.msk.f32.vlgmr.msrb.gmra.mxu0 %vm135_vm2, %v3578_v56 }
0x1062   :  { %2603 = vmatmul.msk.f32.gmra.mxu0 %vm135_vm2, %v3587_v61 }
0x10c7   :  { %v1483_v24 = vpop.f32.mrf.mxu0 }
0x10c8   :  { %v1484_v26 = vadd.f32 %v3634_v25, %v1483_v24 }
0x10ca   :  { %v1489_v17 = vsel %vm391_vm1, %v1484_v26, -inf }
0x10cb   :  { %1490 = vmax.xlane.f32.xlu0 %v1489_v17 }
0x10cf   :  { %v1486_v21 = vpop.f32.mrf.mxu0 }
0x10d0   :  { %v1487_v29 = vadd.f32 %v3641_v28, %v1486_v21 }
0x10d2   :  { %v1492_v18 = vsel %vm391_vm1, %v1487_v29, -inf }
0x10d3   :  { %1493 = vmax.xlane.f32.xlu1 %v1492_v18 }
0x10d7   :  { %v1636_v22 = vpop.f32.mrf.mxu0 }
0x10d8   :  { %v1637_v23 = vadd.f32 %v2734_v30, %v1636_v22 }
0x10df   :  { %v1639_v31 = vpop.f32.mrf.mxu0 }
0x10e0   :  { %v1640_v32 = vadd.f32 %v2734_v30, %v1639_v31 }
0x10e2   :  { %2611 = vmatpush.xpose.msk.msrb.mxu2 %vm355_vm0, %v1640_v32 }
0x10e6   :  { %2612 = vmatpush.xpose.msk.msrb.mxu2 %vm355_vm0, %v1637_v23 }
0x113e   :  { %v1491_v33 = vpop.xlane.xlu0 %1490 }
0x113f   :  { %v1495_v27 = vsub.f32 %v1484_v26, %v1491_v33 }
0x1141   :  { %v1497_v34 = vmul.f32 1.442695, %v1495_v27 }
0x1143   :  { %2802 = vpow2.f32 %v1497_v34 }
0x1146   :  { %v1494_v35 = vpop.xlane.xlu1 %1493 }
0x1147   :  { %v1496_v36 = vsub.f32 %v1487_v29, %v1494_v35  ;;  %v2738_v29 = vld [vmem:[%s3959_s11 + $0x6] ss:$0 sm:$0xff] }
0x1149   :  { %v2803_v37 = vpop.eup %2802  ;;  %v1499_v39 = vmul.f32 1.442695, %v1496_v36 }
0x114a   :  { %v1501_v40 = vsel %vm391_vm1, %v2803_v37, 0.0 }
0x114b   :  { %2804 = vpow2.f32 %v1499_v39  ;;  %1502 = vadd.xlane.f32.xlu2 %v1501_v40  ;;  %v2637_v40 = vld [vmem:[%s3960_s12 + $0xd8] sm:$0xff] }
0x1151   :  { %v2805_v41 = vpop.eup %2804 }
0x1152   :  { %v1504_v42 = vsel %vm391_vm1, %v2805_v41, 0.0 }
0x1153   :  { %1505 = vadd.xlane.f32.xlu0 %v1504_v42  ;;  %v2635_v42 = vld [vmem:[%s3960_s12 + $0xc8] sm:$0xff] }
0x11be   :  { %v1503_v48 = vpop.xlane.xlu2 %1502 }
0x11bf   :  { %2806 = vrcp.f32 %v1503_v48 }
0x11c5   :  { %v2807_v50 = vpop.eup %2806 }
0x11c6   :  { %v1509_v51 = vmul.f32 %v2807_v50, %v2803_v37  ;;  %v1506_v52 = vpop.xlane.xlu0 %1505  ;;  %v2653_v50 = vld [vmem:[%s3996_s2 + $0xf8] sm:$0xff] }
0x11c7   :  { %2808 = vrcp.f32 %v1506_v52  ;;  %v2651_v52 = vld [vmem:[%s3996_s2 + $0xe8] sm:$0xff] }
0x11c8   :  { %2585 = vmatmul.msk.f32.vlgmr.msra.gmra.mxu1 %vm391_vm1, %v1509_v51  ;;  %v2652_v51 = vld [vmem:[%s3996_s2 + $0xf0] sm:$0xff] }
0x11c9   :  { %1816 = vmatpush.msra.mxu1 %v2623_v53  ;;  %v2650_v53 = vld [vmem:[%s3996_s2 + $0xe0] sm:$0xff] }
0x11cb   :  { %1817 = vmatpush.msra.mxu1 %v2622_v7 }
0x11cd   :  { %v2809_v57 = vpop.eup %2808  ;;  %1818 = vmatpush.msra.mxu1 %v2621_v54 }
0x11ce   :  { %v1510_v13 = vmul.f32 %v2809_v57, %v2805_v41  ;;  %v2636_v41 = vld [vmem:[%s3960_s12 + $0xd0] sm:$0xff] }
0x11cf   :  { %1819 = vmatpush.msra.mxu1 %v2620_v55  ;;  %v2660_v55 = vld [vmem:[%s3958_s10 + $0xf8] sm:$0xff] }
0x11d0   :  { %2586 = vmatmul.msk.f32.gmra.mxu1 %vm391_vm1, %v1510_v13  ;;  %v2659_v13 = vld [vmem:[%s3958_s10 + $0xf0] sm:$0xff] }
0x11d8   :  { %2609 = vmatmul.msk.f32.vlgmr.msrb.gmra.mxu1 %vm135_vm2, %v3578_v56 }
0x11e0   :  { %2610 = vmatmul.msk.f32.gmra.mxu1 %vm135_vm2, %v3587_v61 }
0x11e8   :  { %2625 = vmatmul.msk.f32.vlgmr.msra.gmra.mxu1 %vm135_vm2, %v3578_v56 }
0x11f0   :  { %2626 = vmatmul.msk.f32.gmra.mxu1 %vm135_vm2, %v3587_v61 }
0x1245   :  { %v1534_v59 = vpop.f32.mrf.mxu1 }
0x1246   :  { %2588 = vmatmul.msk.f32.vlgmr.msra.gmra.mxu2 %vm355_vm0, %v1534_v59  ;;  %v2657_v59 = vld [vmem:[%s3958_s10 + $0xe0] sm:$0xff] }
0x1247   :  { %1849 = vmatpush.msra.mxu2 %v2630_v58  ;;  %v2658_v58 = vld [vmem:[%s3958_s10 + $0xe8] sm:$0xff] }
0x1249   :  { %1850 = vmatpush.msra.mxu2 %v2629_v62 }
0x124b   :  { %1851 = vmatpush.msra.mxu2 %v2628_v63 }
0x124d   :  { %v1537_v60 = vpop.f32.mrf.mxu1  ;;  %1852 = vmatpush.msra.mxu2 %v2627_v0  ;;  %v2736_v0 = vld [vmem:[%s3957_s9 + $0x6] ss:$0 sm:$0xff] }
0x124e   :  { %2589 = vmatmul.msk.f32.gmra.mxu2 %vm355_vm0, %v1537_v60 }
0x1255   :  { %v1669_v6 = vpop.f32.mrf.mxu1 }
0x1256   :  { %2613 = vmatmul.msk.f32.vlgmr.msrb.gmra.mxu2 %vm355_vm0, %v1604_v5  ;;  %v1670_v49 = vadd.f32 %v2735_v45, %v1669_v6  ;;  %v2739_v6 = vld [vmem:[%s3961_s13 + $0x6] ss:$0 sm:$0xff] }
0x125d   :  { %v1672_v10 = vpop.f32.mrf.mxu1 }
0x125e   :  { %v1673_v11 = vadd.f32 %v2735_v45, %v1672_v10  ;;  %2614 = vmatmul.msk.f32.gmra.mxu2 %vm355_vm0, %v1607_v9  ;;  %v2737_v10 = vld [vmem:[%s3963_s15 + $0x1] ss:$0 sm:$0xff] }
0x1260   :  { %1752 = vmatpush.msrb.mxu3 %v1673_v11 }
0x1262   :  { %1753 = vmatpush.msrb.mxu3 %v1670_v49 }
0x1264   :  { %1882 = vmatpush.msra.mxu3 %v2637_v40 }
0x1265   :  { %v1821_v63 = vpop.f32.mrf.mxu1 }
0x1266   :  { %2632 = vmatmul.msk.f32.vlgmr.msra.gmra.mxu2 %vm135_vm2, %v3578_v56  ;;  %1883 = vmatpush.msra.mxu3 %v2636_v41  ;;  %v1822_v60 = vadd.f32 %v2736_v0, %v1821_v63 }
0x1268   :  { %1884 = vmatpush.msra.mxu3 %v2635_v42  ;;  %v2667_v42 = vld [vmem:[%s3960_s12 + $0xf8] sm:$0xff] }
0x126a   :  { %1885 = vmatpush.msra.mxu3 %v2634_v43  ;;  %v2666_v43 = vld [vmem:[%s3960_s12 + $0xf0] sm:$0xff] }
0x126d   :  { %v1824_v3 = vpop.f32.mrf.mxu1 }
0x126e   :  { %2633 = vmatmul.msk.f32.gmra.mxu2 %vm135_vm2, %v3587_v61  ;;  %v1825_v5 = vadd.f32 %v2736_v0, %v1824_v3 }
0x12c9   :  { %v3712_v12 = vpop.f32.mrf.mxu2 }
0x12ca   :  { %v1574_v11 = vadd.f32 %v2737_v10, %v3712_v12 }
0x12d1   :  { %v3714_v14 = vpop.f32.mrf.mxu2 }
0x12d9   :  { %v1704_v16 = vpop.f32.mrf.mxu2 }
0x12da   :  { %v1705_v19 = vadd.f32 %v3634_v25, %v1704_v16  ;;  %v1575_v16 = vadd.f32 %v2737_v10, %v3714_v14 }
0x12dc   :  { %v1710_v20 = vsel %vm391_vm1, %v1705_v19, -inf }
0x12dd   :  { %1711 = vmax.xlane.f32.xlu1 %v1710_v20 }
0x12e1   :  { %v1707_v24 = vpop.f32.mrf.mxu2 }
0x12e2   :  { %v1708_v26 = vadd.f32 %v3641_v28, %v1707_v24  ;;  %v2647_v24 = vld [vmem:[%s3962_s14 + $0x30] sm:$0xff] }
0x12e3   :  { %2002 = vmatpush.msrb.mxu2 %v2647_v24 }
0x12e4   :  { %v1713_v17 = vsel %vm391_vm1, %v1708_v26, -inf }
0x12e5   :  { %1714 = vmax.xlane.f32.xlu2 %v1713_v17 }
0x12e9   :  { %v1854_v21 = vpop.f32.mrf.mxu2 }
0x12ea   :  { %v1855_v30 = vadd.f32 %v2738_v29, %v1854_v21 }
0x12f1   :  { %v1857_v18 = vpop.f32.mrf.mxu2 }
0x12f2   :  { %v1858_v22 = vadd.f32 %v2738_v29, %v1857_v18 }
0x12f4   :  { %2641 = vmatpush.xpose.msk.msrb.mxu0 %vm355_vm0, %v1858_v22  ;;  %v2741_v22 = vld [vmem:[%s3959_s11 + $0x7] ss:$0 sm:$0xff] }
0x12f8   :  { %2642 = vmatpush.xpose.msk.msrb.mxu0 %vm355_vm0, %v1855_v30 }
0x1350   :  { %v1712_v31 = vpop.xlane.xlu1 %1711 }
0x1351   :  { %v1716_v32 = vsub.f32 %v1705_v19, %v1712_v31 }
0x1353   :  { %v1718_v23 = vmul.f32 1.442695, %v1716_v32 }
0x1355   :  { %2810 = vpow2.f32 %v1718_v23 }
0x1358   :  { %v1715_v33 = vpop.xlane.xlu2 %1714 }
0x1359   :  { %v1717_v27 = vsub.f32 %v1708_v26, %v1715_v33 }
0x135b   :  { %v2811_v34 = vpop.eup %2810  ;;  %v1720_v35 = vmul.f32 1.442695, %v1717_v27 }
0x135c   :  { %v1722_v36 = vsel %vm391_vm1, %v2811_v34, 0.0 }
0x135d   :  { %2812 = vpow2.f32 %v1720_v35  ;;  %1723 = vadd.xlane.f32.xlu0 %v1722_v36 }
0x1363   :  { %v2813_v37 = vpop.eup %2812 }
0x1364   :  { %v1725_v39 = vsel %vm391_vm1, %v2813_v37, 0.0 }
0x1365   :  { %1726 = vadd.xlane.f32.xlu1 %v1725_v39 }
0x13d0   :  { %v1724_v44 = vpop.xlane.xlu0 %1723 }
0x13d1   :  { %2814 = vrcp.f32 %v1724_v44  ;;  %v2665_v44 = vld [vmem:[%s3960_s12 + $0xe8] sm:$0xff] }
0x13d7   :  { %v2815_v46 = vpop.eup %2814 }
0x13d8   :  { %v1730_v47 = vmul.f32 %v2815_v46, %v2811_v34  ;;  %v1727_v48 = vpop.xlane.xlu1 %1726  ;;  %v2664_v46 = vld [vmem:[%s3960_s12 + $0xe0] sm:$0xff] }
0x13d9   :  { %2816 = vrcp.f32 %v1727_v48 }
0x13da   :  { %2615 = vmatmul.msk.f32.vlgmr.msrb.gmra.mxu3 %vm391_vm1, %v1730_v47 }
0x13db   :  { %2034 = vmatpush.msrb.mxu3 %v2653_v50 }
0x13dd   :  { %2035 = vmatpush.msrb.mxu3 %v2652_v51 }
0x13df   :  { %v2817_v7 = vpop.eup %2816  ;;  %2036 = vmatpush.msrb.mxu3 %v2651_v52 }
0x13e0   :  { %v1731_v54 = vmul.f32 %v2817_v7, %v2813_v37 }
0x13e1   :  { %2037 = vmatpush.msrb.mxu3 %v2650_v53 }
0x13e2   :  { %2616 = vmatmul.msk.f32.gmra.mxu3 %vm391_vm1, %v1731_v54 }
0x13ea   :  { %2639 = vmatmul.msk.f32.vlgmr.msra.gmra.mxu3 %vm135_vm2, %v3578_v56 }
0x13f2   :  { %2640 = vmatmul.msk.f32.gmra.mxu3 %vm135_vm2, %v3587_v61 }
0x13fa   :  { %2655 = vmatmul.msk.f32.vlgmr.msrb.gmra.mxu3 %vm135_vm2, %v3578_v56 }
0x1402   :  { %2656 = vmatmul.msk.f32.gmra.mxu3 %vm135_vm2, %v3587_v61 }
0x145d   :  { %v1755_v57 = vpop.f32.mrf.mxu3 }
0x145e   :  { %2618 = vmatmul.msk.f32.vlgmr.msra.gmra.mxu0 %vm355_vm0, %v1755_v57  ;;  %v2740_v57 = vld [vmem:[%s3957_s9 + $0x7] ss:$0 sm:$0xff] }
0x145f   :  { %2067 = vmatpush.msra.mxu0 %v2660_v55 }
0x1461   :  { %2068 = vmatpush.msra.mxu0 %v2659_v13 }
0x1463   :  { %2069 = vmatpush.msra.mxu0 %v2658_v58 }
0x1465   :  { %v1758_v62 = vpop.f32.mrf.mxu3  ;;  %2070 = vmatpush.msra.mxu0 %v2657_v59 }
0x1466   :  { %2619 = vmatmul.msk.f32.gmra.mxu0 %vm355_vm0, %v1758_v62 }
0x146d   :  { %v1887_v1 = vpop.f32.mrf.mxu3 }
0x146e   :  { %2643 = vmatmul.msk.f32.vlgmr.msrb.gmra.mxu0 %vm355_vm0, %v1822_v60  ;;  %v1888_v45 = vadd.f32 %v2739_v6, %v1887_v1 }
0x1475   :  { %v1890_v8 = vpop.f32.mrf.mxu3 }
0x1476   :  { %v1891_v9 = vadd.f32 %v2739_v6, %v1890_v8  ;;  %2644 = vmatmul.msk.f32.gmra.mxu0 %vm355_vm0, %v1825_v5 }
0x1478   :  { %1970 = vmatpush.msrb.mxu1 %v1891_v9 }
0x147a   :  { %1971 = vmatpush.msrb.mxu1 %v1888_v45 }
0x147c   :  { %2100 = vmatpush.msra.mxu1 %v2667_v42 }
0x147d   :  { %v2039_v55 = vpop.f32.mrf.mxu3 }
0x147e   :  { %2662 = vmatmul.msk.f32.vlgmr.msra.gmra.mxu0 %vm135_vm2, %v3578_v56  ;;  %2101 = vmatpush.msra.mxu1 %v2666_v43  ;;  %v2040_v13 = vadd.f32 %v2740_v57, %v2039_v55 }
0x1480   :  { %2102 = vmatpush.msra.mxu1 %v2665_v44 }
0x1482   :  { %2103 = vmatpush.msra.mxu1 %v2664_v46 }
0x1485   :  { %v2042_v59 = vpop.f32.mrf.mxu3 }
0x1486   :  { %2663 = vmatmul.msk.f32.gmra.mxu0 %vm135_vm2, %v3587_v61 }
0x14db   :  { %v1786_v49 = vpop.f32.mrf.mxu0 }
0x14dc   :  { %v3794_v15 = vadd.f32 %v1786_v49, %v1574_v11 }
0x14e3   :  { %v1789_v19 = vpop.f32.mrf.mxu0 }
0x14e4   :  { %v3797_v20 = vadd.f32 %v1789_v19, %v1575_v16 }
0x14eb   :  { %v1922_v26 = vpop.f32.mrf.mxu0 }
0x14ec   :  { %v1923_v17 = vadd.f32 %v3634_v25, %v1922_v26 }
0x14ee   :  { %v1928_v21 = vsel %vm391_vm1, %v1923_v17, -inf }
0x14ef   :  { %1929 = vmax.xlane.f32.xlu2 %v1928_v21 }
0x14f3   :  { %v1925_v12 = vpop.f32.mrf.mxu0 }
0x14f4   :  { %v1926_v29 = vadd.f32 %v3641_v28, %v1925_v12 }
0x14f6   :  { %v1931_v18 = vsel %vm391_vm1, %v1926_v29, -inf }
0x14f7   :  { %1932 = vmax.xlane.f32.xlu0 %v1931_v18 }
0x14fb   :  { %v2072_v14 = vpop.f32.mrf.mxu0 }
0x14fc   :  { %v2073_v32 = vadd.f32 %v2741_v22, %v2072_v14 }
0x1503   :  { %v2075_v30 = vpop.f32.mrf.mxu0 }
0x1504   :  { %v2076_v31 = vadd.f32 %v2741_v22, %v2075_v30 }
0x1506   :  { %2671 = vmatpush.xpose.msk.msra.mxu2 %vm355_vm0, %v2076_v31 }
0x150a   :  { %2672 = vmatpush.xpose.msk.msra.mxu2 %vm355_vm0, %v2073_v32 }
0x1562   :  { %v1930_v23 = vpop.xlane.xlu2 %1929 }
0x1563   :  { %v1934_v33 = vsub.f32 %v1923_v17, %v1930_v23 }
0x1565   :  { %v1936_v27 = vmul.f32 1.442695, %v1934_v33 }
0x1567   :  { %2818 = vpow2.f32 %v1936_v27 }
0x156a   :  { %v1933_v34 = vpop.xlane.xlu0 %1932 }
0x156b   :  { %v1935_v35 = vsub.f32 %v1926_v29, %v1933_v34 }
0x156d   :  { %v2819_v36 = vpop.eup %2818  ;;  %v1938_v37 = vmul.f32 1.442695, %v1935_v35 }
0x156e   :  { %v1940_v39 = vsel %vm391_vm1, %v2819_v36, 0.0 }
0x156f   :  { %2820 = vpow2.f32 %v1938_v37  ;;  %1941 = vadd.xlane.f32.xlu1 %v1940_v39 }
0x1575   :  { %v2821_v40 = vpop.eup %2820 }
0x1576   :  { %v1943_v41 = vsel %vm391_vm1, %v2821_v40, 0.0 }
0x1577   :  { %1944 = vadd.xlane.f32.xlu2 %v1943_v41 }
0x15e2   :  { %v1942_v47 = vpop.xlane.xlu1 %1941 }
0x15e3   :  { %2822 = vrcp.f32 %v1942_v47 }
0x15e9   :  { %v2823_v48 = vpop.eup %2822 }
0x15ea   :  { %v1948_v50 = vmul.f32 %v2823_v48, %v2819_v36  ;;  %v1945_v51 = vpop.xlane.xlu2 %1944 }
0x15eb   :  { %2824 = vrcp.f32 %v1945_v51  ;;  %v2684_v51 = vld [vmem:[%s3966_s18 + $0x30] sm:$0xff] }
0x15ec   :  { %2645 = vmatmul.msk.f32.vlgmr.msrb.gmra.mxu1 %vm391_vm1, %v1948_v50  ;;  %v2685_v50 = vld [vmem:[%s3966_s18 + $0x38] sm:$0xff] }
0x15ed   :  { %2318 = vmatpush.msrb.mxu1 %v2685_v50 }
0x15ef   :  { %2319 = vmatpush.msrb.mxu1 %v2684_v51 }
0x15f1   :  { %v2825_v52 = vpop.eup %2824 }
0x15f2   :  { %v1949_v53 = vmul.f32 %v2825_v52, %v2821_v40  ;;  %v2683_v52 = vld [vmem:[%s3966_s18 + $0x28] sm:$0xff] }
0x15f3   :  { %2320 = vmatpush.msrb.mxu1 %v2683_v52  ;;  %v2394_v52 = vld [vmem:[%s3970_s22 + $0x10] sm:$0xff] }
0x15f4   :  { %2646 = vmatmul.msk.f32.gmra.mxu1 %vm391_vm1, %v1949_v53  ;;  %v2682_v53 = vld [vmem:[%s3966_s18 + $0x20] sm:$0xff] }
0x15f5   :  { %2321 = vmatpush.msrb.mxu1 %v2682_v53  ;;  %v2393_v53 = vld [vmem:[%s3970_s22 + $0x8] sm:$0xff] }
0x15fc   :  { %2669 = vmatmul.msk.f32.vlgmr.msra.gmra.mxu1 %vm135_vm2, %v3578_v56  ;;  %v2043_v56 = vadd.f32 %v2740_v57, %v2042_v59 }
0x1604   :  { %2670 = vmatmul.msk.f32.gmra.mxu1 %vm135_vm2, %v3587_v61  ;;  %v2742_v61 = vld [vmem:[%s3961_s13 + $0x7] ss:$0 sm:$0xff] }
0x1669   :  { %v1973_v7 = vpop.f32.mrf.mxu1 }
0x166a   :  { %2648 = vmatmul.msk.f32.vlgmr.msrb.gmra.mxu2 %vm355_vm0, %v1973_v7 }
0x1671   :  { %v1976_v54 = vpop.f32.mrf.mxu1 }
0x1672   :  { %2649 = vmatmul.msk.f32.gmra.mxu2 %vm355_vm0, %v1976_v54 }
0x1679   :  { %v2105_v58 = vpop.f32.mrf.mxu1 }
0x167a   :  { %2673 = vmatmul.msk.f32.vlgmr.msra.gmra.mxu2 %vm355_vm0, %v2040_v13  ;;  %v2106_v0 = vadd.f32 %v2742_v61, %v2105_v58 }
0x1681   :  { %v2108_v62 = vpop.f32.mrf.mxu1 }
0x1682   :  { %v2109_v63 = vadd.f32 %v2742_v61, %v2108_v62  ;;  %2674 = vmatmul.msk.f32.gmra.mxu2 %vm355_vm0, %v2043_v56 }
0x1684   :  { %2188 = vmatpush.msra.mxu3 %v2109_v63 }
0x1686   :  { %2189 = vmatpush.msra.mxu3 %v2106_v0 }
0x16ed   :  { %v2004_v60 = vpop.f32.mrf.mxu2 }
0x16ee   :  { %v2010_v1 = vadd.f32 %v2004_v60, %v3794_v15 }
0x16f5   :  { %v2007_v3 = vpop.f32.mrf.mxu2 }
0x16f6   :  { %v2011_v5 = vadd.f32 %v2007_v3, %v3797_v20  ;;  %v2743_v3 = vld [vmem:[%s3964_s16 + $0x1] ss:$0 sm:$0xff] }
0x16fd   :  { %v2140_v6 = vpop.f32.mrf.mxu2 }
0x16fe   :  { %v2141_v8 = vadd.f32 %v3634_v25, %v2140_v6 }
0x1700   :  { %v2146_v9 = vsel %vm391_vm1, %v2141_v8, -inf }
0x1701   :  { %2147 = vmax.xlane.f32.xlu0 %v2146_v9 }
0x1705   :  { %v2143_v45 = vpop.f32.mrf.mxu2 }
0x1706   :  { %v2144_v10 = vadd.f32 %v3641_v28, %v2143_v45  ;;  %v2677_v28 = vld [vmem:[%s3962_s14 + $0x38] sm:$0xff] }
0x1707   :  { %2220 = vmatpush.msrb.mxu0 %v2677_v28  ;;  %v2691_v28 = vld [vmem:[%s3968_s20 + $0x50] sm:$0xff] }
0x1708   :  { %v2149_v11 = vsel %vm391_vm1, %v2144_v10, -inf }
0x1709   :  { %2150 = vmax.xlane.f32.xlu1 %v2149_v11 }
0x1774   :  { %v2148_v49 = vpop.xlane.xlu0 %2147 }
0x1775   :  { %v2152_v16 = vsub.f32 %v2141_v8, %v2148_v49 }
0x1777   :  { %v2154_v19 = vmul.f32 1.442695, %v2152_v16 }
0x1779   :  { %2826 = vpow2.f32 %v2154_v19 }
0x177c   :  { %v2151_v15 = vpop.xlane.xlu1 %2150 }
0x177d   :  { %v2153_v24 = vsub.f32 %v2144_v10, %v2151_v15 }
0x177f   :  { %v2827_v26 = vpop.eup %2826  ;;  %v2156_v20 = vmul.f32 1.442695, %v2153_v24 }
0x1780   :  { %v2158_v17 = vsel %vm391_vm1, %v2827_v26, 0.0 }
0x1781   :  { %2828 = vpow2.f32 %v2156_v20  ;;  %2159 = vadd.xlane.f32.xlu2 %v2158_v17  ;;  %v2695_v20 = vld [vmem:[%s3968_s20 + $0x70] sm:$0xff]  ;;  %v2694_v17 = vld [vmem:[%s3968_s20 + $0x68] sm:$0xff] }
0x1787   :  { %v2829_v25 = vpop.eup %2828 }
0x1788   :  { %v2161_v21 = vsel %vm391_vm1, %v2829_v25, 0.0 }
0x1789   :  { %2162 = vadd.xlane.f32.xlu0 %v2161_v21  ;;  %v2692_v21 = vld [vmem:[%s3968_s20 + $0x58] sm:$0xff] }
0x17f4   :  { %v2160_v12 = vpop.xlane.xlu2 %2159 }
0x17f5   :  { %2830 = vrcp.f32 %v2160_v12  ;;  %v2690_v12 = vld [vmem:[%s3968_s20 + $0x48] sm:$0xff] }
0x17fb   :  { %v2831_v29 = vpop.eup %2830 }
0x17fc   :  { %v2166_v18 = vmul.f32 %v2831_v29, %v2827_v26  ;;  %v2163_v14 = vpop.xlane.xlu0 %2162  ;;  %v2696_v26 = vld [vmem:[%s3968_s20 + $0x78] sm:$0xff]  ;;  %v2689_v29 = vld [vmem:[%s3968_s20 + $0x40] sm:$0xff] }
0x17fd   :  { %2832 = vrcp.f32 %v2163_v14  ;;  %2375 = vmatpush.msrb.mxu2 %v2696_v26 }
0x17fe   :  { %2675 = vmatmul.msk.f32.vlgmr.msra.gmra.mxu3 %vm391_vm1, %v2166_v18  ;;  %v2745_v18 = vld [vmem:[%s4000_s3 + $0x1] ss:$0 sm:$0xff] }
0x17ff   :  { %2376 = vmatpush.msrb.mxu2 %v2695_v20 }
0x1801   :  { %2377 = vmatpush.msrb.mxu2 %v2694_v17 }
0x1803   :  { %v2833_v22 = vpop.eup %2832 }
0x1804   :  { %v2167_v30 = vmul.f32 %v2833_v22, %v2829_v25  ;;  %v2693_v25 = vld [vmem:[%s3968_s20 + $0x60] sm:$0xff] }
0x1805   :  { %2378 = vmatpush.msrb.mxu2 %v2693_v25 }
0x1806   :  { %2676 = vmatmul.msk.f32.gmra.mxu3 %vm391_vm1, %v2167_v30  ;;  %v2395_v30 = vld [vmem:[%s3970_s22 + $0x18] sm:$0xff] }
0x1807   :  { %2379 = vmatpush.msrb.mxu2 %v2692_v21  ;;  %2418 = vmatpush.msrb.mxu3 %v2395_v30 }
0x1809   :  { %2380 = vmatpush.msrb.mxu2 %v2691_v28  ;;  %2419 = vmatpush.msrb.mxu3 %v2394_v52 }
0x180b   :  { %2381 = vmatpush.msrb.mxu2 %v2690_v12  ;;  %2420 = vmatpush.msrb.mxu3 %v2393_v53 }
0x180d   :  { %2382 = vmatpush.msrb.mxu2 %v2689_v29 }
0x1881   :  { %v2191_v31 = vpop.f32.mrf.mxu3 }
0x1882   :  { %2678 = vmatmul.msk.f32.vlgmr.msrb.gmra.mxu0 %vm355_vm0, %v2191_v31 }
0x1889   :  { %v2194_v32 = vpop.f32.mrf.mxu3 }
0x188a   :  { %2679 = vmatmul.msk.f32.gmra.mxu0 %vm355_vm0, %v2194_v32 }
0x18ff   :  { %v2222_v23 = vpop.f32.mrf.mxu0 }
0x1900   :  { %v2228_v33 = vadd.f32 %v2222_v23, %v2010_v1 }
0x1902   :  { %v3857_v27 = vadd.f32 %v2228_v33, %v3498_v2 }
0x1904   :  { %v2236_v34 = vsel %vm135_vm2, %v3857_v27, 0.0 }
0x1905   :  { %2237 = vadd.xlane.f32.xlu1 %v2236_v34 }
0x1907   :  { %v2225_v35 = vpop.f32.mrf.mxu0 }
0x1908   :  { %v2229_v36 = vadd.f32 %v2225_v35, %v2011_v5 }
0x190a   :  { %v3862_v37 = vadd.f32 %v2229_v36, %v3503_v4 }
0x190c   :  { %v2239_v39 = vsel %vm135_vm2, %v3862_v37, 0.0 }
0x190d   :  { %2240 = vadd.xlane.f32.xlu2 %v2239_v39 }
0x1978   :  { %v2238_v40 = vpop.xlane.xlu1 %2237 }
0x1979   :  { %v2242_v41 = vmul.f32 %v2238_v40, %v3061_v38 }
0x197b   :  { %v2244_v42 = vsub.f32 %v3857_v27, %v2242_v41 }
0x197d   :  { %v2246_v2 = vmul.f32 %v2244_v42, %v2244_v42 }
0x197f   :  { %v2248_v43 = vsel %vm135_vm2, %v2246_v2, 0.0 }
0x1980   :  { %2249 = vadd.xlane.f32.xlu0 %v2248_v43  ;;  %v2241_v44 = vpop.xlane.xlu2 %2240 }
0x1981   :  { %v2243_v46 = vmul.f32 %v2241_v44, %v3061_v38 }
0x1983   :  { %v2245_v47 = vsub.f32 %v3862_v37, %v2243_v46 }
0x1985   :  { %v2247_v4 = vmul.f32 %v2245_v47, %v2245_v47 }
0x1987   :  { %v2251_v48 = vsel %vm135_vm2, %v2247_v4, 0.0 }
0x1988   :  { %2252 = vadd.xlane.f32.xlu1 %v2251_v48 }
0x19f3   :  { %v2250_v7 = vpop.xlane.xlu0 %2249 }
0x19f4   :  { %v2254_v54 = vmul.f32 %v2250_v7, %v3061_v38  ;;  %v2392_v7 = vld [vmem:[%s3970_s22] sm:$0xff] }
0x19f5   :  { %2421 = vmatpush.msrb.mxu3 %v2392_v7 }
0x19f6   :  { %v2256_v55 = vadd.f32 1e-05, %v2254_v54  ;;  %v2746_v54 = vld [vmem:[%s3969_s21 + $0x1] ss:$0 sm:$0xff]  ;;  %s2873_s21 = smov [#allocation2]  }
0x19f7   :  { %s2436_s22 = sshll.u32 %s2873_s21, 4  ;;  %s2437_s22 = int_to_ptr.vmem [resolvable:$true] %s2436_s22 }
0x19f8   :  { %2834 = vrsqrt.f32 %v2256_v55  ;;  %vm2264_vm1 = vweird.f32 %v2256_v55 }
0x19fb   :  { %v2253_v57 = vpop.xlane.xlu1 %2252 }
0x19fc   :  { %v2255_v13 = vmul.f32 %v2253_v57, %v3061_v38  ;;  %v2744_v38 = vld [vmem:[%s3965_s17 + $0x1] ss:$0 sm:$0xff] }
0x19fe   :  { %v2835_v58 = vpop.eup %2834  ;;  %v2257_v59 = vadd.f32 1e-05, %v2255_v13 }
0x19ff   :  { %v2259_v56 = vmul.f32 %v2835_v58, %v2256_v55  ;;  %vm2265_vm0 = vweird.f32 %v2835_v58 }
0x1a00   :  { %2836 = vrsqrt.f32 %v2257_v59  ;;  %vm2266_vm3 = vmor %vm2264_vm1, %vm2265_vm0  ;;  %vm2274_vm5 = vweird.f32 %v2257_v59 }
0x1a01   :  { %v2260_v61 = vmul.f32 %v2835_v58, %v2259_v56 }
0x1a03   :  { %v2261_v62 = vmul.f32 0.5, %v2260_v61  ;;  %v2747_v61 = vld [vmem:[%s3971_s23] ss:$0 sm:$0xff] }
0x1a05   :  { %v2262_v63 = vsub.f32 1.5, %v2261_v62 }
0x1a06   :  { %v2837_v0 = vpop.eup %2836 }
0x1a07   :  { %v2263_v60 = vmul.f32 %v2835_v58, %v2262_v63  ;;  %v2269_v1 = vmul.f32 %v2837_v0, %v2257_v59  ;;  %vm2275_vm4 = vweird.f32 %v2837_v0 }
0x1a08   :  { %vm2276_vm6 = vmor %vm2274_vm5, %vm2275_vm4 }
0x1a09   :  { %v2267_v5 = vsel %vm2266_vm3, %v2835_v58, %v2263_v60  ;;  %v2270_v6 = vmul.f32 %v2837_v0, %v2269_v1 }
0x1a0a   :  { %v2278_v8 = vmul.f32 %v2267_v5, %v2244_v42 }
0x1a0b   :  { %v2271_v9 = vmul.f32 0.5, %v2270_v6 }
0x1a0c   :  { %v2283_v45 = vmul.f32 %v2743_v3, %v2278_v8 }
0x1a0d   :  { %v2272_v10 = vsub.f32 1.5, %v2271_v9 }
0x1a0e   :  { %v2288_v11 = vadd.f32 %v2744_v38, %v2283_v45 }
0x1a0f   :  { %v2273_v49 = vmul.f32 %v2837_v0, %v2272_v10 }
0x1a10   :  { %2687 = vmatmul.msk.f32.vlgmr.msrb.gmra.mxu1 %vm135_vm2, %v2288_v11 }
0x1a11   :  { %v2277_v16 = vsel %vm2276_vm6, %v2837_v0, %v2273_v49 }
0x1a12   :  { %v2279_v19 = vmul.f32 %v2277_v16, %v2245_v47 }
0x1a14   :  { %v2284_v15 = vmul.f32 %v2743_v3, %v2279_v19 }
0x1a16   :  { %v2289_v24 = vadd.f32 %v2744_v38, %v2284_v15 }
0x1a18   :  { %2688 = vmatmul.msk.f32.gmra.mxu1 %vm135_vm2, %v2289_v24 }
0x1a8d   :  { %v2323_v14 = vpop.f32.mrf.mxu1 }
0x1a8e   :  { %v2324_v22 = vadd.f32 %v2745_v18, %v2323_v14 }
0x1a90   :  { %v2329_v31 = vmul.f32 %v2324_v22, %v2324_v22 }
0x1a92   :  { %v2331_v32 = vmul.f32 %v2329_v31, %v2324_v22 }
0x1a94   :  { %v2333_v23 = vmul.f32 0.044715, %v2331_v32 }
0x1a95   :  { %v2326_v33 = vpop.f32.mrf.mxu1 }
0x1a96   :  { %v2335_v34 = vadd.f32 %v2333_v23, %v2324_v22  ;;  %v2327_v35 = vadd.f32 %v2745_v18, %v2326_v33 }
0x1a98   :  { %v2337_v36 = vmul.f32 0.7978846, %v2335_v34  ;;  %v2330_v39 = vmul.f32 %v2327_v35, %v2327_v35 }
0x1a9a   :  { %2838 = vtanh.f32 %v2337_v36  ;;  %v2332_v40 = vmul.f32 %v2330_v39, %v2327_v35 }
0x1a9c   :  { %v2334_v41 = vmul.f32 0.044715, %v2332_v40 }
0x1a9e   :  { %v2336_v42 = vadd.f32 %v2334_v41, %v2327_v35 }
0x1aa0   :  { %v2839_v2 = vpop.eup %2838  ;;  %v2338_v43 = vmul.f32 0.7978846, %v2336_v42 }
0x1aa1   :  { %v2341_v44 = vadd.f32 1.0, %v2839_v2 }
0x1aa2   :  { %2840 = vtanh.f32 %v2338_v43 }
0x1aa3   :  { %v2343_v46 = vmul.f32 0.5, %v2341_v44 }
0x1aa5   :  { %v2345_v47 = vmul.f32 %v2343_v46, %v2324_v22 }
0x1aa7   :  { %2698 = vmatmul.msk.f32.vlgmr.msrb.gmra.mxu2 %vm1257_vm9, %v2345_v47 }
0x1aa8   :  { %v2841_v4 = vpop.eup %2840 }
0x1aa9   :  { %v2342_v48 = vadd.f32 1.0, %v2841_v4 }
0x1aab   :  { %v2344_v50 = vmul.f32 0.5, %v2342_v48 }
0x1aad   :  { %v2346_v51 = vmul.f32 %v2344_v50, %v2327_v35 }
0x1aaf   :  { %2699 = vmatmul.msk.f32.gmra.mxu2 %vm1257_vm9, %v2346_v51 }
0x1b2a   :  { %v2384_v55 = vpop.f32.mrf.mxu2 }
0x1b2b   :  { %v2385_v57 = vadd.f32 %v2746_v54, %v2384_v55 }
0x1b2d   :  { %v2390_v13 = vadd.f32 %v2385_v57, %v3857_v27 }
0x1b2f   :  { %2700 = vmatmul.msk.f32.vlgmr.msrb.gmra.mxu3 %vm135_vm2, %v2390_v13 }
0x1b32   :  { %v2387_v58 = vpop.f32.mrf.mxu2 }
0x1b33   :  { %v2388_v59 = vadd.f32 %v2746_v54, %v2387_v58 }
0x1b35   :  { %v2391_v56 = vadd.f32 %v2388_v59, %v3862_v37 }
0x1b37   :  { %2701 = vmatmul.msk.f32.gmra.mxu3 %vm135_vm2, %v2391_v56 }
0x1bb2   :  { %v2423_v62 = vpop.f32.mrf.mxu3 }
0x1bb3   :  { %v2424_v63 = vadd.f32 %v2747_v61, %v2423_v62 }
0x1bb5   :  { %2429 = vst [vmem:[#allocation2] sm:$0x1] %v2424_v63 }
0x1bba   :  { %v2426_v27 = vpop.f32.mrf.mxu3 }
0x1bbb   :  { %v2427_v0 = vadd.f32 %v2747_v61, %v2426_v27 }
0x1bbd   :  { %2430 = vst [vmem:[#allocation2 + $0x1] sm:$0x1] %v2427_v0 }
0x1bbe   :  { %2441 = dma.vmem_to_hbm [thread:$0]  %s2437_s22, 32, %s2439_s30, [#allocation3]  }
0x1bbf   :  { %2868 = dma.done.wait [#allocation3], 32  }
0x1bc0   :  { %2869 = vsyncadd [#allocation3], 4294967264 }
0x1bc1   :  { %2446 = vsyncpa [#allocation3], 1 }

</bundles_post_ra>
